<compile_context>
chip_gen: v5e
topology: v5e:2x2
jax: 0.10.0
libtpu: 0.0.40
codegen_flags: <defaults>
</compile_context>

<pallas_src>
import functools

import jax
import jax.numpy as jnp
from jax.experimental import pallas as pl
from jax.experimental.pallas import tpu as pltpu

KH = KW = 3          # kernel size
SH = SW = 2          # stride
PAD = 1              # padding
EPS = 1e-5           # BatchNorm eps


def _conv_bn_kernel(x_ref, w_ref, g_ref, b_ref, o_ref, *, valid_rows):
    # One long-K MXU matmul, f32 accumulation: (M_pad, 9*Cin) x (9*Cin, BC).
    acc = jnp.dot(x_ref[...], w_ref[...], preferred_element_type=jnp.float32)

    # Fused BatchNorm2d, single-pass batch statistics (training mode).
    # Zero-padded rows contribute nothing to the sums; divide by the true count.
    cnt = float(valid_rows)
    s = jnp.sum(acc, axis=0, keepdims=True)                 # (1, BC)
    ss = jnp.sum(acc * acc, axis=0, keepdims=True)          # (1, BC)
    mean = s / cnt
    var = ss / cnt - mean * mean
    scale = g_ref[...] * jax.lax.rsqrt(var + EPS)           # EUP slot
    shift = b_ref[...] - mean * scale
    o_ref[...] = acc * scale + shift


def relu_conv_bn(x_nchw, w_oihw, gamma, beta):
    """Forward pass of the PyTorch module M (training-mode BatchNorm)."""
    N, Cin, H, W = x_nchw.shape
    Cout = w_oihw.shape[0]
    Ho = (H + 2 * PAD - KH) // SH + 1
    Wo = (W + 2 * PAD - KW) // SW + 1
    NHW = N * Ho * Wo
    M_pad = ((NHW + 15) // 16) * 16          # 16-row alignment for bf16 tiles
    K = KH * KW * Cin
    BC = 128 if (Cout % 128 == 0) else Cout  # Cout block (grid over Cout)

    # ---- wrapper-side layout: NCHW->NHWC, ReLU (f32), cast bf16, zero-pad,
    #      im2col into a contiguous (M_pad, 9*Cin) slab.
    x = jnp.transpose(x_nchw, (0, 2, 3, 1)).astype(jnp.float32)       # NHWC
    x = jnp.maximum(x, 0.0).astype(jnp.bfloat16)                      # fused ReLU
    x = jnp.pad(x, ((0, 0), (PAD, PAD), (PAD, PAD), (0, 0)))
    taps = []
    for kh in range(KH):
        for kw in range(KW):
            taps.append(x[:, kh:kh + SH * (Ho - 1) + 1:SH,
                          kw:kw + SW * (Wo - 1) + 1:SW, :])           # (N,Ho,Wo,Cin)
    xcol = jnp.stack(taps, axis=3).reshape(NHW, K)                    # (NHW, 9*Cin)
    xcol = jnp.pad(xcol, ((0, M_pad - NHW), (0, 0)))                  # zero rows

    # Conv weights: OIHW -> HWIO, flattened to (9*Cin, Cout), bf16 for the MXU.
    wmat = (jnp.transpose(w_oihw, (2, 3, 1, 0))
            .astype(jnp.bfloat16)
            .reshape(K, Cout))

    g2 = gamma.astype(jnp.float32).reshape(1, Cout)
    b2 = beta.astype(jnp.float32).reshape(1, Cout)

    kernel = functools.partial(_conv_bn_kernel, valid_rows=NHW)

    y = pl.pallas_call(
        kernel,
        out_shape=jax.ShapeDtypeStruct((M_pad, Cout), jnp.float32),
        grid=(Cout // BC,),
        in_specs=[
            pl.BlockSpec((M_pad, K), lambda j: (0, 0)),   # im2col slab (bf16, shared)
            pl.BlockSpec((K, BC), lambda j: (0, j)),      # weight Cout block (bf16)
            pl.BlockSpec((1, BC), lambda j: (0, j)),      # gamma block
            pl.BlockSpec((1, BC), lambda j: (0, j)),      # beta block
        ],
        out_specs=pl.BlockSpec((M_pad, BC), lambda j: (0, j)),
        compiler_params=pltpu.CompilerParams(
            dimension_semantics=("parallel",)),
    )(xcol, wmat, g2, b2)

    out = y[:NHW].reshape(N, Ho, Wo, Cout)
    return jnp.transpose(out, (0, 3, 1, 2))               # back to NCHW


if __name__ == "__main__":
    key = jax.random.PRNGKey(0)
    kx, kw_, kg, kb = jax.random.split(key, 4)

    # shapes implied by the module: x120 ~ [1, 256, 28, 28] -> out [1, 256, 14, 14]
    N, C, H, W = 1, 256, 28, 28
    x = jax.random.normal(kx, (N, C, H, W), jnp.float32)
    w = jax.random.normal(kw_, (C, C, KH, KW), jnp.float32) * 0.05   # Conv2d weight (OIHW)
    gamma = 1.0 + 0.1 * jax.random.normal(kg, (C,), jnp.float32)     # BatchNorm weight
    beta = 0.1 * jax.random.normal(kb, (C,), jnp.float32)            # BatchNorm bias

    out = jax.jit(relu_conv_bn)(x, w, gamma, beta)
    out = jax.block_until_ready(out)

    # plain-JAX f32 reference for a sanity check
    xr = jnp.maximum(x, 0.0)
    yr = jax.lax.conv_general_dilated(
        jnp.transpose(xr, (0, 2, 3, 1)),
        jnp.transpose(w, (2, 3, 1, 0)),
        window_strides=(SH, SW),
        padding=((PAD, PAD), (PAD, PAD)),
        dimension_numbers=("NHWC", "HWIO", "NHWC"))
    mean = jnp.mean(yr, axis=(0, 1, 2))
    var = jnp.mean((yr - mean) ** 2, axis=(0, 1, 2))
    ref = (yr - mean) / jnp.sqrt(var + EPS) * gamma + beta
    ref = jnp.transpose(ref, (0, 3, 1, 2))

    Ho = (H + 2 * PAD - KH) // SH + 1
    Wo = (W + 2 * PAD - KW) // SW + 1
    assert out.shape == (N, C, Ho, Wo), out.shape
    max_err = float(jnp.max(jnp.abs(out - ref)))
    assert jnp.allclose(out, ref, atol=5e-2, rtol=5e-2), max_err
    print("KERNEL_OK")
</pallas_src>

<mosaic_0001>
module attributes {stable_mosaic.version = 11 : i64} {
  func.func @_conv_bn_kernel(%arg0: i32, %arg1: memref<208x2304xbf16, #tpu.memory_space<vmem>>, %arg2: memref<2304x128xbf16, #tpu.memory_space<vmem>>, %arg3: memref<1x128xf32, #tpu.memory_space<vmem>>, %arg4: memref<1x128xf32, #tpu.memory_space<vmem>>, %arg5: memref<208x128xf32, #tpu.memory_space<vmem>>) attributes {dimension_semantics = [#tpu.dimension_semantics<parallel>], iteration_bounds = array<i64: 2>, scalar_prefetch = 0 : i64, scratch_operands = 0 : i64, tpu.core_type = #tpu.core_type<tc>, window_params = [{pipeline_mode = #tpu.pipeline_mode<synchronous>, transform_indices = @transform_0, window_bounds = array<i64: 208, 2304>}, {transform_indices = @transform_1, window_bounds = array<i64: 2304, 128>}, {transform_indices = @transform_2, window_bounds = array<i64: 1, 128>}, {transform_indices = @transform_3, window_bounds = array<i64: 1, 128>}, {transform_indices = @transform_4, window_bounds = array<i64: 208, 128>}]} {
    %c0 = arith.constant 0 : index
    %c0_0 = arith.constant 0 : index
    %0 = vector.load %arg1[%c0, %c0_0] : memref<208x2304xbf16, #tpu.memory_space<vmem>>, vector<208x2304xbf16>
    %c0_1 = arith.constant 0 : index
    %c0_2 = arith.constant 0 : index
    %1 = vector.load %arg2[%c0_1, %c0_2] : memref<2304x128xbf16, #tpu.memory_space<vmem>>, vector<2304x128xbf16>
    %cst = arith.constant dense<0.000000e+00> : vector<208x128xf32>
    %2 = tpu.matmul %0, %1, %cst {dimension_numbers = #tpu.dot_dimension_numbers<[1], [0], [0], [1], [0, 0, 1, 1], [], []>} : vector<208x2304xbf16>, vector<2304x128xbf16>, vector<208x128xf32> -> vector<208x128xf32>
    %cst_3 = arith.constant dense<0.000000e+00> : vector<128xf32>
    %3 = vector.multi_reduction <add>, %2, %cst_3 [0] : vector<208x128xf32> to vector<128xf32>
    %4 = vector.shape_cast %3 : vector<128xf32> to vector<1x128xf32>
    %5 = arith.mulf %2, %2 : vector<208x128xf32>
    %cst_4 = arith.constant dense<0.000000e+00> : vector<128xf32>
    %6 = vector.multi_reduction <add>, %5, %cst_4 [0] : vector<208x128xf32> to vector<128xf32>
    %7 = vector.shape_cast %6 : vector<128xf32> to vector<1x128xf32>
    %cst_5 = arith.constant 1.960000e+02 : f32
    %8 = vector.broadcast %cst_5 : f32 to vector<1x128xf32>
    %9 = arith.divf %4, %8 : vector<1x128xf32>
    %cst_6 = arith.constant 1.960000e+02 : f32
    %10 = vector.broadcast %cst_6 : f32 to vector<1x128xf32>
    %11 = arith.divf %7, %10 : vector<1x128xf32>
    %12 = arith.mulf %9, %9 : vector<1x128xf32>
    %13 = arith.subf %11, %12 : vector<1x128xf32>
    %c0_7 = arith.constant 0 : index
    %c0_8 = arith.constant 0 : index
    %14 = vector.load %arg3[%c0_7, %c0_8] : memref<1x128xf32, #tpu.memory_space<vmem>>, vector<1x128xf32>
    %cst_9 = arith.constant 9.99999974E-6 : f32
    %15 = vector.broadcast %cst_9 : f32 to vector<1x128xf32>
    %16 = arith.addf %13, %15 : vector<1x128xf32>
    %17 = math.rsqrt %16 : vector<1x128xf32>
    %18 = arith.mulf %14, %17 : vector<1x128xf32>
    %c0_10 = arith.constant 0 : index
    %c0_11 = arith.constant 0 : index
    %19 = vector.load %arg4[%c0_10, %c0_11] : memref<1x128xf32, #tpu.memory_space<vmem>>, vector<1x128xf32>
    %20 = arith.mulf %9, %18 : vector<1x128xf32>
    %21 = arith.subf %19, %20 : vector<1x128xf32>
    %22 = vector.broadcast %18 : vector<1x128xf32> to vector<208x128xf32>
    %23 = arith.mulf %2, %22 : vector<208x128xf32>
    %24 = vector.broadcast %21 : vector<1x128xf32> to vector<208x128xf32>
    %25 = arith.addf %23, %24 : vector<208x128xf32>
    %c0_12 = arith.constant 0 : index
    %c0_13 = arith.constant 0 : index
    %26 = vector.load %arg5[%c0_12, %c0_13] : memref<208x128xf32, #tpu.memory_space<vmem>>, vector<208x128xf32>
    tpu.vector_store %arg5[%c0_12, %c0_13], %25 {strides = array<i32>} : memref<208x128xf32, #tpu.memory_space<vmem>>, vector<208x128xf32>,
    return
  }
  func.func @transform_0(%arg0: i32) -> (i32, i32) {
    %c0_i32 = arith.constant 0 : i32
    %c0_i32_0 = arith.constant 0 : i32
    %c0_i32_1 = arith.constant 0 : i32
    return %c0_i32, %c0_i32_0 : i32, i32
  }
  func.func @transform_1(%arg0: i32) -> (i32, i32) {
    %c0_i32 = arith.constant 0 : i32
    %c0_i32_0 = arith.constant 0 : i32
    return %c0_i32, %arg0 : i32, i32
  }
  func.func @transform_2(%arg0: i32) -> (i32, i32) {
    %c0_i32 = arith.constant 0 : i32
    %c0_i32_0 = arith.constant 0 : i32
    return %c0_i32, %arg0 : i32, i32
  }
  func.func @transform_3(%arg0: i32) -> (i32, i32) {
    %c0_i32 = arith.constant 0 : i32
    %c0_i32_0 = arith.constant 0 : i32
    return %c0_i32, %arg0 : i32, i32
  }
  func.func @transform_4(%arg0: i32) -> (i32, i32) {
    %c0_i32 = arith.constant 0 : i32
    %c0_i32_0 = arith.constant 0 : i32
    return %c0_i32, %arg0 : i32, i32
  }
}

</mosaic_0001>

<bundles_post_ra>
// kernel: relu_conv_bn.1
= control target key start
LH: loop header
LB: loop body
LE: loop exit
PB: predicated region body
PF: predicated region fallthrough
CT: control target
= control target key end

     0   :  { %s8897_s15 = smov 0   ;;  %s8899_s16 = smov 0   ;;  %s11718_s0 = inlined_call_operand.vmem [shape: bf16[208,2304], index: 0, kind: input, shape index: {}]   ;;  %s11719_s1 = inlined_call_operand.vmem [shape: bf16[2304,256], index: 1, kind: input, shape index: {}]   ;;  %s11720_s2 = inlined_call_operand.vmem [shape: f32[1,256], index: 2, kind: input, shape index: {}]   ;;  %s11721_s3 = inlined_call_operand.vmem [shape: f32[1,256], index: 3, kind: input, shape index: {}]   ;;  %s11722_s4 = inlined_call_operand.vmem [shape: f32[208,256], index: 4, kind: output, shape index: {}]  }
   0x1   :  { %s8901_s17 = smov 0  }
   0x2 LB: > { %s8913_s18 = sadd.s32 4294967295, %s8869_s17   ;;  %s8916_s19 = sadd.s32 1, %s8869_s17   ;;  %s8869_s17 = sphi %s8901_s17, %s11744_s17   ;;  %s8865_s16 = sphi %s8899_s16, %s11743_s16   ;;  %s8861_s15 = sphi %s8897_s15, %s11742_s15  }
   0x3   : > { %s39_s20 = ssub.s32 %s8869_s17, %s8916_s19  ;;  %s42_s21 = sadd.s32 1, %s8865_s16 }
   0x4   : > { %p40_p0 = scmp.eq.s32.totalorder %s39_s20, 0  ;;  %p49_p1 = scmp.ne.s32.totalorder %s8865_s16, %s8861_s15 }
   0x5   : > { %p50_p2 = scmp.eq.s32.totalorder %s8869_s17, 0  ;;  %p131_p3 = scmp.eq.s32.totalorder %s8913_s18, 1 }
   0x6   : > { %s8926_s22 = scalar_select %p40_p0, %s8865_s16, %s42_s21  }
   0x7   : > { %p51_p4 = por %p50_p2, %p49_p1  ;;  %p8928_p5 = por %p131_p3, %p49_p1 }
   0x8   : > { %p6903_p6 = scmp.ge.s32.totalorder %s8869_s17, 2 }
   0xa   : > { %156 = sbr.rel (%p6903_p6) target bundleno = 308 (0x134), region = 20 }
   0xf   : > { %159 = sbr.rel (!%p51_p4) target bundleno = 308 (0x134), region = 24  ;;  %s161_s24 = sand.u32 (%p51_p4), 1, %s8865_s16  }
  0x10   : > { %s6904_s25 = sshll.u32 (%p51_p4), %s8869_s17, 2  ;;  %s8815_s26 = smul.u32 (%p51_p4), 1152, %s161_s24 }
  0x11   : > { %s8938_s29 = scalar_lea.vmem (%p51_p4), %s11719_s1, %s6904_s25 }
  0x12   : > { %v182_v0 = vld [vmem:[%s8938_s29] sm:$0xf] (%p51_p4)  ;;  %v184_v1 = vld [vmem:[%s8938_s29 + $0x8] sm:$0xf] (%p51_p4)  ;;  %v186_v2 = vld [vmem:[%s8938_s29 + $0x10] sm:$0xf] (%p51_p4) }
  0x13   : > { %s8943_s30 = scalar_lea.vmem (%p51_p4), [#allocation2], %s8815_s26  ;;  %v188_v3 = vld [vmem:[%s8938_s29 + $0x18] sm:$0xf] (%p51_p4)  ;;  %v190_v4 = vld [vmem:[%s8938_s29 + $0x20] sm:$0xf] (%p51_p4) }
  0x14   : > { %183 = vst [vmem:[%s8943_s30] sm:$0xf] %v182_v0  ;;  %v192_v5 = vld [vmem:[%s8938_s29 + $0x28] sm:$0xf]  ;;  %v194_v6 = vld [vmem:[%s8938_s29 + $0x30] sm:$0xf] }
  0x15   : > { %185 = vst [vmem:[%s8943_s30 + $0x4] sm:$0xf] %v184_v1  ;;  %v196_v7 = vld [vmem:[%s8938_s29 + $0x38] sm:$0xf]  ;;  %v198_v8 = vld [vmem:[%s8938_s29 + $0x40] sm:$0xf] }
  0x16   : > { %187 = vst [vmem:[%s8943_s30 + $0x8] sm:$0xf] %v186_v2  ;;  %v200_v9 = vld [vmem:[%s8938_s29 + $0x48] sm:$0xf]  ;;  %v202_v10 = vld [vmem:[%s8938_s29 + $0x50] sm:$0xf] }
  0x17   : > { %189 = vst [vmem:[%s8943_s30 + $0xc] sm:$0xf] %v188_v3  ;;  %v204_v11 = vld [vmem:[%s8938_s29 + $0x58] sm:$0xf]  ;;  %v206_v12 = vld [vmem:[%s8938_s29 + $0x60] sm:$0xf] }
  0x18   : > { %191 = vst [vmem:[%s8943_s30 + $0x10] sm:$0xf] %v190_v4  ;;  %v208_v13 = vld [vmem:[%s8938_s29 + $0x68] sm:$0xf]  ;;  %v210_v14 = vld [vmem:[%s8938_s29 + $0x70] sm:$0xf] }
  0x19   : > { %193 = vst [vmem:[%s8943_s30 + $0x14] sm:$0xf] %v192_v5  ;;  %v212_v15 = vld [vmem:[%s8938_s29 + $0x78] sm:$0xf]  ;;  %v214_v16 = vld [vmem:[%s8938_s29 + $0x80] sm:$0xf] }
  0x1a   : > { %195 = vst [vmem:[%s8943_s30 + $0x18] sm:$0xf] %v194_v6  ;;  %v216_v17 = vld [vmem:[%s8938_s29 + $0x88] sm:$0xf]  ;;  %v218_v18 = vld [vmem:[%s8938_s29 + $0x90] sm:$0xf] }
  0x1b   : > { %197 = vst [vmem:[%s8943_s30 + $0x1c] sm:$0xf] %v196_v7  ;;  %v220_v19 = vld [vmem:[%s8938_s29 + $0x98] sm:$0xf]  ;;  %v222_v20 = vld [vmem:[%s8938_s29 + $0xa0] sm:$0xf] }
  0x1c   : > { %199 = vst [vmem:[%s8943_s30 + $0x20] sm:$0xf] %v198_v8  ;;  %v224_v21 = vld [vmem:[%s8938_s29 + $0xa8] sm:$0xf]  ;;  %v226_v22 = vld [vmem:[%s8938_s29 + $0xb0] sm:$0xf] }
  0x1d   : > { %201 = vst [vmem:[%s8943_s30 + $0x24] sm:$0xf] %v200_v9  ;;  %v228_v23 = vld [vmem:[%s8938_s29 + $0xb8] sm:$0xf]  ;;  %v230_v24 = vld [vmem:[%s8938_s29 + $0xc0] sm:$0xf] }
  0x1e   : > { %203 = vst [vmem:[%s8943_s30 + $0x28] sm:$0xf] %v202_v10  ;;  %v232_v25 = vld [vmem:[%s8938_s29 + $0xc8] sm:$0xf]  ;;  %v234_v26 = vld [vmem:[%s8938_s29 + $0xd0] sm:$0xf] }
  0x1f   : > { %205 = vst [vmem:[%s8943_s30 + $0x2c] sm:$0xf] %v204_v11  ;;  %v236_v27 = vld [vmem:[%s8938_s29 + $0xd8] sm:$0xf]  ;;  %v238_v28 = vld [vmem:[%s8938_s29 + $0xe0] sm:$0xf] }
  0x20   : > { %207 = vst [vmem:[%s8943_s30 + $0x30] sm:$0xf] %v206_v12  ;;  %v240_v29 = vld [vmem:[%s8938_s29 + $0xe8] sm:$0xf]  ;;  %v242_v30 = vld [vmem:[%s8938_s29 + $0xf0] sm:$0xf] }
  0x21   : > { %209 = vst [vmem:[%s8943_s30 + $0x34] sm:$0xf] %v208_v13  ;;  %v244_v31 = vld [vmem:[%s8938_s29 + $0xf8] sm:$0xf]  ;;  %v246_v32 = vld [vmem:[%s8938_s29 + $0x100] sm:$0xf] }
  0x22   : > { %211 = vst [vmem:[%s8943_s30 + $0x38] sm:$0xf] %v210_v14  ;;  %v248_v33 = vld [vmem:[%s8938_s29 + $0x108] sm:$0xf]  ;;  %v250_v34 = vld [vmem:[%s8938_s29 + $0x110] sm:$0xf] }
  0x23   : > { %213 = vst [vmem:[%s8943_s30 + $0x3c] sm:$0xf] %v212_v15  ;;  %v252_v35 = vld [vmem:[%s8938_s29 + $0x118] sm:$0xf]  ;;  %v254_v36 = vld [vmem:[%s8938_s29 + $0x120] sm:$0xf] }
  0x24   : > { %215 = vst [vmem:[%s8943_s30 + $0x40] sm:$0xf] %v214_v16  ;;  %v256_v37 = vld [vmem:[%s8938_s29 + $0x128] sm:$0xf]  ;;  %v258_v38 = vld [vmem:[%s8938_s29 + $0x130] sm:$0xf] }
  0x25   : > { %217 = vst [vmem:[%s8943_s30 + $0x44] sm:$0xf] %v216_v17  ;;  %v260_v39 = vld [vmem:[%s8938_s29 + $0x138] sm:$0xf]  ;;  %v262_v40 = vld [vmem:[%s8938_s29 + $0x140] sm:$0xf] }
  0x26   : > { %219 = vst [vmem:[%s8943_s30 + $0x48] sm:$0xf] %v218_v18  ;;  %v264_v41 = vld [vmem:[%s8938_s29 + $0x148] sm:$0xf]  ;;  %v266_v42 = vld [vmem:[%s8938_s29 + $0x150] sm:$0xf] }
  0x27   : > { %221 = vst [vmem:[%s8943_s30 + $0x4c] sm:$0xf] %v220_v19  ;;  %v268_v43 = vld [vmem:[%s8938_s29 + $0x158] sm:$0xf]  ;;  %v270_v44 = vld [vmem:[%s8938_s29 + $0x160] sm:$0xf] }
  0x28   : > { %223 = vst [vmem:[%s8943_s30 + $0x50] sm:$0xf] %v222_v20  ;;  %v272_v45 = vld [vmem:[%s8938_s29 + $0x168] sm:$0xf]  ;;  %v274_v46 = vld [vmem:[%s8938_s29 + $0x170] sm:$0xf] }
  0x29   : > { %225 = vst [vmem:[%s8943_s30 + $0x54] sm:$0xf] %v224_v21  ;;  %v276_v47 = vld [vmem:[%s8938_s29 + $0x178] sm:$0xf]  ;;  %v278_v48 = vld [vmem:[%s8938_s29 + $0x180] sm:$0xf] }
  0x2a   : > { %227 = vst [vmem:[%s8943_s30 + $0x58] sm:$0xf] %v226_v22  ;;  %v280_v49 = vld [vmem:[%s8938_s29 + $0x188] sm:$0xf]  ;;  %v282_v50 = vld [vmem:[%s8938_s29 + $0x190] sm:$0xf] }
  0x2b   : > { %229 = vst [vmem:[%s8943_s30 + $0x5c] sm:$0xf] %v228_v23  ;;  %v284_v51 = vld [vmem:[%s8938_s29 + $0x198] sm:$0xf]  ;;  %v286_v52 = vld [vmem:[%s8938_s29 + $0x1a0] sm:$0xf] }
  0x2c   : > { %231 = vst [vmem:[%s8943_s30 + $0x60] sm:$0xf] %v230_v24  ;;  %v288_v53 = vld [vmem:[%s8938_s29 + $0x1a8] sm:$0xf]  ;;  %v290_v54 = vld [vmem:[%s8938_s29 + $0x1b0] sm:$0xf] }
  0x2d   : > { %233 = vst [vmem:[%s8943_s30 + $0x64] sm:$0xf] %v232_v25  ;;  %v292_v55 = vld [vmem:[%s8938_s29 + $0x1b8] sm:$0xf]  ;;  %v294_v56 = vld [vmem:[%s8938_s29 + $0x1c0] sm:$0xf] }
  0x2e   : > { %235 = vst [vmem:[%s8943_s30 + $0x68] sm:$0xf] %v234_v26  ;;  %v296_v57 = vld [vmem:[%s8938_s29 + $0x1c8] sm:$0xf]  ;;  %v298_v58 = vld [vmem:[%s8938_s29 + $0x1d0] sm:$0xf] }
  0x2f   : > { %237 = vst [vmem:[%s8943_s30 + $0x6c] sm:$0xf] %v236_v27  ;;  %v300_v59 = vld [vmem:[%s8938_s29 + $0x1d8] sm:$0xf]  ;;  %v302_v60 = vld [vmem:[%s8938_s29 + $0x1e0] sm:$0xf] }
  0x30   : > { %239 = vst [vmem:[%s8943_s30 + $0x70] sm:$0xf] %v238_v28  ;;  %v304_v61 = vld [vmem:[%s8938_s29 + $0x1e8] sm:$0xf]  ;;  %v306_v62 = vld [vmem:[%s8938_s29 + $0x1f0] sm:$0xf] }
  0x31   : > { %241 = vst [vmem:[%s8943_s30 + $0x74] sm:$0xf] %v240_v29  ;;  %v308_v63 = vld [vmem:[%s8938_s29 + $0x1f8] sm:$0xf]  ;;  %v310_v0 = vld [vmem:[%s8938_s29 + $0x200] sm:$0xf] }
  0x32   : > { %243 = vst [vmem:[%s8943_s30 + $0x78] sm:$0xf] %v242_v30  ;;  %v312_v1 = vld [vmem:[%s8938_s29 + $0x208] sm:$0xf]  ;;  %v314_v2 = vld [vmem:[%s8938_s29 + $0x210] sm:$0xf] }
  0x33   : > { %245 = vst [vmem:[%s8943_s30 + $0x7c] sm:$0xf] %v244_v31  ;;  %v316_v3 = vld [vmem:[%s8938_s29 + $0x218] sm:$0xf]  ;;  %v318_v4 = vld [vmem:[%s8938_s29 + $0x220] sm:$0xf] }
  0x34   : > { %247 = vst [vmem:[%s8943_s30 + $0x80] sm:$0xf] %v246_v32  ;;  %v320_v5 = vld [vmem:[%s8938_s29 + $0x228] sm:$0xf]  ;;  %v322_v6 = vld [vmem:[%s8938_s29 + $0x230] sm:$0xf] }
  0x35   : > { %249 = vst [vmem:[%s8943_s30 + $0x84] sm:$0xf] %v248_v33  ;;  %v324_v7 = vld [vmem:[%s8938_s29 + $0x238] sm:$0xf]  ;;  %v326_v8 = vld [vmem:[%s8938_s29 + $0x240] sm:$0xf] }
  0x36   : > { %251 = vst [vmem:[%s8943_s30 + $0x88] sm:$0xf] %v250_v34  ;;  %v328_v9 = vld [vmem:[%s8938_s29 + $0x248] sm:$0xf]  ;;  %v330_v10 = vld [vmem:[%s8938_s29 + $0x250] sm:$0xf] }
  0x37   : > { %253 = vst [vmem:[%s8943_s30 + $0x8c] sm:$0xf] %v252_v35  ;;  %v332_v11 = vld [vmem:[%s8938_s29 + $0x258] sm:$0xf]  ;;  %v334_v12 = vld [vmem:[%s8938_s29 + $0x260] sm:$0xf] }
  0x38   : > { %255 = vst [vmem:[%s8943_s30 + $0x90] sm:$0xf] %v254_v36  ;;  %v336_v13 = vld [vmem:[%s8938_s29 + $0x268] sm:$0xf]  ;;  %v338_v14 = vld [vmem:[%s8938_s29 + $0x270] sm:$0xf] }
  0x39   : > { %257 = vst [vmem:[%s8943_s30 + $0x94] sm:$0xf] %v256_v37  ;;  %v340_v15 = vld [vmem:[%s8938_s29 + $0x278] sm:$0xf]  ;;  %v342_v16 = vld [vmem:[%s8938_s29 + $0x280] sm:$0xf] }
  0x3a   : > { %259 = vst [vmem:[%s8943_s30 + $0x98] sm:$0xf] %v258_v38  ;;  %v344_v17 = vld [vmem:[%s8938_s29 + $0x288] sm:$0xf]  ;;  %v346_v18 = vld [vmem:[%s8938_s29 + $0x290] sm:$0xf] }
  0x3b   : > { %261 = vst [vmem:[%s8943_s30 + $0x9c] sm:$0xf] %v260_v39  ;;  %v348_v19 = vld [vmem:[%s8938_s29 + $0x298] sm:$0xf]  ;;  %v350_v20 = vld [vmem:[%s8938_s29 + $0x2a0] sm:$0xf] }
  0x3c   : > { %263 = vst [vmem:[%s8943_s30 + $0xa0] sm:$0xf] %v262_v40  ;;  %v352_v21 = vld [vmem:[%s8938_s29 + $0x2a8] sm:$0xf]  ;;  %v354_v22 = vld [vmem:[%s8938_s29 + $0x2b0] sm:$0xf] }
  0x3d   : > { %265 = vst [vmem:[%s8943_s30 + $0xa4] sm:$0xf] %v264_v41  ;;  %v356_v23 = vld [vmem:[%s8938_s29 + $0x2b8] sm:$0xf]  ;;  %v358_v24 = vld [vmem:[%s8938_s29 + $0x2c0] sm:$0xf] }
  0x3e   : > { %267 = vst [vmem:[%s8943_s30 + $0xa8] sm:$0xf] %v266_v42  ;;  %v360_v25 = vld [vmem:[%s8938_s29 + $0x2c8] sm:$0xf]  ;;  %v362_v26 = vld [vmem:[%s8938_s29 + $0x2d0] sm:$0xf] }
  0x3f   : > { %269 = vst [vmem:[%s8943_s30 + $0xac] sm:$0xf] %v268_v43  ;;  %v364_v27 = vld [vmem:[%s8938_s29 + $0x2d8] sm:$0xf]  ;;  %v366_v28 = vld [vmem:[%s8938_s29 + $0x2e0] sm:$0xf] }
  0x40   : > { %271 = vst [vmem:[%s8943_s30 + $0xb0] sm:$0xf] %v270_v44  ;;  %v368_v29 = vld [vmem:[%s8938_s29 + $0x2e8] sm:$0xf]  ;;  %v370_v30 = vld [vmem:[%s8938_s29 + $0x2f0] sm:$0xf] }
  0x41   : > { %273 = vst [vmem:[%s8943_s30 + $0xb4] sm:$0xf] %v272_v45  ;;  %v372_v31 = vld [vmem:[%s8938_s29 + $0x2f8] sm:$0xf]  ;;  %v374_v32 = vld [vmem:[%s8938_s29 + $0x300] sm:$0xf] }
  0x42   : > { %275 = vst [vmem:[%s8943_s30 + $0xb8] sm:$0xf] %v274_v46  ;;  %v376_v33 = vld [vmem:[%s8938_s29 + $0x308] sm:$0xf]  ;;  %v378_v34 = vld [vmem:[%s8938_s29 + $0x310] sm:$0xf] }
  0x43   : > { %277 = vst [vmem:[%s8943_s30 + $0xbc] sm:$0xf] %v276_v47  ;;  %v380_v35 = vld [vmem:[%s8938_s29 + $0x318] sm:$0xf]  ;;  %v382_v36 = vld [vmem:[%s8938_s29 + $0x320] sm:$0xf] }
  0x44   : > { %279 = vst [vmem:[%s8943_s30 + $0xc0] sm:$0xf] %v278_v48  ;;  %v384_v37 = vld [vmem:[%s8938_s29 + $0x328] sm:$0xf]  ;;  %v386_v38 = vld [vmem:[%s8938_s29 + $0x330] sm:$0xf] }
  0x45   : > { %281 = vst [vmem:[%s8943_s30 + $0xc4] sm:$0xf] %v280_v49  ;;  %v388_v39 = vld [vmem:[%s8938_s29 + $0x338] sm:$0xf]  ;;  %v390_v40 = vld [vmem:[%s8938_s29 + $0x340] sm:$0xf] }
  0x46   : > { %283 = vst [vmem:[%s8943_s30 + $0xc8] sm:$0xf] %v282_v50  ;;  %v392_v41 = vld [vmem:[%s8938_s29 + $0x348] sm:$0xf]  ;;  %v394_v42 = vld [vmem:[%s8938_s29 + $0x350] sm:$0xf] }
  0x47   : > { %285 = vst [vmem:[%s8943_s30 + $0xcc] sm:$0xf] %v284_v51  ;;  %v396_v43 = vld [vmem:[%s8938_s29 + $0x358] sm:$0xf]  ;;  %v398_v44 = vld [vmem:[%s8938_s29 + $0x360] sm:$0xf] }
  0x48   : > { %287 = vst [vmem:[%s8943_s30 + $0xd0] sm:$0xf] %v286_v52  ;;  %v400_v45 = vld [vmem:[%s8938_s29 + $0x368] sm:$0xf]  ;;  %v402_v46 = vld [vmem:[%s8938_s29 + $0x370] sm:$0xf] }
  0x49   : > { %289 = vst [vmem:[%s8943_s30 + $0xd4] sm:$0xf] %v288_v53  ;;  %v404_v47 = vld [vmem:[%s8938_s29 + $0x378] sm:$0xf]  ;;  %v406_v48 = vld [vmem:[%s8938_s29 + $0x380] sm:$0xf] }
  0x4a   : > { %291 = vst [vmem:[%s8943_s30 + $0xd8] sm:$0xf] %v290_v54  ;;  %v408_v49 = vld [vmem:[%s8938_s29 + $0x388] sm:$0xf]  ;;  %v410_v50 = vld [vmem:[%s8938_s29 + $0x390] sm:$0xf] }
  0x4b   : > { %293 = vst [vmem:[%s8943_s30 + $0xdc] sm:$0xf] %v292_v55  ;;  %v412_v51 = vld [vmem:[%s8938_s29 + $0x398] sm:$0xf]  ;;  %v414_v52 = vld [vmem:[%s8938_s29 + $0x3a0] sm:$0xf] }
  0x4c   : > { %295 = vst [vmem:[%s8943_s30 + $0xe0] sm:$0xf] %v294_v56  ;;  %v416_v53 = vld [vmem:[%s8938_s29 + $0x3a8] sm:$0xf]  ;;  %v418_v54 = vld [vmem:[%s8938_s29 + $0x3b0] sm:$0xf] }
  0x4d   : > { %297 = vst [vmem:[%s8943_s30 + $0xe4] sm:$0xf] %v296_v57  ;;  %v420_v55 = vld [vmem:[%s8938_s29 + $0x3b8] sm:$0xf]  ;;  %v422_v56 = vld [vmem:[%s8938_s29 + $0x3c0] sm:$0xf] }
  0x4e   : > { %299 = vst [vmem:[%s8943_s30 + $0xe8] sm:$0xf] %v298_v58  ;;  %v424_v57 = vld [vmem:[%s8938_s29 + $0x3c8] sm:$0xf]  ;;  %v426_v58 = vld [vmem:[%s8938_s29 + $0x3d0] sm:$0xf] }
  0x4f   : > { %301 = vst [vmem:[%s8943_s30 + $0xec] sm:$0xf] %v300_v59  ;;  %v428_v59 = vld [vmem:[%s8938_s29 + $0x3d8] sm:$0xf] }
  0x50   : > { %303 = vst [vmem:[%s8943_s30 + $0xf0] sm:$0xf] %v302_v60  ;;  %v430_v60 = vld [vmem:[%s8938_s29 + $0x3e0] sm:$0xf] }
  0x51   : > { %305 = vst [vmem:[%s8943_s30 + $0xf4] sm:$0xf] %v304_v61  ;;  %v432_v61 = vld [vmem:[%s8938_s29 + $0x3e8] sm:$0xf] }
  0x52   : > { %307 = vst [vmem:[%s8943_s30 + $0xf8] sm:$0xf] %v306_v62  ;;  %v434_v62 = vld [vmem:[%s8938_s29 + $0x3f0] sm:$0xf] }
  0x53   : > { %309 = vst [vmem:[%s8943_s30 + $0xfc] sm:$0xf] %v308_v63  ;;  %v436_v63 = vld [vmem:[%s8938_s29 + $0x3f8] sm:$0xf] }
  0x54   : > { %311 = vst [vmem:[%s8943_s30 + $0x100] sm:$0xf] %v310_v0  ;;  %v438_v0 = vld [vmem:[%s8938_s29 + $0x400] sm:$0xf] }
  0x55   : > { %313 = vst [vmem:[%s8943_s30 + $0x104] sm:$0xf] %v312_v1  ;;  %v440_v1 = vld [vmem:[%s8938_s29 + $0x408] sm:$0xf] }
  0x56   : > { %315 = vst [vmem:[%s8943_s30 + $0x108] sm:$0xf] %v314_v2  ;;  %v442_v2 = vld [vmem:[%s8938_s29 + $0x410] sm:$0xf] }
  0x57   : > { %317 = vst [vmem:[%s8943_s30 + $0x10c] sm:$0xf] %v316_v3  ;;  %v444_v3 = vld [vmem:[%s8938_s29 + $0x418] sm:$0xf] }
  0x58   : > { %319 = vst [vmem:[%s8943_s30 + $0x110] sm:$0xf] %v318_v4  ;;  %v446_v4 = vld [vmem:[%s8938_s29 + $0x420] sm:$0xf] }
  0x59   : > { %321 = vst [vmem:[%s8943_s30 + $0x114] sm:$0xf] %v320_v5  ;;  %v448_v5 = vld [vmem:[%s8938_s29 + $0x428] sm:$0xf] }
  0x5a   : > { %323 = vst [vmem:[%s8943_s30 + $0x118] sm:$0xf] %v322_v6  ;;  %v450_v6 = vld [vmem:[%s8938_s29 + $0x430] sm:$0xf] }
  0x5b   : > { %325 = vst [vmem:[%s8943_s30 + $0x11c] sm:$0xf] %v324_v7  ;;  %v452_v7 = vld [vmem:[%s8938_s29 + $0x438] sm:$0xf] }
  0x5c   : > { %327 = vst [vmem:[%s8943_s30 + $0x120] sm:$0xf] %v326_v8  ;;  %v454_v8 = vld [vmem:[%s8938_s29 + $0x440] sm:$0xf] }
  0x5d   : > { %329 = vst [vmem:[%s8943_s30 + $0x124] sm:$0xf] %v328_v9  ;;  %v456_v9 = vld [vmem:[%s8938_s29 + $0x448] sm:$0xf] }
  0x5e   : > { %331 = vst [vmem:[%s8943_s30 + $0x128] sm:$0xf] %v330_v10  ;;  %v458_v10 = vld [vmem:[%s8938_s29 + $0x450] sm:$0xf] }
  0x5f   : > { %333 = vst [vmem:[%s8943_s30 + $0x12c] sm:$0xf] %v332_v11  ;;  %v460_v11 = vld [vmem:[%s8938_s29 + $0x458] sm:$0xf] }
  0x60   : > { %335 = vst [vmem:[%s8943_s30 + $0x130] sm:$0xf] %v334_v12  ;;  %v462_v12 = vld [vmem:[%s8938_s29 + $0x460] sm:$0xf] }
  0x61   : > { %337 = vst [vmem:[%s8943_s30 + $0x134] sm:$0xf] %v336_v13  ;;  %v464_v13 = vld [vmem:[%s8938_s29 + $0x468] sm:$0xf] }
  0x62   : > { %339 = vst [vmem:[%s8943_s30 + $0x138] sm:$0xf] %v338_v14  ;;  %v466_v14 = vld [vmem:[%s8938_s29 + $0x470] sm:$0xf] }
  0x63   : > { %341 = vst [vmem:[%s8943_s30 + $0x13c] sm:$0xf] %v340_v15  ;;  %v468_v15 = vld [vmem:[%s8938_s29 + $0x478] sm:$0xf] }
  0x64   : > { %343 = vst [vmem:[%s8943_s30 + $0x140] sm:$0xf] %v342_v16  ;;  %v470_v16 = vld [vmem:[%s8938_s29 + $0x480] sm:$0xf] }
  0x65   : > { %345 = vst [vmem:[%s8943_s30 + $0x144] sm:$0xf] %v344_v17  ;;  %v472_v17 = vld [vmem:[%s8938_s29 + $0x488] sm:$0xf] }
  0x66   : > { %347 = vst [vmem:[%s8943_s30 + $0x148] sm:$0xf] %v346_v18  ;;  %v474_v18 = vld [vmem:[%s8938_s29 + $0x490] sm:$0xf] }
  0x67   : > { %349 = vst [vmem:[%s8943_s30 + $0x14c] sm:$0xf] %v348_v19  ;;  %v476_v19 = vld [vmem:[%s8938_s29 + $0x498] sm:$0xf] }
  0x68   : > { %351 = vst [vmem:[%s8943_s30 + $0x150] sm:$0xf] %v350_v20  ;;  %v478_v20 = vld [vmem:[%s8938_s29 + $0x4a0] sm:$0xf] }
  0x69   : > { %353 = vst [vmem:[%s8943_s30 + $0x154] sm:$0xf] %v352_v21  ;;  %v480_v21 = vld [vmem:[%s8938_s29 + $0x4a8] sm:$0xf] }
  0x6a   : > { %355 = vst [vmem:[%s8943_s30 + $0x158] sm:$0xf] %v354_v22  ;;  %v482_v22 = vld [vmem:[%s8938_s29 + $0x4b0] sm:$0xf] }
  0x6b   : > { %357 = vst [vmem:[%s8943_s30 + $0x15c] sm:$0xf] %v356_v23  ;;  %v484_v23 = vld [vmem:[%s8938_s29 + $0x4b8] sm:$0xf] }
  0x6c   : > { %359 = vst [vmem:[%s8943_s30 + $0x160] sm:$0xf] %v358_v24  ;;  %v486_v24 = vld [vmem:[%s8938_s29 + $0x4c0] sm:$0xf] }
  0x6d   : > { %361 = vst [vmem:[%s8943_s30 + $0x164] sm:$0xf] %v360_v25  ;;  %v488_v25 = vld [vmem:[%s8938_s29 + $0x4c8] sm:$0xf] }
  0x6e   : > { %363 = vst [vmem:[%s8943_s30 + $0x168] sm:$0xf] %v362_v26  ;;  %v490_v26 = vld [vmem:[%s8938_s29 + $0x4d0] sm:$0xf] }
  0x6f   : > { %365 = vst [vmem:[%s8943_s30 + $0x16c] sm:$0xf] %v364_v27  ;;  %v492_v27 = vld [vmem:[%s8938_s29 + $0x4d8] sm:$0xf] }
  0x70   : > { %367 = vst [vmem:[%s8943_s30 + $0x170] sm:$0xf] %v366_v28  ;;  %v494_v28 = vld [vmem:[%s8938_s29 + $0x4e0] sm:$0xf] }
  0x71   : > { %369 = vst [vmem:[%s8943_s30 + $0x174] sm:$0xf] %v368_v29  ;;  %v496_v29 = vld [vmem:[%s8938_s29 + $0x4e8] sm:$0xf] }
  0x72   : > { %371 = vst [vmem:[%s8943_s30 + $0x178] sm:$0xf] %v370_v30  ;;  %v498_v30 = vld [vmem:[%s8938_s29 + $0x4f0] sm:$0xf] }
  0x73   : > { %373 = vst [vmem:[%s8943_s30 + $0x17c] sm:$0xf] %v372_v31  ;;  %v500_v31 = vld [vmem:[%s8938_s29 + $0x4f8] sm:$0xf] }
  0x74   : > { %375 = vst [vmem:[%s8943_s30 + $0x180] sm:$0xf] %v374_v32  ;;  %v502_v32 = vld [vmem:[%s8938_s29 + $0x500] sm:$0xf] }
  0x75   : > { %377 = vst [vmem:[%s8943_s30 + $0x184] sm:$0xf] %v376_v33  ;;  %v504_v33 = vld [vmem:[%s8938_s29 + $0x508] sm:$0xf] }
  0x76   : > { %379 = vst [vmem:[%s8943_s30 + $0x188] sm:$0xf] %v378_v34  ;;  %v506_v34 = vld [vmem:[%s8938_s29 + $0x510] sm:$0xf] }
  0x77   : > { %381 = vst [vmem:[%s8943_s30 + $0x18c] sm:$0xf] %v380_v35  ;;  %v508_v35 = vld [vmem:[%s8938_s29 + $0x518] sm:$0xf] }
  0x78   : > { %383 = vst [vmem:[%s8943_s30 + $0x190] sm:$0xf] %v382_v36  ;;  %v510_v36 = vld [vmem:[%s8938_s29 + $0x520] sm:$0xf] }
  0x79   : > { %385 = vst [vmem:[%s8943_s30 + $0x194] sm:$0xf] %v384_v37  ;;  %v512_v37 = vld [vmem:[%s8938_s29 + $0x528] sm:$0xf] }
  0x7a   : > { %387 = vst [vmem:[%s8943_s30 + $0x198] sm:$0xf] %v386_v38  ;;  %v514_v38 = vld [vmem:[%s8938_s29 + $0x530] sm:$0xf] }
  0x7b   : > { %389 = vst [vmem:[%s8943_s30 + $0x19c] sm:$0xf] %v388_v39  ;;  %v516_v39 = vld [vmem:[%s8938_s29 + $0x538] sm:$0xf] }
  0x7c   : > { %391 = vst [vmem:[%s8943_s30 + $0x1a0] sm:$0xf] %v390_v40  ;;  %v518_v40 = vld [vmem:[%s8938_s29 + $0x540] sm:$0xf] }
  0x7d   : > { %393 = vst [vmem:[%s8943_s30 + $0x1a4] sm:$0xf] %v392_v41  ;;  %v520_v41 = vld [vmem:[%s8938_s29 + $0x548] sm:$0xf] }
  0x7e   : > { %395 = vst [vmem:[%s8943_s30 + $0x1a8] sm:$0xf] %v394_v42  ;;  %v522_v42 = vld [vmem:[%s8938_s29 + $0x550] sm:$0xf] }
  0x7f   : > { %397 = vst [vmem:[%s8943_s30 + $0x1ac] sm:$0xf] %v396_v43  ;;  %v524_v43 = vld [vmem:[%s8938_s29 + $0x558] sm:$0xf] }
  0x80   : > { %399 = vst [vmem:[%s8943_s30 + $0x1b0] sm:$0xf] %v398_v44  ;;  %v526_v44 = vld [vmem:[%s8938_s29 + $0x560] sm:$0xf] }
  0x81   : > { %401 = vst [vmem:[%s8943_s30 + $0x1b4] sm:$0xf] %v400_v45  ;;  %v528_v45 = vld [vmem:[%s8938_s29 + $0x568] sm:$0xf] }
  0x82   : > { %403 = vst [vmem:[%s8943_s30 + $0x1b8] sm:$0xf] %v402_v46  ;;  %v530_v46 = vld [vmem:[%s8938_s29 + $0x570] sm:$0xf] }
  0x83   : > { %405 = vst [vmem:[%s8943_s30 + $0x1bc] sm:$0xf] %v404_v47  ;;  %v532_v47 = vld [vmem:[%s8938_s29 + $0x578] sm:$0xf] }
  0x84   : > { %407 = vst [vmem:[%s8943_s30 + $0x1c0] sm:$0xf] %v406_v48  ;;  %v534_v48 = vld [vmem:[%s8938_s29 + $0x580] sm:$0xf] }
  0x85   : > { %409 = vst [vmem:[%s8943_s30 + $0x1c4] sm:$0xf] %v408_v49  ;;  %v536_v49 = vld [vmem:[%s8938_s29 + $0x588] sm:$0xf] }
  0x86   : > { %411 = vst [vmem:[%s8943_s30 + $0x1c8] sm:$0xf] %v410_v50  ;;  %v538_v50 = vld [vmem:[%s8938_s29 + $0x590] sm:$0xf] }
  0x87   : > { %413 = vst [vmem:[%s8943_s30 + $0x1cc] sm:$0xf] %v412_v51  ;;  %v540_v51 = vld [vmem:[%s8938_s29 + $0x598] sm:$0xf] }
  0x88   : > { %415 = vst [vmem:[%s8943_s30 + $0x1d0] sm:$0xf] %v414_v52  ;;  %v542_v52 = vld [vmem:[%s8938_s29 + $0x5a0] sm:$0xf] }
  0x89   : > { %417 = vst [vmem:[%s8943_s30 + $0x1d4] sm:$0xf] %v416_v53  ;;  %v544_v53 = vld [vmem:[%s8938_s29 + $0x5a8] sm:$0xf] }
  0x8a   : > { %419 = vst [vmem:[%s8943_s30 + $0x1d8] sm:$0xf] %v418_v54  ;;  %v546_v54 = vld [vmem:[%s8938_s29 + $0x5b0] sm:$0xf] }
  0x8b   : > { %421 = vst [vmem:[%s8943_s30 + $0x1dc] sm:$0xf] %v420_v55  ;;  %v548_v55 = vld [vmem:[%s8938_s29 + $0x5b8] sm:$0xf] }
  0x8c   : > { %423 = vst [vmem:[%s8943_s30 + $0x1e0] sm:$0xf] %v422_v56  ;;  %v550_v56 = vld [vmem:[%s8938_s29 + $0x5c0] sm:$0xf] }
  0x8d   : > { %425 = vst [vmem:[%s8943_s30 + $0x1e4] sm:$0xf] %v424_v57  ;;  %v552_v57 = vld [vmem:[%s8938_s29 + $0x5c8] sm:$0xf] }
  0x8e   : > { %427 = vst [vmem:[%s8943_s30 + $0x1e8] sm:$0xf] %v426_v58  ;;  %v554_v58 = vld [vmem:[%s8938_s29 + $0x5d0] sm:$0xf] }
  0x8f   : > { %429 = vst [vmem:[%s8943_s30 + $0x1ec] sm:$0xf] %v428_v59  ;;  %v556_v59 = vld [vmem:[%s8938_s29 + $0x5d8] sm:$0xf] }
  0x90   : > { %431 = vst [vmem:[%s8943_s30 + $0x1f0] sm:$0xf] %v430_v60  ;;  %v558_v60 = vld [vmem:[%s8938_s29 + $0x5e0] sm:$0xf] }
  0x91   : > { %433 = vst [vmem:[%s8943_s30 + $0x1f4] sm:$0xf] %v432_v61  ;;  %v560_v61 = vld [vmem:[%s8938_s29 + $0x5e8] sm:$0xf] }
  0x92   : > { %435 = vst [vmem:[%s8943_s30 + $0x1f8] sm:$0xf] %v434_v62  ;;  %v562_v62 = vld [vmem:[%s8938_s29 + $0x5f0] sm:$0xf] }
  0x93   : > { %437 = vst [vmem:[%s8943_s30 + $0x1fc] sm:$0xf] %v436_v63  ;;  %v564_v63 = vld [vmem:[%s8938_s29 + $0x5f8] sm:$0xf] }
  0x94   : > { %439 = vst [vmem:[%s8943_s30 + $0x200] sm:$0xf] %v438_v0  ;;  %v566_v0 = vld [vmem:[%s8938_s29 + $0x600] sm:$0xf] }
  0x95   : > { %441 = vst [vmem:[%s8943_s30 + $0x204] sm:$0xf] %v440_v1  ;;  %v568_v1 = vld [vmem:[%s8938_s29 + $0x608] sm:$0xf] }
  0x96   : > { %443 = vst [vmem:[%s8943_s30 + $0x208] sm:$0xf] %v442_v2  ;;  %v570_v2 = vld [vmem:[%s8938_s29 + $0x610] sm:$0xf] }
  0x97   : > { %445 = vst [vmem:[%s8943_s30 + $0x20c] sm:$0xf] %v444_v3  ;;  %v572_v3 = vld [vmem:[%s8938_s29 + $0x618] sm:$0xf] }
  0x98   : > { %447 = vst [vmem:[%s8943_s30 + $0x210] sm:$0xf] %v446_v4  ;;  %v574_v4 = vld [vmem:[%s8938_s29 + $0x620] sm:$0xf] }
  0x99   : > { %449 = vst [vmem:[%s8943_s30 + $0x214] sm:$0xf] %v448_v5  ;;  %v576_v5 = vld [vmem:[%s8938_s29 + $0x628] sm:$0xf] }
  0x9a   : > { %451 = vst [vmem:[%s8943_s30 + $0x218] sm:$0xf] %v450_v6  ;;  %v578_v6 = vld [vmem:[%s8938_s29 + $0x630] sm:$0xf] }
  0x9b   : > { %453 = vst [vmem:[%s8943_s30 + $0x21c] sm:$0xf] %v452_v7  ;;  %v580_v7 = vld [vmem:[%s8938_s29 + $0x638] sm:$0xf] }
  0x9c   : > { %455 = vst [vmem:[%s8943_s30 + $0x220] sm:$0xf] %v454_v8  ;;  %v582_v8 = vld [vmem:[%s8938_s29 + $0x640] sm:$0xf] }
  0x9d   : > { %457 = vst [vmem:[%s8943_s30 + $0x224] sm:$0xf] %v456_v9  ;;  %v584_v9 = vld [vmem:[%s8938_s29 + $0x648] sm:$0xf] }
  0x9e   : > { %459 = vst [vmem:[%s8943_s30 + $0x228] sm:$0xf] %v458_v10  ;;  %v586_v10 = vld [vmem:[%s8938_s29 + $0x650] sm:$0xf] }
  0x9f   : > { %461 = vst [vmem:[%s8943_s30 + $0x22c] sm:$0xf] %v460_v11  ;;  %v588_v11 = vld [vmem:[%s8938_s29 + $0x658] sm:$0xf] }
  0xa0   : > { %463 = vst [vmem:[%s8943_s30 + $0x230] sm:$0xf] %v462_v12  ;;  %v590_v12 = vld [vmem:[%s8938_s29 + $0x660] sm:$0xf] }
  0xa1   : > { %465 = vst [vmem:[%s8943_s30 + $0x234] sm:$0xf] %v464_v13  ;;  %v592_v13 = vld [vmem:[%s8938_s29 + $0x668] sm:$0xf] }
  0xa2   : > { %467 = vst [vmem:[%s8943_s30 + $0x238] sm:$0xf] %v466_v14  ;;  %v594_v14 = vld [vmem:[%s8938_s29 + $0x670] sm:$0xf] }
  0xa3   : > { %469 = vst [vmem:[%s8943_s30 + $0x23c] sm:$0xf] %v468_v15  ;;  %v596_v15 = vld [vmem:[%s8938_s29 + $0x678] sm:$0xf] }
  0xa4   : > { %471 = vst [vmem:[%s8943_s30 + $0x240] sm:$0xf] %v470_v16  ;;  %v598_v16 = vld [vmem:[%s8938_s29 + $0x680] sm:$0xf] }
  0xa5   : > { %473 = vst [vmem:[%s8943_s30 + $0x244] sm:$0xf] %v472_v17  ;;  %v600_v17 = vld [vmem:[%s8938_s29 + $0x688] sm:$0xf] }
  0xa6   : > { %475 = vst [vmem:[%s8943_s30 + $0x248] sm:$0xf] %v474_v18  ;;  %v602_v18 = vld [vmem:[%s8938_s29 + $0x690] sm:$0xf] }
  0xa7   : > { %477 = vst [vmem:[%s8943_s30 + $0x24c] sm:$0xf] %v476_v19  ;;  %v604_v19 = vld [vmem:[%s8938_s29 + $0x698] sm:$0xf] }
  0xa8   : > { %479 = vst [vmem:[%s8943_s30 + $0x250] sm:$0xf] %v478_v20  ;;  %v606_v20 = vld [vmem:[%s8938_s29 + $0x6a0] sm:$0xf] }
  0xa9   : > { %481 = vst [vmem:[%s8943_s30 + $0x254] sm:$0xf] %v480_v21  ;;  %v608_v21 = vld [vmem:[%s8938_s29 + $0x6a8] sm:$0xf] }
  0xaa   : > { %483 = vst [vmem:[%s8943_s30 + $0x258] sm:$0xf] %v482_v22  ;;  %v610_v22 = vld [vmem:[%s8938_s29 + $0x6b0] sm:$0xf] }
  0xab   : > { %485 = vst [vmem:[%s8943_s30 + $0x25c] sm:$0xf] %v484_v23  ;;  %v612_v23 = vld [vmem:[%s8938_s29 + $0x6b8] sm:$0xf] }
  0xac   : > { %487 = vst [vmem:[%s8943_s30 + $0x260] sm:$0xf] %v486_v24  ;;  %v614_v24 = vld [vmem:[%s8938_s29 + $0x6c0] sm:$0xf] }
  0xad   : > { %489 = vst [vmem:[%s8943_s30 + $0x264] sm:$0xf] %v488_v25  ;;  %v616_v25 = vld [vmem:[%s8938_s29 + $0x6c8] sm:$0xf] }
  0xae   : > { %491 = vst [vmem:[%s8943_s30 + $0x268] sm:$0xf] %v490_v26  ;;  %v618_v26 = vld [vmem:[%s8938_s29 + $0x6d0] sm:$0xf] }
  0xaf   : > { %493 = vst [vmem:[%s8943_s30 + $0x26c] sm:$0xf] %v492_v27  ;;  %v620_v27 = vld [vmem:[%s8938_s29 + $0x6d8] sm:$0xf] }
  0xb0   : > { %495 = vst [vmem:[%s8943_s30 + $0x270] sm:$0xf] %v494_v28  ;;  %v622_v28 = vld [vmem:[%s8938_s29 + $0x6e0] sm:$0xf] }
  0xb1   : > { %497 = vst [vmem:[%s8943_s30 + $0x274] sm:$0xf] %v496_v29  ;;  %v624_v29 = vld [vmem:[%s8938_s29 + $0x6e8] sm:$0xf] }
  0xb2   : > { %499 = vst [vmem:[%s8943_s30 + $0x278] sm:$0xf] %v498_v30  ;;  %v626_v30 = vld [vmem:[%s8938_s29 + $0x6f0] sm:$0xf] }
  0xb3   : > { %501 = vst [vmem:[%s8943_s30 + $0x27c] sm:$0xf] %v500_v31  ;;  %v628_v31 = vld [vmem:[%s8938_s29 + $0x6f8] sm:$0xf] }
  0xb4   : > { %503 = vst [vmem:[%s8943_s30 + $0x280] sm:$0xf] %v502_v32  ;;  %v630_v32 = vld [vmem:[%s8938_s29 + $0x700] sm:$0xf] }
  0xb5   : > { %505 = vst [vmem:[%s8943_s30 + $0x284] sm:$0xf] %v504_v33  ;;  %v632_v33 = vld [vmem:[%s8938_s29 + $0x708] sm:$0xf] }
  0xb6   : > { %507 = vst [vmem:[%s8943_s30 + $0x288] sm:$0xf] %v506_v34  ;;  %v634_v34 = vld [vmem:[%s8938_s29 + $0x710] sm:$0xf] }
  0xb7   : > { %509 = vst [vmem:[%s8943_s30 + $0x28c] sm:$0xf] %v508_v35  ;;  %v636_v35 = vld [vmem:[%s8938_s29 + $0x718] sm:$0xf] }
  0xb8   : > { %511 = vst [vmem:[%s8943_s30 + $0x290] sm:$0xf] %v510_v36  ;;  %v638_v36 = vld [vmem:[%s8938_s29 + $0x720] sm:$0xf] }
  0xb9   : > { %513 = vst [vmem:[%s8943_s30 + $0x294] sm:$0xf] %v512_v37  ;;  %v640_v37 = vld [vmem:[%s8938_s29 + $0x728] sm:$0xf] }
  0xba   : > { %515 = vst [vmem:[%s8943_s30 + $0x298] sm:$0xf] %v514_v38  ;;  %v642_v38 = vld [vmem:[%s8938_s29 + $0x730] sm:$0xf] }
  0xbb   : > { %517 = vst [vmem:[%s8943_s30 + $0x29c] sm:$0xf] %v516_v39  ;;  %v644_v39 = vld [vmem:[%s8938_s29 + $0x738] sm:$0xf] }
  0xbc   : > { %519 = vst [vmem:[%s8943_s30 + $0x2a0] sm:$0xf] %v518_v40  ;;  %v646_v40 = vld [vmem:[%s8938_s29 + $0x740] sm:$0xf] }
  0xbd   : > { %521 = vst [vmem:[%s8943_s30 + $0x2a4] sm:$0xf] %v520_v41  ;;  %v648_v41 = vld [vmem:[%s8938_s29 + $0x748] sm:$0xf] }
  0xbe   : > { %523 = vst [vmem:[%s8943_s30 + $0x2a8] sm:$0xf] %v522_v42  ;;  %v650_v42 = vld [vmem:[%s8938_s29 + $0x750] sm:$0xf] }
  0xbf   : > { %525 = vst [vmem:[%s8943_s30 + $0x2ac] sm:$0xf] %v524_v43  ;;  %v652_v43 = vld [vmem:[%s8938_s29 + $0x758] sm:$0xf] }
  0xc0   : > { %527 = vst [vmem:[%s8943_s30 + $0x2b0] sm:$0xf] %v526_v44  ;;  %v654_v44 = vld [vmem:[%s8938_s29 + $0x760] sm:$0xf] }
  0xc1   : > { %529 = vst [vmem:[%s8943_s30 + $0x2b4] sm:$0xf] %v528_v45  ;;  %v656_v45 = vld [vmem:[%s8938_s29 + $0x768] sm:$0xf] }
  0xc2   : > { %531 = vst [vmem:[%s8943_s30 + $0x2b8] sm:$0xf] %v530_v46  ;;  %v658_v46 = vld [vmem:[%s8938_s29 + $0x770] sm:$0xf] }
  0xc3   : > { %533 = vst [vmem:[%s8943_s30 + $0x2bc] sm:$0xf] %v532_v47  ;;  %v660_v47 = vld [vmem:[%s8938_s29 + $0x778] sm:$0xf] }
  0xc4   : > { %535 = vst [vmem:[%s8943_s30 + $0x2c0] sm:$0xf] %v534_v48  ;;  %v662_v48 = vld [vmem:[%s8938_s29 + $0x780] sm:$0xf] }
  0xc5   : > { %537 = vst [vmem:[%s8943_s30 + $0x2c4] sm:$0xf] %v536_v49  ;;  %v664_v49 = vld [vmem:[%s8938_s29 + $0x788] sm:$0xf] }
  0xc6   : > { %539 = vst [vmem:[%s8943_s30 + $0x2c8] sm:$0xf] %v538_v50  ;;  %v666_v50 = vld [vmem:[%s8938_s29 + $0x790] sm:$0xf] }
  0xc7   : > { %541 = vst [vmem:[%s8943_s30 + $0x2cc] sm:$0xf] %v540_v51  ;;  %v668_v51 = vld [vmem:[%s8938_s29 + $0x798] sm:$0xf] }
  0xc8   : > { %543 = vst [vmem:[%s8943_s30 + $0x2d0] sm:$0xf] %v542_v52  ;;  %v670_v52 = vld [vmem:[%s8938_s29 + $0x7a0] sm:$0xf] }
  0xc9   : > { %545 = vst [vmem:[%s8943_s30 + $0x2d4] sm:$0xf] %v544_v53  ;;  %v672_v53 = vld [vmem:[%s8938_s29 + $0x7a8] sm:$0xf] }
  0xca   : > { %547 = vst [vmem:[%s8943_s30 + $0x2d8] sm:$0xf] %v546_v54  ;;  %v674_v54 = vld [vmem:[%s8938_s29 + $0x7b0] sm:$0xf] }
  0xcb   : > { %549 = vst [vmem:[%s8943_s30 + $0x2dc] sm:$0xf] %v548_v55  ;;  %v676_v55 = vld [vmem:[%s8938_s29 + $0x7b8] sm:$0xf] }
  0xcc   : > { %551 = vst [vmem:[%s8943_s30 + $0x2e0] sm:$0xf] %v550_v56  ;;  %v678_v56 = vld [vmem:[%s8938_s29 + $0x7c0] sm:$0xf] }
  0xcd   : > { %553 = vst [vmem:[%s8943_s30 + $0x2e4] sm:$0xf] %v552_v57  ;;  %v680_v57 = vld [vmem:[%s8938_s29 + $0x7c8] sm:$0xf] }
  0xce   : > { %555 = vst [vmem:[%s8943_s30 + $0x2e8] sm:$0xf] %v554_v58  ;;  %v682_v58 = vld [vmem:[%s8938_s29 + $0x7d0] sm:$0xf] }
  0xcf   : > { %557 = vst [vmem:[%s8943_s30 + $0x2ec] sm:$0xf] %v556_v59  ;;  %v684_v59 = vld [vmem:[%s8938_s29 + $0x7d8] sm:$0xf] }
  0xd0   : > { %559 = vst [vmem:[%s8943_s30 + $0x2f0] sm:$0xf] %v558_v60  ;;  %v686_v60 = vld [vmem:[%s8938_s29 + $0x7e0] sm:$0xf] }
  0xd1   : > { %561 = vst [vmem:[%s8943_s30 + $0x2f4] sm:$0xf] %v560_v61  ;;  %v688_v61 = vld [vmem:[%s8938_s29 + $0x7e8] sm:$0xf] }
  0xd2   : > { %563 = vst [vmem:[%s8943_s30 + $0x2f8] sm:$0xf] %v562_v62  ;;  %v690_v62 = vld [vmem:[%s8938_s29 + $0x7f0] sm:$0xf] }
  0xd3   : > { %565 = vst [vmem:[%s8943_s30 + $0x2fc] sm:$0xf] %v564_v63  ;;  %v692_v63 = vld [vmem:[%s8938_s29 + $0x7f8] sm:$0xf] }
  0xd4   : > { %567 = vst [vmem:[%s8943_s30 + $0x300] sm:$0xf] %v566_v0  ;;  %v694_v0 = vld [vmem:[%s8938_s29 + $0x800] sm:$0xf] }
  0xd5   : > { %569 = vst [vmem:[%s8943_s30 + $0x304] sm:$0xf] %v568_v1  ;;  %v696_v1 = vld [vmem:[%s8938_s29 + $0x808] sm:$0xf] }
  0xd6   : > { %571 = vst [vmem:[%s8943_s30 + $0x308] sm:$0xf] %v570_v2  ;;  %v698_v2 = vld [vmem:[%s8938_s29 + $0x810] sm:$0xf] }
  0xd7   : > { %573 = vst [vmem:[%s8943_s30 + $0x30c] sm:$0xf] %v572_v3  ;;  %v700_v3 = vld [vmem:[%s8938_s29 + $0x818] sm:$0xf] }
  0xd8   : > { %575 = vst [vmem:[%s8943_s30 + $0x310] sm:$0xf] %v574_v4  ;;  %v702_v4 = vld [vmem:[%s8938_s29 + $0x820] sm:$0xf] }
  0xd9   : > { %577 = vst [vmem:[%s8943_s30 + $0x314] sm:$0xf] %v576_v5  ;;  %v704_v5 = vld [vmem:[%s8938_s29 + $0x828] sm:$0xf] }
  0xda   : > { %579 = vst [vmem:[%s8943_s30 + $0x318] sm:$0xf] %v578_v6  ;;  %v706_v6 = vld [vmem:[%s8938_s29 + $0x830] sm:$0xf] }
  0xdb   : > { %581 = vst [vmem:[%s8943_s30 + $0x31c] sm:$0xf] %v580_v7  ;;  %v708_v7 = vld [vmem:[%s8938_s29 + $0x838] sm:$0xf] }
  0xdc   : > { %583 = vst [vmem:[%s8943_s30 + $0x320] sm:$0xf] %v582_v8  ;;  %v710_v8 = vld [vmem:[%s8938_s29 + $0x840] sm:$0xf] }
  0xdd   : > { %585 = vst [vmem:[%s8943_s30 + $0x324] sm:$0xf] %v584_v9  ;;  %v712_v9 = vld [vmem:[%s8938_s29 + $0x848] sm:$0xf] }
  0xde   : > { %587 = vst [vmem:[%s8943_s30 + $0x328] sm:$0xf] %v586_v10  ;;  %v714_v10 = vld [vmem:[%s8938_s29 + $0x850] sm:$0xf] }
  0xdf   : > { %589 = vst [vmem:[%s8943_s30 + $0x32c] sm:$0xf] %v588_v11  ;;  %v716_v11 = vld [vmem:[%s8938_s29 + $0x858] sm:$0xf] }
  0xe0   : > { %591 = vst [vmem:[%s8943_s30 + $0x330] sm:$0xf] %v590_v12  ;;  %v718_v12 = vld [vmem:[%s8938_s29 + $0x860] sm:$0xf] }
  0xe1   : > { %593 = vst [vmem:[%s8943_s30 + $0x334] sm:$0xf] %v592_v13  ;;  %v720_v13 = vld [vmem:[%s8938_s29 + $0x868] sm:$0xf] }
  0xe2   : > { %595 = vst [vmem:[%s8943_s30 + $0x338] sm:$0xf] %v594_v14  ;;  %v722_v14 = vld [vmem:[%s8938_s29 + $0x870] sm:$0xf] }
  0xe3   : > { %597 = vst [vmem:[%s8943_s30 + $0x33c] sm:$0xf] %v596_v15  ;;  %v724_v15 = vld [vmem:[%s8938_s29 + $0x878] sm:$0xf] }
  0xe4   : > { %599 = vst [vmem:[%s8943_s30 + $0x340] sm:$0xf] %v598_v16  ;;  %v726_v16 = vld [vmem:[%s8938_s29 + $0x880] sm:$0xf] }
  0xe5   : > { %601 = vst [vmem:[%s8943_s30 + $0x344] sm:$0xf] %v600_v17  ;;  %v728_v17 = vld [vmem:[%s8938_s29 + $0x888] sm:$0xf] }
  0xe6   : > { %603 = vst [vmem:[%s8943_s30 + $0x348] sm:$0xf] %v602_v18  ;;  %v730_v18 = vld [vmem:[%s8938_s29 + $0x890] sm:$0xf] }
  0xe7   : > { %605 = vst [vmem:[%s8943_s30 + $0x34c] sm:$0xf] %v604_v19  ;;  %v732_v19 = vld [vmem:[%s8938_s29 + $0x898] sm:$0xf] }
  0xe8   : > { %607 = vst [vmem:[%s8943_s30 + $0x350] sm:$0xf] %v606_v20  ;;  %v734_v20 = vld [vmem:[%s8938_s29 + $0x8a0] sm:$0xf] }
  0xe9   : > { %609 = vst [vmem:[%s8943_s30 + $0x354] sm:$0xf] %v608_v21  ;;  %v736_v21 = vld [vmem:[%s8938_s29 + $0x8a8] sm:$0xf] }
  0xea   : > { %611 = vst [vmem:[%s8943_s30 + $0x358] sm:$0xf] %v610_v22  ;;  %v738_v22 = vld [vmem:[%s8938_s29 + $0x8b0] sm:$0xf] }
  0xeb   : > { %613 = vst [vmem:[%s8943_s30 + $0x35c] sm:$0xf] %v612_v23  ;;  %v740_v23 = vld [vmem:[%s8938_s29 + $0x8b8] sm:$0xf] }
  0xec   : > { %615 = vst [vmem:[%s8943_s30 + $0x360] sm:$0xf] %v614_v24  ;;  %v742_v24 = vld [vmem:[%s8938_s29 + $0x8c0] sm:$0xf] }
  0xed   : > { %617 = vst [vmem:[%s8943_s30 + $0x364] sm:$0xf] %v616_v25  ;;  %v744_v25 = vld [vmem:[%s8938_s29 + $0x8c8] sm:$0xf] }
  0xee   : > { %619 = vst [vmem:[%s8943_s30 + $0x368] sm:$0xf] %v618_v26  ;;  %v746_v26 = vld [vmem:[%s8938_s29 + $0x8d0] sm:$0xf] }
  0xef   : > { %621 = vst [vmem:[%s8943_s30 + $0x36c] sm:$0xf] %v620_v27  ;;  %v748_v27 = vld [vmem:[%s8938_s29 + $0x8d8] sm:$0xf] }
  0xf0   : > { %623 = vst [vmem:[%s8943_s30 + $0x370] sm:$0xf] %v622_v28  ;;  %v750_v28 = vld [vmem:[%s8938_s29 + $0x8e0] sm:$0xf] }
  0xf1   : > { %625 = vst [vmem:[%s8943_s30 + $0x374] sm:$0xf] %v624_v29  ;;  %v752_v29 = vld [vmem:[%s8938_s29 + $0x8e8] sm:$0xf] }
  0xf2   : > { %627 = vst [vmem:[%s8943_s30 + $0x378] sm:$0xf] %v626_v30  ;;  %v754_v30 = vld [vmem:[%s8938_s29 + $0x8f0] sm:$0xf] }
  0xf3   : > { %629 = vst [vmem:[%s8943_s30 + $0x37c] sm:$0xf] %v628_v31  ;;  %v756_v31 = vld [vmem:[%s8938_s29 + $0x8f8] sm:$0xf] }
  0xf4   : > { %631 = vst [vmem:[%s8943_s30 + $0x380] sm:$0xf] %v630_v32 }
  0xf5   : > { %633 = vst [vmem:[%s8943_s30 + $0x384] sm:$0xf] %v632_v33 }
  0xf6   : > { %635 = vst [vmem:[%s8943_s30 + $0x388] sm:$0xf] %v634_v34 }
  0xf7   : > { %637 = vst [vmem:[%s8943_s30 + $0x38c] sm:$0xf] %v636_v35 }
  0xf8   : > { %639 = vst [vmem:[%s8943_s30 + $0x390] sm:$0xf] %v638_v36 }
  0xf9   : > { %641 = vst [vmem:[%s8943_s30 + $0x394] sm:$0xf] %v640_v37 }
  0xfa   : > { %643 = vst [vmem:[%s8943_s30 + $0x398] sm:$0xf] %v642_v38 }
  0xfb   : > { %645 = vst [vmem:[%s8943_s30 + $0x39c] sm:$0xf] %v644_v39 }
  0xfc   : > { %647 = vst [vmem:[%s8943_s30 + $0x3a0] sm:$0xf] %v646_v40 }
  0xfd   : > { %649 = vst [vmem:[%s8943_s30 + $0x3a4] sm:$0xf] %v648_v41 }
  0xfe   : > { %651 = vst [vmem:[%s8943_s30 + $0x3a8] sm:$0xf] %v650_v42 }
  0xff   : > { %653 = vst [vmem:[%s8943_s30 + $0x3ac] sm:$0xf] %v652_v43 }
 0x100   : > { %655 = vst [vmem:[%s8943_s30 + $0x3b0] sm:$0xf] %v654_v44 }
 0x101   : > { %657 = vst [vmem:[%s8943_s30 + $0x3b4] sm:$0xf] %v656_v45 }
 0x102   : > { %659 = vst [vmem:[%s8943_s30 + $0x3b8] sm:$0xf] %v658_v46 }
 0x103   : > { %661 = vst [vmem:[%s8943_s30 + $0x3bc] sm:$0xf] %v660_v47 }
 0x104   : > { %663 = vst [vmem:[%s8943_s30 + $0x3c0] sm:$0xf] %v662_v48 }
 0x105   : > { %665 = vst [vmem:[%s8943_s30 + $0x3c4] sm:$0xf] %v664_v49 }
 0x106   : > { %667 = vst [vmem:[%s8943_s30 + $0x3c8] sm:$0xf] %v666_v50 }
 0x107   : > { %669 = vst [vmem:[%s8943_s30 + $0x3cc] sm:$0xf] %v668_v51 }
 0x108   : > { %671 = vst [vmem:[%s8943_s30 + $0x3d0] sm:$0xf] %v670_v52 }
 0x109   : > { %673 = vst [vmem:[%s8943_s30 + $0x3d4] sm:$0xf] %v672_v53 }
 0x10a   : > { %675 = vst [vmem:[%s8943_s30 + $0x3d8] sm:$0xf] %v674_v54 }
 0x10b   : > { %677 = vst [vmem:[%s8943_s30 + $0x3dc] sm:$0xf] %v676_v55 }
 0x10c   : > { %679 = vst [vmem:[%s8943_s30 + $0x3e0] sm:$0xf] %v678_v56 }
 0x10d   : > { %681 = vst [vmem:[%s8943_s30 + $0x3e4] sm:$0xf] %v680_v57 }
 0x10e   : > { %683 = vst [vmem:[%s8943_s30 + $0x3e8] sm:$0xf] %v682_v58 }
 0x10f   : > { %685 = vst [vmem:[%s8943_s30 + $0x3ec] sm:$0xf] %v684_v59 }
 0x110   : > { %687 = vst [vmem:[%s8943_s30 + $0x3f0] sm:$0xf] %v686_v60 }
 0x111   : > { %689 = vst [vmem:[%s8943_s30 + $0x3f4] sm:$0xf] %v688_v61 }
 0x112   : > { %691 = vst [vmem:[%s8943_s30 + $0x3f8] sm:$0xf] %v690_v62 }
 0x113   : > { %693 = vst [vmem:[%s8943_s30 + $0x3fc] sm:$0xf] %v692_v63 }
 0x114   : > { %695 = vst [vmem:[%s8943_s30 + $0x400] sm:$0xf] %v694_v0 }
 0x115   : > { %697 = vst [vmem:[%s8943_s30 + $0x404] sm:$0xf] %v696_v1 }
 0x116   : > { %699 = vst [vmem:[%s8943_s30 + $0x408] sm:$0xf] %v698_v2 }
 0x117   : > { %701 = vst [vmem:[%s8943_s30 + $0x40c] sm:$0xf] %v700_v3 }
 0x118   : > { %703 = vst [vmem:[%s8943_s30 + $0x410] sm:$0xf] %v702_v4 }
 0x119   : > { %705 = vst [vmem:[%s8943_s30 + $0x414] sm:$0xf] %v704_v5 }
 0x11a   : > { %707 = vst [vmem:[%s8943_s30 + $0x418] sm:$0xf] %v706_v6 }
 0x11b   : > { %709 = vst [vmem:[%s8943_s30 + $0x41c] sm:$0xf] %v708_v7 }
 0x11c   : > { %711 = vst [vmem:[%s8943_s30 + $0x420] sm:$0xf] %v710_v8 }
 0x11d   : > { %713 = vst [vmem:[%s8943_s30 + $0x424] sm:$0xf] %v712_v9 }
 0x11e   : > { %715 = vst [vmem:[%s8943_s30 + $0x428] sm:$0xf] %v714_v10 }
 0x11f   : > { %717 = vst [vmem:[%s8943_s30 + $0x42c] sm:$0xf] %v716_v11 }
 0x120   : > { %719 = vst [vmem:[%s8943_s30 + $0x430] sm:$0xf] %v718_v12 }
 0x121   : > { %721 = vst [vmem:[%s8943_s30 + $0x434] sm:$0xf] %v720_v13 }
 0x122   : > { %723 = vst [vmem:[%s8943_s30 + $0x438] sm:$0xf] %v722_v14 }
 0x123   : > { %725 = vst [vmem:[%s8943_s30 + $0x43c] sm:$0xf] %v724_v15 }
 0x124   : > { %727 = vst [vmem:[%s8943_s30 + $0x440] sm:$0xf] %v726_v16 }
 0x125   : > { %729 = vst [vmem:[%s8943_s30 + $0x444] sm:$0xf] %v728_v17 }
 0x126   : > { %731 = vst [vmem:[%s8943_s30 + $0x448] sm:$0xf] %v730_v18 }
 0x127   : > { %733 = vst [vmem:[%s8943_s30 + $0x44c] sm:$0xf] %v732_v19 }
 0x128   : > { %735 = vst [vmem:[%s8943_s30 + $0x450] sm:$0xf] %v734_v20 }
 0x129   : > { %737 = vst [vmem:[%s8943_s30 + $0x454] sm:$0xf] %v736_v21 }
 0x12a   : > { %739 = vst [vmem:[%s8943_s30 + $0x458] sm:$0xf] %v738_v22 }
 0x12b   : > { %741 = vst [vmem:[%s8943_s30 + $0x45c] sm:$0xf] %v740_v23 }
 0x12c   : > { %743 = vst [vmem:[%s8943_s30 + $0x460] sm:$0xf] %v742_v24 }
 0x12d   : > { %745 = vst [vmem:[%s8943_s30 + $0x464] sm:$0xf] %v744_v25 }
 0x12e   : > { %747 = vst [vmem:[%s8943_s30 + $0x468] sm:$0xf] %v746_v26 }
 0x12f   : > { %749 = vst [vmem:[%s8943_s30 + $0x46c] sm:$0xf] %v748_v27 }
 0x130   : > { %751 = vst [vmem:[%s8943_s30 + $0x470] sm:$0xf] %v750_v28 }
 0x131   : > { %753 = vst [vmem:[%s8943_s30 + $0x474] sm:$0xf] %v752_v29 }
 0x132   : > { %755 = vst [vmem:[%s8943_s30 + $0x478] sm:$0xf] %v754_v30 }
 0x133   : > { %757 = vst [vmem:[%s8943_s30 + $0x47c] sm:$0xf] %v756_v31 }
 0x134 PF: > { %p6905_p7 = scmp.ge.s32.totalorder %s8869_s17, 1  ;;  %p2546_p8 = scmp.lt.s32.totalorder %s8869_s17, 3 }
 0x136   : > { %p2547_p9 = pnand %p6905_p7, %p2546_p8 }
 0x138   : > { %2550 = sbr.rel (%p2547_p9) target bundleno = 1524 (0x5f4), region = 84 }
 0x13d   : > { %s2553_s5 = sand.u32 1, %s8861_s15   ;;  %v6908_v46 = vld [vmem:[%s11718_s0] sm:$0xf]  ;;  %v8430_v49 = vld [vmem:[%s11718_s0 + $0x44] sm:$0xf0]  ;;  %p2583_p10 = scmp.lt.s32.totalorder %s8913_s18, 1 }
 0x13e   : > { %s8816_s6 = smul.u32 1152, %s2553_s5  ;;  %v7412_v50 = vld [vmem:[%s11718_s0 + $0x3f0] sm:$0xf]  ;;  %v8556_v51 = vld [vmem:[%s11718_s0 + $0x434] sm:$0xf0]  ;;  %v6909_v58 = vor.u32 %v8430_v49, %v6908_v46 }
 0x13f   : > { %v8421_v52 = vld [vmem:[%s11718_s0 + $0x4] sm:$0xf]  ;;  %v6910_v53 = vld [vmem:[%s11718_s0 + $0x48] sm:$0xf0]  ;;  %v8547_v54 = vld [vmem:[%s11718_s0 + $0x3f4] sm:$0xf]  ;;  %v7413_v59 = vor.u32 %v8556_v51, %v7412_v50 }
 0x140   : > { %s9523_s7 = scalar_lea.vmem [#allocation2], %s8816_s6  ;;  %v7414_v55 = vld [vmem:[%s11718_s0 + $0x438] sm:$0xf0]  ;;  %v6913_v60 = vor.u32 %v8421_v52, %v6910_v53  ;;  %v6980_v8 = vld [vmem:[%s11718_s0 + $0x90] sm:$0xf]  ;;  %s11598_s26 = smul.u32 208, %s2553_s5 }
 0x141   : > { %v8662_v32 = vld [vmem:[%s9523_s7 + $0x38] sm:$0xff]  ;;  %v8661_v34 = vld [vmem:[%s9523_s7 + $0x30] sm:$0xff]  ;;  %v8660_v36 = vld [vmem:[%s9523_s7 + $0x28] sm:$0xff]  ;;  %v7417_v61 = vor.u32 %v8547_v54, %v7414_v55  ;;  %s2584_s13 = scalar_select %p2583_p10, %s8913_s18, 1 }
 0x142   : > { %v8670_v33 = vld [vmem:[%s9523_s7 + $0x78] sm:$0xff]  ;;  %5145 = vmatpush.bf16.msra.mxu0 %v8662_v32  ;;  %8799 = vmatpush.bf16.msra.mxu2 %v8662_v32  ;;  %v8669_v35 = vld [vmem:[%s9523_s7 + $0x70] sm:$0xff]  ;;  %v8668_v37 = vld [vmem:[%s9523_s7 + $0x68] sm:$0xff]  ;;  %s11620_s15 = scalar_lea.vmem [#allocation3], %s11598_s26  ;;  %s8418_s5 = sshll.u32 (%p8928_p5), %s8913_s18, 3 }
 0x143   : > { %5219 = vmatpush.bf16.msra.mxu1 %v8670_v33  ;;  %8807 = vmatpush.bf16.msra.mxu3 %v8670_v33  ;;  %v8659_v38 = vld [vmem:[%s9523_s7 + $0x20] sm:$0xff]  ;;  %v8658_v40 = vld [vmem:[%s9523_s7 + $0x18] sm:$0xff]  ;;  %v8657_v42 = vld [vmem:[%s9523_s7 + $0x10] sm:$0xff]  ;;  %s2585_s20 = scalar_lea.vmem %s11720_s2, %s2584_s13  ;;  %s2588_s25 = scalar_lea.vmem %s11721_s3, %s2584_s13 }
 0x144   : > { %v8667_v39 = vld [vmem:[%s9523_s7 + $0x60] sm:$0xff]  ;;  %v8666_v41 = vld [vmem:[%s9523_s7 + $0x58] sm:$0xff]  ;;  %v8665_v43 = vld [vmem:[%s9523_s7 + $0x50] sm:$0xff]  ;;  %s11656_s29 = scalar_lea.vmem (%p8928_p5), %s11722_s4, %s8418_s5 }
 0x145   : > { %v8656_v44 = vld [vmem:[%s9523_s7 + $0x8] sm:$0xff]  ;;  %v8655_v47 = vld [vmem:[%s9523_s7] sm:$0xff]  ;;  %v8694_v56 = vld [vmem:[%s9523_s7 + $0x138] sm:$0xff] }
 0x146   : > { %5146 = vmatpush.bf16.msra.mxu0 %v8661_v34  ;;  %8800 = vmatpush.bf16.msra.mxu2 %v8661_v34  ;;  %v8664_v45 = vld [vmem:[%s9523_s7 + $0x48] sm:$0xff]  ;;  %v8663_v48 = vld [vmem:[%s9523_s7 + $0x40] sm:$0xff]  ;;  %v8702_v57 = vld [vmem:[%s9523_s7 + $0x178] sm:$0xff] }
 0x147   : > { %5220 = vmatpush.bf16.msra.mxu1 %v8669_v35  ;;  %8808 = vmatpush.bf16.msra.mxu3 %v8669_v35  ;;  %v8678_v62 = vld [vmem:[%s9523_s7 + $0xb8] sm:$0xff]  ;;  %v8693_v0 = vld [vmem:[%s9523_s7 + $0x130] sm:$0xff]  ;;  %v8692_v4 = vld [vmem:[%s9523_s7 + $0x128] sm:$0xff] }
 0x148   : > { %v8686_v63 = vld [vmem:[%s9523_s7 + $0xf8] sm:$0xff]  ;;  %v8701_v1 = vld [vmem:[%s9523_s7 + $0x170] sm:$0xff]  ;;  %v8700_v5 = vld [vmem:[%s9523_s7 + $0x168] sm:$0xff] }
 0x149   : > { %v8677_v2 = vld [vmem:[%s9523_s7 + $0xb0] sm:$0xff]  ;;  %v8676_v6 = vld [vmem:[%s9523_s7 + $0xa8] sm:$0xff]  ;;  %v8691_v9 = vld [vmem:[%s9523_s7 + $0x120] sm:$0xff] }
 0x14a   : > { %5147 = vmatpush.bf16.msra.mxu0 %v8660_v36  ;;  %8801 = vmatpush.bf16.msra.mxu2 %v8660_v36  ;;  %v8685_v3 = vld [vmem:[%s9523_s7 + $0xf0] sm:$0xff]  ;;  %v8684_v7 = vld [vmem:[%s9523_s7 + $0xe8] sm:$0xff]  ;;  %v8699_v10 = vld [vmem:[%s9523_s7 + $0x160] sm:$0xff] }
 0x14b   : > { %5221 = vmatpush.bf16.msra.mxu1 %v8668_v37  ;;  %8809 = vmatpush.bf16.msra.mxu3 %v8668_v37  ;;  %v8448_v11 = vld [vmem:[%s11718_s0 + $0xd4] sm:$0xf0]  ;;  %v7484_v12 = vld [vmem:[%s11718_s0 + $0x480] sm:$0xf]  ;;  %v8574_v13 = vld [vmem:[%s11718_s0 + $0x4c4] sm:$0xf0] }
 0x14c   : > { %v8439_v14 = vld [vmem:[%s11718_s0 + $0x94] sm:$0xf]  ;;  %v6982_v15 = vld [vmem:[%s11718_s0 + $0xd8] sm:$0xf0]  ;;  %v8565_v16 = vld [vmem:[%s11718_s0 + $0x484] sm:$0xf]  ;;  %v6981_v20 = vor.u32 %v8448_v11, %v6980_v8  ;;  %v7485_v21 = vor.u32 %v8574_v13, %v7484_v12 }
 0x14d   : > { %v7486_v17 = vld [vmem:[%s11718_s0 + $0x4c8] sm:$0xf0]  ;;  %v8675_v18 = vld [vmem:[%s9523_s7 + $0xa0] sm:$0xff]  ;;  %v6985_v22 = vor.u32 %v8439_v14, %v6982_v15  ;;  %v8674_v24 = vld [vmem:[%s9523_s7 + $0x98] sm:$0xff] }
 0x14e   : > { %5148 = vmatpush.bf16.msra.mxu0 %v8659_v38  ;;  %8802 = vmatpush.bf16.msra.mxu2 %v8659_v38  ;;  %v8683_v19 = vld [vmem:[%s9523_s7 + $0xe0] sm:$0xff]  ;;  %v7489_v23 = vor.u32 %v8565_v16, %v7486_v17  ;;  %v8682_v25 = vld [vmem:[%s9523_s7 + $0xd8] sm:$0xff]  ;;  %v8466_v29 = vld [vmem:[%s11718_s0 + $0x164] sm:$0xf0] }
 0x14f   : > { %5222 = vmatpush.bf16.msra.mxu1 %v8667_v39  ;;  %8810 = vmatpush.bf16.msra.mxu3 %v8667_v39  ;;  %v8690_v26 = vld [vmem:[%s9523_s7 + $0x118] sm:$0xff]  ;;  %v7052_v28 = vld [vmem:[%s11718_s0 + $0x120] sm:$0xf]  ;;  %v7556_v30 = vld [vmem:[%s11718_s0 + $0x510] sm:$0xf] }
 0x150   : > { %v8698_v27 = vld [vmem:[%s9523_s7 + $0x158] sm:$0xff]  ;;  %v8457_v32 = vld [vmem:[%s11718_s0 + $0x124] sm:$0xf]  ;;  %v7054_v33 = vld [vmem:[%s11718_s0 + $0x168] sm:$0xf0]  ;;  %v7053_v36 = vor.u32 %v8466_v29, %v7052_v28 }
 0x151   : > { %v8592_v31 = vld [vmem:[%s11718_s0 + $0x554] sm:$0xf0]  ;;  %v8583_v34 = vld [vmem:[%s11718_s0 + $0x514] sm:$0xf]  ;;  %v7558_v35 = vld [vmem:[%s11718_s0 + $0x558] sm:$0xf0]  ;;  %v7057_v38 = vor.u32 %v8457_v32, %v7054_v33 }
 0x152   : > { %5149 = vmatpush.bf16.msra.mxu0 %v8658_v40  ;;  %8803 = vmatpush.bf16.msra.mxu2 %v8658_v40  ;;  %v7557_v37 = vor.u32 %v8592_v31, %v7556_v30  ;;  %v7561_v39 = vor.u32 %v8583_v34, %v7558_v35  ;;  %v8673_v40 = vld [vmem:[%s9523_s7 + $0x90] sm:$0xff]  ;;  %v8484_v46 = vld [vmem:[%s11718_s0 + $0x1f4] sm:$0xf0]  ;;  %v7126_v50 = vld [vmem:[%s11718_s0 + $0x1f8] sm:$0xf0] }
 0x153   : > { %5223 = vmatpush.bf16.msra.mxu1 %v8666_v41  ;;  %8811 = vmatpush.bf16.msra.mxu3 %v8666_v41  ;;  %v8681_v41 = vld [vmem:[%s9523_s7 + $0xd0] sm:$0xff]  ;;  %v8601_v51 = vld [vmem:[%s11718_s0 + $0x5a4] sm:$0xf]  ;;  %v7630_v52 = vld [vmem:[%s11718_s0 + $0x5e8] sm:$0xf0] }
 0x154   : > { %v8475_v49 = vld [vmem:[%s11718_s0 + $0x1b4] sm:$0xf]  ;;  %v8695_v11 = vld [vmem:[%s9523_s7 + $0x140] sm:$0xff]  ;;  %v8710_v12 = vld [vmem:[%s9523_s7 + $0x1b8] sm:$0xff] }
 0x155   : > { %v7129_v55 = vor.u32 %v8475_v49, %v7126_v50  ;;  %v8718_v13 = vld [vmem:[%s9523_s7 + $0x1f8] sm:$0xff]  ;;  %v7268_v14 = vld [vmem:[%s11718_s0 + $0x2d0] sm:$0xf]  ;;  %v7772_v16 = vld [vmem:[%s11718_s0 + $0x6c0] sm:$0xf] }
 0x156   : > { %5150 = vmatpush.bf16.msra.mxu0 %v8657_v42  ;;  %8804 = vmatpush.bf16.msra.mxu2 %v8657_v42  ;;  %v8689_v42 = vld [vmem:[%s9523_s7 + $0x110] sm:$0xff]  ;;  %v8520_v15 = vld [vmem:[%s11718_s0 + $0x314] sm:$0xf0]  ;;  %v8646_v17 = vld [vmem:[%s11718_s0 + $0x704] sm:$0xf0] }
 0x157   : > { %5224 = vmatpush.bf16.msra.mxu1 %v8665_v43  ;;  %8812 = vmatpush.bf16.msra.mxu3 %v8665_v43  ;;  %v8697_v43 = vld [vmem:[%s9523_s7 + $0x150] sm:$0xff]  ;;  %v7340_v28 = vld [vmem:[%s11718_s0 + $0x360] sm:$0xf]  ;;  %v8538_v29 = vld [vmem:[%s11718_s0 + $0x3a4] sm:$0xf0] }
 0x158   : > { %v8529_v30 = vld [vmem:[%s11718_s0 + $0x364] sm:$0xf]  ;;  %v6916_v31 = vld [vmem:[%s11718_s0 + $0x8] sm:$0xf]  ;;  %v8431_v32 = vld [vmem:[%s11718_s0 + $0x4c] sm:$0xf0] }
 0x159   : > { %v7342_v33 = vld [vmem:[%s11718_s0 + $0x3a8] sm:$0xf0]  ;;  %v6918_v35 = vld [vmem:[%s11718_s0 + $0x50] sm:$0xf0]  ;;  %v6926_v50 = vld [vmem:[%s11718_s0 + $0x58] sm:$0xf0] }
 0x15a   : > { %5151 = vmatpush.bf16.msra.mxu0 %v8656_v44  ;;  %8805 = vmatpush.bf16.msra.mxu2 %v8656_v44  ;;  %v8672_v44 = vld [vmem:[%s9523_s7 + $0x88] sm:$0xff]  ;;  %v8423_v49 = vld [vmem:[%s11718_s0 + $0x14] sm:$0xf] }
 0x15b   : > { %5225 = vmatpush.bf16.msra.mxu1 %v8664_v45  ;;  %8813 = vmatpush.bf16.msra.mxu3 %v8664_v45  ;;  %v7124_v45 = vld [vmem:[%s11718_s0 + $0x1b0] sm:$0xf]  ;;  %v8422_v34 = vld [vmem:[%s11718_s0 + $0xc] sm:$0xf] }
 0x15c   : > { %v7125_v53 = vor.u32 %v8484_v46, %v7124_v45  ;;  %v8440_v45 = vld [vmem:[%s11718_s0 + $0x9c] sm:$0xf]  ;;  %v6924_v46 = vld [vmem:[%s11718_s0 + $0x10] sm:$0xf] }
 0x15e   : > { %5152 = vmatpush.bf16.msra.mxu0 %v8655_v47  ;;  %8806 = vmatpush.bf16.msra.mxu2 %v8655_v47  ;;  %v7628_v47 = vld [vmem:[%s11718_s0 + $0x5a0] sm:$0xf] }
 0x15f   : > { %5226 = vmatpush.bf16.msra.mxu1 %v8663_v48  ;;  %8814 = vmatpush.bf16.msra.mxu3 %v8663_v48  ;;  %v8610_v48 = vld [vmem:[%s11718_s0 + $0x5e4] sm:$0xf0] }
 0x160   : > { %v7629_v54 = vor.u32 %v8610_v48, %v7628_v47  ;;  %v8432_v47 = vld [vmem:[%s11718_s0 + $0x54] sm:$0xf0]  ;;  %v6990_v48 = vld [vmem:[%s11718_s0 + $0xe0] sm:$0xf0] }
 0x161   : > { %5153 = vmatmul.bf16.vlgmr.msra.gmra.mxu0 %v6909_v58  ;;  %5188 = vmatmul.bf16.vlgmr.msra.gmra.mxu2 %v7413_v59  ;;  %v8688_v58 = vld [vmem:[%s9523_s7 + $0x108] sm:$0xff] }
 0x162   : > { %5441 = vmatpush.bf16.msrb.mxu0 %v8694_v56  ;;  %5227 = vmatmul.bf16.vlgmr.msra.gmra.mxu1 %v6913_v60  ;;  %v7633_v56 = vor.u32 %v8601_v51, %v7630_v52  ;;  %v8696_v59 = vld [vmem:[%s9523_s7 + $0x148] sm:$0xff]  ;;  %v8671_v60 = vld [vmem:[%s9523_s7 + $0x80] sm:$0xff]  ;;  %v6925_v52 = vor.u32 %v8432_v47, %v6924_v46 }
 0x163   : > { %5515 = vmatpush.bf16.msrb.mxu1 %v8702_v57  ;;  %5262 = vmatmul.bf16.vlgmr.msra.gmra.mxu3 %v7417_v61  ;;  %v8680_v57 = vld [vmem:[%s9523_s7 + $0xc8] sm:$0xff]  ;;  %v8679_v61 = vld [vmem:[%s9523_s7 + $0xc0] sm:$0xff] }
 0x164   : > { %5293 = vmatpush.bf16.msrb.mxu2 %v8678_v62  ;;  %5367 = vmatpush.bf16.msrb.mxu3 %v8686_v63  ;;  %v7196_v62 = vld [vmem:[%s11718_s0 + $0x240] sm:$0xf]  ;;  %v8502_v63 = vld [vmem:[%s11718_s0 + $0x284] sm:$0xf0] }
 0x165   : > { %v7140_v46 = vld [vmem:[%s11718_s0 + $0x1c0] sm:$0xf]  ;;  %v8486_v47 = vld [vmem:[%s11718_s0 + $0x204] sm:$0xf0] }
 0x166   : > { %5442 = vmatpush.bf16.msrb.mxu0 %v8693_v0  ;;  %v7700_v0 = vld [vmem:[%s11718_s0 + $0x630] sm:$0xf] }
 0x167   : > { %5516 = vmatpush.bf16.msrb.mxu1 %v8701_v1  ;;  %v8628_v1 = vld [vmem:[%s11718_s0 + $0x674] sm:$0xf0] }
 0x168   : > { %5294 = vmatpush.bf16.msrb.mxu2 %v8677_v2  ;;  %5368 = vmatpush.bf16.msrb.mxu3 %v8685_v3  ;;  %v8493_v2 = vld [vmem:[%s11718_s0 + $0x244] sm:$0xf]  ;;  %v7198_v3 = vld [vmem:[%s11718_s0 + $0x288] sm:$0xf0] }
 0x169   : > { %v7201_v8 = vor.u32 %v8493_v2, %v7198_v3 }
 0x16a   : > { %5443 = vmatpush.bf16.msrb.mxu0 %v8692_v4  ;;  %v8619_v4 = vld [vmem:[%s11718_s0 + $0x634] sm:$0xf] }
 0x16b   : > { %5517 = vmatpush.bf16.msrb.mxu1 %v8700_v5  ;;  %v7702_v5 = vld [vmem:[%s11718_s0 + $0x678] sm:$0xf0] }
 0x16c   : > { %5295 = vmatpush.bf16.msrb.mxu2 %v8676_v6  ;;  %5369 = vmatpush.bf16.msrb.mxu3 %v8684_v7  ;;  %v7197_v6 = vor.u32 %v8502_v63, %v7196_v62  ;;  %v7701_v7 = vor.u32 %v8628_v1, %v7700_v0  ;;  %v7062_v62 = vld [vmem:[%s11718_s0 + $0x170] sm:$0xf0]  ;;  %v8441_v63 = vld [vmem:[%s11718_s0 + $0xa4] sm:$0xf]  ;;  %v6998_v0 = vld [vmem:[%s11718_s0 + $0xe8] sm:$0xf0] }
 0x16e   : > { %5444 = vmatpush.bf16.msrb.mxu0 %v8691_v9  ;;  %v7705_v9 = vor.u32 %v8619_v4, %v7702_v5  ;;  %v7001_v5 = vor.u32 %v8441_v63, %v6998_v0 }
 0x16f   : > { %5518 = vmatpush.bf16.msrb.mxu1 %v8699_v10  ;;  %v8687_v10 = vld [vmem:[%s9523_s7 + $0x100] sm:$0xff] }
 0x170   : > { %5296 = vmatpush.bf16.msrb.mxu2 %v8675_v18  ;;  %5370 = vmatpush.bf16.msrb.mxu3 %v8683_v19  ;;  %v8511_v18 = vld [vmem:[%s11718_s0 + $0x2d4] sm:$0xf]  ;;  %v7270_v19 = vld [vmem:[%s11718_s0 + $0x318] sm:$0xf0] }
 0x171   : > { %5158 = vmatmul.bf16.gmra.mxu0 %v6981_v20  ;;  %5193 = vmatmul.bf16.gmra.mxu2 %v7485_v21  ;;  %v8637_v20 = vld [vmem:[%s11718_s0 + $0x6c4] sm:$0xf]  ;;  %v7774_v21 = vld [vmem:[%s11718_s0 + $0x708] sm:$0xf0] }
 0x172   : > { %5232 = vmatmul.bf16.gmra.mxu1 %v6985_v22  ;;  %5445 = vmatpush.bf16.msrb.mxu0 %v8690_v26  ;;  %v7269_v22 = vor.u32 %v8520_v15, %v7268_v14  ;;  %v8726_v26 = vld [vmem:[%s9523_s7 + $0x238] sm:$0xff] }
 0x173   : > { %5267 = vmatmul.bf16.gmra.mxu3 %v7489_v23  ;;  %5519 = vmatpush.bf16.msrb.mxu1 %v8698_v27  ;;  %v7773_v23 = vor.u32 %v8646_v17, %v7772_v16  ;;  %v8734_v27 = vld [vmem:[%s9523_s7 + $0x278] sm:$0xff]  ;;  %v8732_v16 = vld [vmem:[%s9523_s7 + $0x268] sm:$0xff] }
 0x174   : > { %5297 = vmatpush.bf16.msrb.mxu2 %v8674_v24  ;;  %5371 = vmatpush.bf16.msrb.mxu3 %v8682_v25  ;;  %v7273_v24 = vor.u32 %v8511_v18, %v7270_v19  ;;  %v7777_v25 = vor.u32 %v8637_v20, %v7774_v21  ;;  %v7132_v17 = vld [vmem:[%s11718_s0 + $0x1b8] sm:$0xf]  ;;  %v8485_v18 = vld [vmem:[%s11718_s0 + $0x1fc] sm:$0xf0]  ;;  %v8476_v19 = vld [vmem:[%s11718_s0 + $0x1bc] sm:$0xf] }
 0x175   : > { %v7068_v20 = vld [vmem:[%s11718_s0 + $0x130] sm:$0xf]  ;;  %v8468_v21 = vld [vmem:[%s11718_s0 + $0x174] sm:$0xf0] }
 0x176   : > { %5446 = vmatpush.bf16.msrb.mxu0 %v8689_v42  ;;  %v8725_v42 = vld [vmem:[%s9523_s7 + $0x230] sm:$0xff] }
 0x177   : > { %5520 = vmatpush.bf16.msrb.mxu1 %v8697_v43  ;;  %v6988_v43 = vld [vmem:[%s11718_s0 + $0x98] sm:$0xf] }
 0x178   : > { %5298 = vmatpush.bf16.msrb.mxu2 %v8673_v40  ;;  %5372 = vmatpush.bf16.msrb.mxu3 %v8681_v41  ;;  %v8709_v40 = vld [vmem:[%s9523_s7 + $0x1b0] sm:$0xff] }
 0x179   : > { %v8717_v41 = vld [vmem:[%s9523_s7 + $0x1f0] sm:$0xff] }
 0x17a   : > { %5447 = vmatpush.bf16.msrb.mxu0 %v8688_v58  ;;  %v8467_v58 = vld [vmem:[%s11718_s0 + $0x16c] sm:$0xf0] }
 0x17b   : > { %5521 = vmatpush.bf16.msrb.mxu1 %v8696_v59  ;;  %v8458_v59 = vld [vmem:[%s11718_s0 + $0x12c] sm:$0xf] }
 0x17c   : > { %5299 = vmatpush.bf16.msrb.mxu2 %v8672_v44  ;;  %5373 = vmatpush.bf16.msrb.mxu3 %v8680_v57  ;;  %v8449_v44 = vld [vmem:[%s11718_s0 + $0xdc] sm:$0xf0]  ;;  %v7060_v57 = vld [vmem:[%s11718_s0 + $0x128] sm:$0xf]  ;;  %v7065_v4 = vor.u32 %v8458_v59, %v7062_v62 }
 0x17d   : > { %v6989_v51 = vor.u32 %v8449_v44, %v6988_v43  ;;  %v7061_v1 = vor.u32 %v8467_v58, %v7060_v57  ;;  %v7204_v43 = vld [vmem:[%s11718_s0 + $0x248] sm:$0xf]  ;;  %v8503_v44 = vld [vmem:[%s11718_s0 + $0x28c] sm:$0xf0]  ;;  %v8731_v62 = vld [vmem:[%s9523_s7 + $0x260] sm:$0xff] }
 0x17e   : > { %5448 = vmatpush.bf16.msrb.mxu0 %v8687_v10 }
 0x17f   : > { %5522 = vmatpush.bf16.msrb.mxu1 %v8695_v11 }
 0x180   : > { %5300 = vmatpush.bf16.msrb.mxu2 %v8671_v60  ;;  %5374 = vmatpush.bf16.msrb.mxu3 %v8679_v61  ;;  %v6996_v60 = vld [vmem:[%s11718_s0 + $0xa0] sm:$0xf]  ;;  %v8450_v61 = vld [vmem:[%s11718_s0 + $0xe4] sm:$0xf0] }
 0x181   : > { %5163 = vmatmul.bf16.gmra.mxu0 %v7053_v36  ;;  %5198 = vmatmul.bf16.gmra.mxu2 %v7557_v37  ;;  %v7341_v36 = vor.u32 %v8538_v29, %v7340_v28  ;;  %v6917_v37 = vor.u32 %v8431_v32, %v6916_v31  ;;  %v6997_v2 = vor.u32 %v8450_v61, %v6996_v60  ;;  %v8723_v61 = vld [vmem:[%s9523_s7 + $0x220] sm:$0xff] }
 0x182   : > { %5237 = vmatmul.bf16.gmra.mxu1 %v7057_v38  ;;  %5737 = vmatpush.bf16.msra.mxu0 %v8726_v26  ;;  %v7345_v38 = vor.u32 %v8529_v30, %v7342_v33  ;;  %v7069_v28 = vor.u32 %v8468_v21, %v7068_v20 }
 0x183   : > { %5272 = vmatmul.bf16.gmra.mxu3 %v7561_v39  ;;  %5811 = vmatpush.bf16.msra.mxu1 %v8734_v27  ;;  %v6921_v39 = vor.u32 %v8422_v34, %v6918_v35  ;;  %v7133_v27 = vor.u32 %v8485_v18, %v7132_v17 }
 0x184   : > { %5589 = vmatpush.bf16.msra.mxu2 %v8710_v12  ;;  %5663 = vmatpush.bf16.msra.mxu3 %v8718_v13  ;;  %v8724_v13 = vld [vmem:[%s9523_s7 + $0x228] sm:$0xff] }
 0x186   : > { %5738 = vmatpush.bf16.msra.mxu0 %v8725_v42  ;;  %v8715_v42 = vld [vmem:[%s9523_s7 + $0x1e0] sm:$0xff] }
 0x188   : > { %5590 = vmatpush.bf16.msra.mxu2 %v8709_v40  ;;  %5664 = vmatpush.bf16.msra.mxu3 %v8717_v41 }
 0x18a   : > { %5739 = vmatpush.bf16.msra.mxu0 %v8724_v13  ;;  %v8495_v13 = vld [vmem:[%s11718_s0 + $0x254] sm:$0xf] }
 0x18e   : > { %5740 = vmatpush.bf16.msra.mxu0 %v8723_v61 }
 0x191   : > { %5168 = vmatmul.bf16.gmra.mxu0 %v7125_v53  ;;  %5203 = vmatmul.bf16.gmra.mxu2 %v7629_v54  ;;  %v6993_v53 = vor.u32 %v8440_v45, %v6990_v48  ;;  %v6929_v54 = vor.u32 %v8423_v49, %v6926_v50  ;;  %v8494_v45 = vld [vmem:[%s11718_s0 + $0x24c] sm:$0xf]  ;;  %v7206_v48 = vld [vmem:[%s11718_s0 + $0x290] sm:$0xf0]  ;;  %v8477_v49 = vld [vmem:[%s11718_s0 + $0x1c4] sm:$0xf] }
 0x192   : > { %5242 = vmatmul.bf16.gmra.mxu1 %v7129_v55  ;;  %v8733_v55 = vld [vmem:[%s9523_s7 + $0x270] sm:$0xff]  ;;  %v7142_v50 = vld [vmem:[%s11718_s0 + $0x208] sm:$0xf0]  ;;  %v7209_v57 = vor.u32 %v8494_v45, %v7206_v48 }
 0x193   : > { %5277 = vmatmul.bf16.gmra.mxu3 %v7633_v56  ;;  %5812 = vmatpush.bf16.msra.mxu1 %v8733_v55  ;;  %v8708_v56 = vld [vmem:[%s9523_s7 + $0x1a8] sm:$0xff]  ;;  %v7145_v58 = vor.u32 %v8477_v49, %v7142_v50  ;;  %v7350_v45 = vld [vmem:[%s11718_s0 + $0x3b0] sm:$0xf0] }
 0x194   : > { %5591 = vmatpush.bf16.msra.mxu2 %v8708_v56 }
 0x197   : > { %5813 = vmatpush.bf16.msra.mxu1 %v8732_v16 }
 0x19b   : > { %5814 = vmatpush.bf16.msra.mxu1 %v8731_v62 }
 0x1a1   : > { %5173 = vmatmul.bf16.gmra.mxu0 %v7197_v6  ;;  %5208 = vmatmul.bf16.gmra.mxu2 %v7701_v7  ;;  %v8716_v6 = vld [vmem:[%s9523_s7 + $0x1e8] sm:$0xff] }
 0x1a2   : > { %5247 = vmatmul.bf16.gmra.mxu1 %v7201_v8  ;;  %5665 = vmatpush.bf16.msra.mxu3 %v8716_v6  ;;  %v8521_v6 = vld [vmem:[%s11718_s0 + $0x31c] sm:$0xf0] }
 0x1a3   : > { %5282 = vmatmul.bf16.gmra.mxu3 %v7705_v9 }
 0x1a6   : > { %5666 = vmatpush.bf16.msra.mxu3 %v8715_v42  ;;  %v8530_v42 = vld [vmem:[%s11718_s0 + $0x36c] sm:$0xf] }
 0x1b1   : > { %5178 = vmatmul.bf16.gmra.mxu0 %v7269_v22  ;;  %5213 = vmatmul.bf16.gmra.mxu2 %v7773_v23  ;;  %v7134_v22 = vld [vmem:[%s11718_s0 + $0x200] sm:$0xf0]  ;;  %v8459_v23 = vld [vmem:[%s11718_s0 + $0x134] sm:$0xf] }
 0x1b2   : > { %5252 = vmatmul.bf16.gmra.mxu1 %v7273_v24  ;;  %v7070_v24 = vld [vmem:[%s11718_s0 + $0x178] sm:$0xf0]  ;;  %v7137_v31 = vor.u32 %v8476_v19, %v7134_v22 }
 0x1b3   : > { %5287 = vmatmul.bf16.gmra.mxu3 %v7777_v25  ;;  %v7073_v32 = vor.u32 %v8459_v23, %v7070_v24 }
 0x1c1   : > { %5183 = vmatmul.bf16.gmra.mxu0 %v7341_v36  ;;  %5301 = vmatmul.bf16.vlgmr.msrb.gmra.mxu2 %v6917_v37 }
 0x1c2   : > { %5257 = vmatmul.bf16.gmra.mxu1 %v7345_v38 }
 0x1c3   : > { %5375 = vmatmul.bf16.vlgmr.msrb.gmra.mxu3 %v6921_v39  ;;  %v8707_v39 = vld [vmem:[%s9523_s7 + $0x1a0] sm:$0xff] }
 0x1c4   : > { %5592 = vmatpush.bf16.msra.mxu2 %v8707_v39  ;;  %v7348_v39 = vld [vmem:[%s11718_s0 + $0x368] sm:$0xf] }
 0x1d1   : > { %5306 = vmatmul.bf16.gmra.mxu2 %v6989_v51  ;;  %5449 = vmatmul.bf16.vlgmr.msrb.gmra.mxu0 %v6925_v52 }
 0x1d2   : > { %5523 = vmatmul.bf16.vlgmr.msrb.gmra.mxu1 %v6929_v54  ;;  %v7141_v54 = vor.u32 %v8486_v47, %v7140_v46  ;;  %v8513_v46 = vld [vmem:[%s11718_s0 + $0x2e4] sm:$0xf]  ;;  %v7286_v47 = vld [vmem:[%s11718_s0 + $0x328] sm:$0xf0] }
 0x1d3   : > { %5380 = vmatmul.bf16.gmra.mxu3 %v6993_v53  ;;  %v7205_v53 = vor.u32 %v8503_v44, %v7204_v43  ;;  %v7284_v43 = vld [vmem:[%s11718_s0 + $0x2e0] sm:$0xf]  ;;  %v8522_v44 = vld [vmem:[%s11718_s0 + $0x324] sm:$0xf0] }
 0x1de   : > { %v5154_v3 = vpop.f32.mrf.mxu0 }
 0x1df   : > { %v5228_v7 = vpop.f32.mrf.mxu1 }
 0x1e0   : > { %v9799_v8 = vadd.f32 %v5228_v7, %v5154_v3  ;;  %v8512_v7 = vld [vmem:[%s11718_s0 + $0x2dc] sm:$0xf] }
 0x1e1   : > { %5311 = vmatmul.bf16.gmra.mxu2 %v7061_v1  ;;  %5454 = vmatmul.bf16.gmra.mxu0 %v6997_v2 }
 0x1e2   : > { %5528 = vmatmul.bf16.gmra.mxu1 %v7001_v5  ;;  %v7276_v5 = vld [vmem:[%s11718_s0 + $0x2d8] sm:$0xf] }
 0x1e3   : > { %5385 = vmatmul.bf16.gmra.mxu3 %v7065_v4  ;;  %v7277_v18 = vor.u32 %v8521_v6, %v7276_v5  ;;  %v8713_v5 = vld [vmem:[%s9523_s7 + $0x1d0] sm:$0xff]  ;;  %v7420_v6 = vld [vmem:[%s11718_s0 + $0x3f8] sm:$0xf] }
 0x1e4   : > { %v5189_v9 = vpop.f32.mrf.mxu2 }
 0x1e6   : > { %v5263_v10 = vpop.f32.mrf.mxu3  ;;  %v5156_v12 = vpop.f32.mrf.mxu0 }
 0x1e7   : > { %v9801_v11 = vadd.f32 %v5263_v10, %v5189_v9  ;;  %v5230_v14 = vpop.f32.mrf.mxu1  ;;  %v7212_v9 = vld [vmem:[%s11718_s0 + $0x250] sm:$0xf]  ;;  %v8504_v10 = vld [vmem:[%s11718_s0 + $0x294] sm:$0xf0] }
 0x1e8   : > { %v9804_v15 = vadd.f32 %v5230_v14, %v5156_v12  ;;  %v7278_v12 = vld [vmem:[%s11718_s0 + $0x320] sm:$0xf0]  ;;  %v7214_v14 = vld [vmem:[%s11718_s0 + $0x298] sm:$0xf0]  ;;  %v7213_v19 = vor.u32 %v8504_v10, %v7212_v9  ;;  %v7356_v10 = vld [vmem:[%s11718_s0 + $0x370] sm:$0xf] }
 0x1e9   : > { %v7281_v22 = vor.u32 %v8512_v7, %v7278_v12  ;;  %v7217_v23 = vor.u32 %v8495_v13, %v7214_v14  ;;  %v8557_v7 = vld [vmem:[%s11718_s0 + $0x43c] sm:$0xf0]  ;;  %v8548_v9 = vld [vmem:[%s11718_s0 + $0x3fc] sm:$0xf]  ;;  %v8540_v12 = vld [vmem:[%s11718_s0 + $0x3b4] sm:$0xf0] }
 0x1ea   : > { %v7422_v13 = vld [vmem:[%s11718_s0 + $0x440] sm:$0xf0]  ;;  %v8531_v14 = vld [vmem:[%s11718_s0 + $0x374] sm:$0xf] }
 0x1ec   : > { %v5191_v25 = vpop.f32.mrf.mxu2 }
 0x1ee   : > { %v5265_v26 = vpop.f32.mrf.mxu3  ;;  %v5159_v30 = vpop.f32.mrf.mxu0 }
 0x1ef   : > { %v9831_v29 = vadd.f32 %v5265_v26, %v5191_v25  ;;  %v5233_v33 = vpop.f32.mrf.mxu1  ;;  %v8706_v26 = vld [vmem:[%s9523_s7 + $0x198] sm:$0xff] }
 0x1f0   : > { %v9833_v34 = vadd.f32 %v5233_v33, %v5159_v30  ;;  %5593 = vmatpush.bf16.msra.mxu2 %v8706_v26 }
 0x1f1   : > { %5316 = vmatmul.bf16.gmra.mxu2 %v7133_v27  ;;  %5459 = vmatmul.bf16.gmra.mxu0 %v7069_v28  ;;  %v8714_v27 = vld [vmem:[%s9523_s7 + $0x1d8] sm:$0xff] }
 0x1f2   : > { %5533 = vmatmul.bf16.gmra.mxu1 %v7073_v32  ;;  %5667 = vmatpush.bf16.msra.mxu3 %v8714_v27 }
 0x1f3   : > { %5390 = vmatmul.bf16.gmra.mxu3 %v7137_v31 }
 0x1f4   : > { %v5194_v35 = vpop.f32.mrf.mxu2 }
 0x1f6   : > { %v5268_v36 = vpop.f32.mrf.mxu3  ;;  %v5161_v38 = vpop.f32.mrf.mxu0  ;;  %5668 = vmatpush.bf16.msra.mxu3 %v8713_v5  ;;  %v8704_v5 = vld [vmem:[%s9523_s7 + $0x188] sm:$0xff] }
 0x1f7   : > { %v9835_v37 = vadd.f32 %v5268_v36, %v5194_v35  ;;  %v5235_v40 = vpop.f32.mrf.mxu1  ;;  %v8722_v36 = vld [vmem:[%s9523_s7 + $0x218] sm:$0xff] }
 0x1f8   : > { %v9838_v41 = vadd.f32 %v5235_v40, %v5161_v38  ;;  %v8730_v38 = vld [vmem:[%s9523_s7 + $0x258] sm:$0xff]  ;;  %v8539_v40 = vld [vmem:[%s11718_s0 + $0x3ac] sm:$0xf0]  ;;  %5741 = vmatpush.bf16.msra.mxu0 %v8722_v36 }
 0x1f9   : > { %5815 = vmatpush.bf16.msra.mxu1 %v8730_v38  ;;  %v7349_v50 = vor.u32 %v8539_v40, %v7348_v39  ;;  %v8729_v40 = vld [vmem:[%s9523_s7 + $0x250] sm:$0xff] }
 0x1fc   : > { %v5196_v51 = vpop.f32.mrf.mxu2 }
 0x1fd   : > { %5816 = vmatpush.bf16.msra.mxu1 %v8729_v40 }
 0x1fe   : > { %v5270_v52 = vpop.f32.mrf.mxu3  ;;  %v5164_v56 = vpop.f32.mrf.mxu0 }
 0x1ff   : > { %v9865_v55 = vadd.f32 %v5270_v52, %v5196_v51  ;;  %v5238_v59 = vpop.f32.mrf.mxu1  ;;  %v7285_v51 = vor.u32 %v8522_v44, %v7284_v43  ;;  %v7492_v43 = vld [vmem:[%s11718_s0 + $0x488] sm:$0xf]  ;;  %v8575_v44 = vld [vmem:[%s11718_s0 + $0x4cc] sm:$0xf0] }
 0x200   : > { %v9867_v60 = vadd.f32 %v5238_v59, %v5164_v56  ;;  %v7289_v56 = vor.u32 %v8513_v46, %v7286_v47  ;;  %v7428_v46 = vld [vmem:[%s11718_s0 + $0x400] sm:$0xf]  ;;  %v8558_v47 = vld [vmem:[%s11718_s0 + $0x444] sm:$0xf0] }
 0x201   : > { %5321 = vmatmul.bf16.gmra.mxu2 %v7205_v53  ;;  %5464 = vmatmul.bf16.gmra.mxu0 %v7141_v54  ;;  %v7353_v54 = vor.u32 %v8530_v42, %v7350_v45  ;;  %v8566_v45 = vld [vmem:[%s11718_s0 + $0x48c] sm:$0xf] }
 0x202   : > { %5538 = vmatmul.bf16.gmra.mxu1 %v7145_v58 }
 0x203   : > { %5395 = vmatmul.bf16.gmra.mxu3 %v7209_v57 }
 0x204   : > { %v5199_v63 = vpop.f32.mrf.mxu2 }
 0x206   : > { %v5273_v0 = vpop.f32.mrf.mxu3  ;;  %v5166_v2 = vpop.f32.mrf.mxu0 }
 0x207   : > { %v9871_v1 = vadd.f32 %v5273_v0, %v5199_v63  ;;  %v5240_v3 = vpop.f32.mrf.mxu1 }
 0x208   : > { %v9873_v4 = vadd.f32 %v5240_v3, %v5166_v2  ;;  %v8705_v3 = vld [vmem:[%s9523_s7 + $0x190] sm:$0xff] }
 0x209   : > { %5594 = vmatpush.bf16.msra.mxu2 %v8705_v3 }
 0x20c   : > { %v5201_v16 = vpop.f32.mrf.mxu2 }
 0x20d   : > { %5595 = vmatpush.bf16.msra.mxu2 %v8704_v5  ;;  %v8602_v5 = vld [vmem:[%s11718_s0 + $0x5ac] sm:$0xf] }
 0x20e   : > { %v5275_v17 = vpop.f32.mrf.mxu3  ;;  %v5169_v21 = vpop.f32.mrf.mxu0 }
 0x20f   : > { %v9899_v20 = vadd.f32 %v5275_v17, %v5201_v16  ;;  %v5243_v24 = vpop.f32.mrf.mxu1  ;;  %v7358_v16 = vld [vmem:[%s11718_s0 + $0x3b8] sm:$0xf0] }
 0x210   : > { %v9901_v25 = vadd.f32 %v5243_v24, %v5169_v21  ;;  %v7357_v21 = vor.u32 %v8540_v12, %v7356_v10  ;;  %v7425_v24 = vor.u32 %v8548_v9, %v7422_v13  ;;  %v7361_v26 = vor.u32 %v8531_v14, %v7358_v16  ;;  %v8712_v14 = vld [vmem:[%s9523_s7 + $0x1c8] sm:$0xff] }
 0x211   : > { %5326 = vmatmul.bf16.gmra.mxu2 %v7277_v18  ;;  %5469 = vmatmul.bf16.gmra.mxu0 %v7213_v19  ;;  %v7421_v19 = vor.u32 %v8557_v7, %v7420_v6 }
 0x212   : > { %5543 = vmatmul.bf16.gmra.mxu1 %v7217_v23  ;;  %5669 = vmatpush.bf16.msra.mxu3 %v8712_v14 }
 0x213   : > { %5400 = vmatmul.bf16.gmra.mxu3 %v7281_v22 }
 0x214   : > { %v5204_v28 = vpop.f32.mrf.mxu2 }
 0x216   : > { %v5278_v30 = vpop.f32.mrf.mxu3  ;;  %v5171_v32 = vpop.f32.mrf.mxu0 }
 0x217   : > { %v9905_v31 = vadd.f32 %v5278_v30, %v5204_v28  ;;  %v5245_v33 = vpop.f32.mrf.mxu1  ;;  %v8721_v30 = vld [vmem:[%s9523_s7 + $0x210] sm:$0xff] }
 0x218   : > { %v9907_v35 = vadd.f32 %v5245_v33, %v5171_v32  ;;  %5742 = vmatpush.bf16.msra.mxu0 %v8721_v30 }
 0x21c   : > { %v5206_v48 = vpop.f32.mrf.mxu2 }
 0x21e   : > { %v5280_v49 = vpop.f32.mrf.mxu3  ;;  %v5174_v53 = vpop.f32.mrf.mxu0 }
 0x21f   : > { %v9935_v52 = vadd.f32 %v5280_v49, %v5206_v48  ;;  %v5248_v57 = vpop.f32.mrf.mxu1  ;;  %v7494_v48 = vld [vmem:[%s11718_s0 + $0x4d0] sm:$0xf0]  ;;  %v8549_v49 = vld [vmem:[%s11718_s0 + $0x404] sm:$0xf] }
 0x220   : > { %v9937_v58 = vadd.f32 %v5248_v57, %v5174_v53 }
 0x221   : > { %5331 = vmatmul.bf16.gmra.mxu2 %v7349_v50  ;;  %5474 = vmatmul.bf16.gmra.mxu0 %v7285_v51  ;;  %v7430_v50 = vld [vmem:[%s11718_s0 + $0x448] sm:$0xf0] }
 0x222   : > { %5548 = vmatmul.bf16.gmra.mxu1 %v7289_v56  ;;  %v7429_v56 = vor.u32 %v8558_v47, %v7428_v46  ;;  %v8720_v47 = vld [vmem:[%s9523_s7 + $0x208] sm:$0xff] }
 0x223   : > { %5405 = vmatmul.bf16.gmra.mxu3 %v7353_v54  ;;  %v7493_v54 = vor.u32 %v8575_v44, %v7492_v43  ;;  %5743 = vmatpush.bf16.msra.mxu0 %v8720_v47  ;;  %v8629_v47 = vld [vmem:[%s11718_s0 + $0x67c] sm:$0xf0] }
 0x224   : > { %v5209_v59 = vpop.f32.mrf.mxu2 }
 0x226   : > { %v5283_v61 = vpop.f32.mrf.mxu3  ;;  %v5176_v63 = vpop.f32.mrf.mxu0 }
 0x227   : > { %v9939_v62 = vadd.f32 %v5283_v61, %v5209_v59  ;;  %v5250_v0 = vpop.f32.mrf.mxu1  ;;  %v7497_v61 = vor.u32 %v8566_v45, %v7494_v48 }
 0x228   : > { %v9941_v2 = vadd.f32 %v5250_v0, %v5176_v63  ;;  %v7433_v63 = vor.u32 %v8549_v49, %v7430_v50  ;;  %v8728_v49 = vld [vmem:[%s9523_s7 + $0x248] sm:$0xff] }
 0x229   : > { %5817 = vmatpush.bf16.msra.mxu1 %v8728_v49  ;;  %v8719_v49 = vld [vmem:[%s9523_s7 + $0x200] sm:$0xff] }
 0x22a   : > { %5744 = vmatpush.bf16.msra.mxu0 %v8719_v49 }
 0x22c   : > { %v5211_v17 = vpop.f32.mrf.mxu2 }
 0x22e   : > { %v5285_v18 = vpop.f32.mrf.mxu3  ;;  %v5179_v23 = vpop.f32.mrf.mxu0 }
 0x22f   : > { %v9969_v22 = vadd.f32 %v5285_v18, %v5211_v17  ;;  %v5253_v27 = vpop.f32.mrf.mxu1  ;;  %v7564_v17 = vld [vmem:[%s11718_s0 + $0x518] sm:$0xf]  ;;  %v8593_v18 = vld [vmem:[%s11718_s0 + $0x55c] sm:$0xf0] }
 0x230   : > { %v9971_v28 = vadd.f32 %v5253_v27, %v5179_v23  ;;  %v7566_v23 = vld [vmem:[%s11718_s0 + $0x560] sm:$0xf0] }
 0x231   : > { %5336 = vmatmul.bf16.gmra.mxu2 %v7421_v19  ;;  %5479 = vmatmul.bf16.gmra.mxu0 %v7357_v21  ;;  %v7500_v19 = vld [vmem:[%s11718_s0 + $0x490] sm:$0xf]  ;;  %v8576_v21 = vld [vmem:[%s11718_s0 + $0x4d4] sm:$0xf0] }
 0x232   : > { %5553 = vmatmul.bf16.gmra.mxu1 %v7361_v26  ;;  %v7502_v26 = vld [vmem:[%s11718_s0 + $0x4d8] sm:$0xf0] }
 0x233   : > { %5410 = vmatmul.bf16.gmra.mxu3 %v7425_v24  ;;  %v8567_v24 = vld [vmem:[%s11718_s0 + $0x494] sm:$0xf] }
 0x234   : > { %v5214_v32 = vpop.f32.mrf.mxu2  ;;  %v7505_v43 = vor.u32 %v8567_v24, %v7502_v26 }
 0x236   : > { %v5288_v33 = vpop.f32.mrf.mxu3  ;;  %v5181_v38 = vpop.f32.mrf.mxu0 }
 0x237   : > { %v9974_v36 = vadd.f32 %v5288_v33, %v5214_v32  ;;  %v5255_v39 = vpop.f32.mrf.mxu1  ;;  %v7565_v33 = vor.u32 %v8593_v18, %v7564_v17 }
 0x238   : > { %v9977_v42 = vadd.f32 %v5255_v39, %v5181_v38  ;;  %v7501_v38 = vor.u32 %v8576_v21, %v7500_v19 }
 0x23c   : > { %v5216_v51 = vpop.f32.mrf.mxu2 }
 0x23e   : > { %v5290_v53 = vpop.f32.mrf.mxu3  ;;  %v5184_v59 = vpop.f32.mrf.mxu0 }
 0x23f   : > { %v10003_v57 = vadd.f32 %v5290_v53, %v5216_v51  ;;  %v5258_v0 = vpop.f32.mrf.mxu1 }
 0x240   : > { %v10005_v3 = vadd.f32 %v5258_v0, %v5184_v59  ;;  %v8611_v0 = vld [vmem:[%s11718_s0 + $0x5ec] sm:$0xf0] }
 0x241   : > { %5341 = vmatmul.bf16.gmra.mxu2 %v7493_v54  ;;  %5484 = vmatmul.bf16.gmra.mxu0 %v7429_v56 }
 0x242   : > { %5558 = vmatmul.bf16.gmra.mxu1 %v7433_v63  ;;  %v7636_v63 = vld [vmem:[%s11718_s0 + $0x5a8] sm:$0xf] }
 0x243   : > { %5415 = vmatmul.bf16.gmra.mxu3 %v7497_v61  ;;  %v7637_v17 = vor.u32 %v8611_v0, %v7636_v63 }
 0x244   : > { %v5302_v6 = vpop.f32.mrf.mxu2 }
 0x245   : > { %v5303_v7 = vadd.f32 %v5302_v6, %v9799_v8  ;;  %v8584_v8 = vld [vmem:[%s11718_s0 + $0x51c] sm:$0xf]  ;;  %v8594_v6 = vld [vmem:[%s11718_s0 + $0x564] sm:$0xf0] }
 0x246   : > { %v5376_v9 = vpop.f32.mrf.mxu3  ;;  %v5186_v10 = vpop.f32.mrf.mxu0  ;;  %v7569_v40 = vor.u32 %v8584_v8, %v7566_v23 }
 0x247   : > { %v5377_v12 = vadd.f32 %v5376_v9, %v5303_v7  ;;  %v5260_v13 = vpop.f32.mrf.mxu1  ;;  %v7638_v7 = vld [vmem:[%s11718_s0 + $0x5f0] sm:$0xf0]  ;;  %v8585_v9 = vld [vmem:[%s11718_s0 + $0x524] sm:$0xf] }
 0x248   : > { %v10010_v16 = vadd.f32 %v5260_v13, %v5186_v10  ;;  %v7574_v10 = vld [vmem:[%s11718_s0 + $0x568] sm:$0xf0]  ;;  %v7641_v19 = vor.u32 %v8602_v5, %v7638_v7 }
 0x249   : > { %v7577_v21 = vor.u32 %v8585_v9, %v7574_v10 }
 0x24c   : > { %v5304_v27 = vpop.f32.mrf.mxu2 }
 0x24d   : > { %v5305_v30 = vadd.f32 %v5304_v27, %v9804_v15  ;;  %v8703_v27 = vld [vmem:[%s9523_s7 + $0x180] sm:$0xff] }
 0x24e   : > { %v5378_v32 = vpop.f32.mrf.mxu3  ;;  %v5450_v39 = vpop.f32.mrf.mxu0  ;;  %5596 = vmatpush.bf16.msra.mxu2 %v8703_v27  ;;  %v8647_v27 = vld [vmem:[%s11718_s0 + $0x70c] sm:$0xf0] }
 0x24f   : > { %v5379_v44 = vadd.f32 %v5378_v32, %v5305_v30  ;;  %v5451_v45 = vadd.f32 %v5450_v39, %v5377_v12  ;;  %v5524_v46 = vpop.f32.mrf.mxu1  ;;  %v8711_v32 = vld [vmem:[%s9523_s7 + $0x1c0] sm:$0xff] }
 0x250   : > { %5670 = vmatpush.bf16.msra.mxu3 %v8711_v32  ;;  %v8742_v32 = vld [vmem:[%s9523_s7 + $0x2b8] sm:$0xff] }
 0x251   : > { %v10038_v48 = vadd.f32 %v5524_v46, %v5451_v45  ;;  %5346 = vmatmul.bf16.gmra.mxu2 %v7565_v33  ;;  %5489 = vmatmul.bf16.gmra.mxu0 %v7501_v38  ;;  %v7708_v45 = vld [vmem:[%s11718_s0 + $0x638] sm:$0xf] }
 0x252   : > { %5563 = vmatmul.bf16.gmra.mxu1 %v7505_v43  ;;  %v7709_v5 = vor.u32 %v8629_v47, %v7708_v45  ;;  %5885 = vmatpush.bf16.msrb.mxu2 %v8742_v32 }
 0x253   : > { %5420 = vmatmul.bf16.gmra.mxu3 %v7569_v40 }
 0x254   : > { %v5307_v15 = vpop.f32.mrf.mxu2 }
 0x255   : > { %v5308_v50 = vadd.f32 %v5307_v15, %v9833_v34  ;;  %v7572_v34 = vld [vmem:[%s11718_s0 + $0x520] sm:$0xf] }
 0x256   : > { %v5381_v51 = vpop.f32.mrf.mxu3  ;;  %v5452_v53 = vpop.f32.mrf.mxu0  ;;  %v7573_v18 = vor.u32 %v8594_v6, %v7572_v34  ;;  %v8727_v15 = vld [vmem:[%s9523_s7 + $0x240] sm:$0xff] }
 0x257   : > { %v5382_v54 = vadd.f32 %v5381_v51, %v5308_v50  ;;  %v5453_v56 = vadd.f32 %v5452_v53, %v5379_v44  ;;  %v5526_v59 = vpop.f32.mrf.mxu1  ;;  %v7644_v50 = vld [vmem:[%s11718_s0 + $0x5b0] sm:$0xf]  ;;  %v8612_v51 = vld [vmem:[%s11718_s0 + $0x5f4] sm:$0xf0]  ;;  %v7710_v53 = vld [vmem:[%s11718_s0 + $0x680] sm:$0xf0]  ;;  %5818 = vmatpush.bf16.msra.mxu1 %v8727_v15 }
 0x258   : > { %v7645_v34 = vor.u32 %v8612_v51, %v7644_v50 }
 0x259   : > { %v10042_v61 = vadd.f32 %v5526_v59, %v5453_v56  ;;  %v7646_v56 = vld [vmem:[%s11718_s0 + $0x5f8] sm:$0xf0] }
 0x25c   : > { %v5309_v12 = vpop.f32.mrf.mxu2 }
 0x25d   : > { %v5310_v13 = vadd.f32 %v5309_v12, %v9838_v41 }
 0x25e   : > { %v5383_v14 = vpop.f32.mrf.mxu3  ;;  %v5455_v8 = vpop.f32.mrf.mxu0 }
 0x25f   : > { %v5384_v23 = vadd.f32 %v5383_v14, %v5310_v13  ;;  %v5456_v24 = vadd.f32 %v5455_v8, %v5382_v54  ;;  %v5529_v26 = vpop.f32.mrf.mxu1  ;;  %v8603_v54 = vld [vmem:[%s11718_s0 + $0x5b4] sm:$0xf] }
 0x260   : > { %v7649_v9 = vor.u32 %v8603_v54, %v7646_v56 }
 0x261   : > { %v10070_v30 = vadd.f32 %v5529_v26, %v5456_v24  ;;  %5351 = vmatmul.bf16.gmra.mxu2 %v7637_v17  ;;  %5494 = vmatmul.bf16.gmra.mxu0 %v7573_v18  ;;  %v7780_v24 = vld [vmem:[%s11718_s0 + $0x6c8] sm:$0xf] }
 0x262   : > { %5568 = vmatmul.bf16.gmra.mxu1 %v7577_v21  ;;  %v7781_v49 = vor.u32 %v8647_v27, %v7780_v24 }
 0x263   : > { %5425 = vmatmul.bf16.gmra.mxu3 %v7641_v19 }
 0x264   : > { %v5312_v41 = vpop.f32.mrf.mxu2 }
 0x265   : > { %v5313_v33 = vadd.f32 %v5312_v41, %v9867_v60  ;;  %v8620_v60 = vld [vmem:[%s11718_s0 + $0x63c] sm:$0xf] }
 0x266   : > { %v5386_v38 = vpop.f32.mrf.mxu3  ;;  %v5457_v39 = vpop.f32.mrf.mxu0  ;;  %v7713_v7 = vor.u32 %v8620_v60, %v7710_v53  ;;  %v8750_v41 = vld [vmem:[%s9523_s7 + $0x2f8] sm:$0xff] }
 0x267   : > { %v5387_v40 = vadd.f32 %v5386_v38, %v5313_v33  ;;  %v5458_v43 = vadd.f32 %v5457_v39, %v5384_v23  ;;  %v5531_v44 = vpop.f32.mrf.mxu1  ;;  %v7716_v33 = vld [vmem:[%s11718_s0 + $0x640] sm:$0xf]  ;;  %v8630_v38 = vld [vmem:[%s11718_s0 + $0x684] sm:$0xf0]  ;;  %v7782_v39 = vld [vmem:[%s11718_s0 + $0x710] sm:$0xf0]  ;;  %5959 = vmatpush.bf16.msrb.mxu3 %v8750_v41 }
 0x268   : > { %v7717_v15 = vor.u32 %v8630_v38, %v7716_v33 }
 0x269   : > { %v10077_v46 = vadd.f32 %v5531_v44, %v5458_v43  ;;  %v7718_v43 = vld [vmem:[%s11718_s0 + $0x688] sm:$0xf0] }
 0x26c   : > { %v5314_v59 = vpop.f32.mrf.mxu2 }
 0x26d   : > { %v5315_v63 = vadd.f32 %v5314_v59, %v9873_v4 }
 0x26e   : > { %v5388_v0 = vpop.f32.mrf.mxu3  ;;  %v5460_v6 = vpop.f32.mrf.mxu0 }
 0x26f   : > { %v5389_v10 = vadd.f32 %v5388_v0, %v5315_v63  ;;  %v5461_v12 = vadd.f32 %v5460_v6, %v5387_v40  ;;  %v5534_v13 = vpop.f32.mrf.mxu1  ;;  %v8621_v40 = vld [vmem:[%s11718_s0 + $0x644] sm:$0xf]  ;;  %v8758_v63 = vld [vmem:[%s9523_s7 + $0x338] sm:$0xff] }
 0x270   : > { %v7721_v51 = vor.u32 %v8621_v40, %v7718_v43  ;;  %v8766_v0 = vld [vmem:[%s9523_s7 + $0x378] sm:$0xff]  ;;  %6033 = vmatpush.bf16.msrb.mxu0 %v8758_v63  ;;  %v8451_v63 = vld [vmem:[%s11718_s0 + $0xec] sm:$0xf0] }
 0x271   : > { %v10103_v14 = vadd.f32 %v5534_v13, %v5461_v12  ;;  %5356 = vmatmul.bf16.gmra.mxu2 %v7709_v5  ;;  %5499 = vmatmul.bf16.gmra.mxu0 %v7645_v34  ;;  %v7788_v13 = vld [vmem:[%s11718_s0 + $0x6d0] sm:$0xf] }
 0x272   : > { %5573 = vmatmul.bf16.gmra.mxu1 %v7649_v9 }
 0x273   : > { %5430 = vmatmul.bf16.gmra.mxu3 %v7713_v7  ;;  %6107 = vmatpush.bf16.msrb.mxu1 %v8766_v0  ;;  %v8757_v0 = vld [vmem:[%s9523_s7 + $0x330] sm:$0xff] }
 0x274   : > { %v5317_v17 = vpop.f32.mrf.mxu2  ;;  %6034 = vmatpush.bf16.msrb.mxu0 %v8757_v0 }
 0x275   : > { %v5318_v4 = vadd.f32 %v5317_v17, %v9901_v25  ;;  %v8638_v25 = vld [vmem:[%s11718_s0 + $0x6cc] sm:$0xf]  ;;  %v8648_v17 = vld [vmem:[%s11718_s0 + $0x714] sm:$0xf0] }
 0x276   : > { %v5391_v18 = vpop.f32.mrf.mxu3  ;;  %v5462_v8 = vpop.f32.mrf.mxu0  ;;  %v7785_v50 = vor.u32 %v8638_v25, %v7782_v39  ;;  %v7789_v32 = vor.u32 %v8648_v17, %v7788_v13 }
 0x277   : > { %v5392_v19 = vadd.f32 %v5391_v18, %v5318_v4  ;;  %v5463_v21 = vadd.f32 %v5462_v8, %v5389_v10  ;;  %v5536_v23 = vpop.f32.mrf.mxu1  ;;  %v8639_v4 = vld [vmem:[%s11718_s0 + $0x6d4] sm:$0xf]  ;;  %v8433_v18 = vld [vmem:[%s11718_s0 + $0x5c] sm:$0xf0]  ;;  %v7790_v8 = vld [vmem:[%s11718_s0 + $0x718] sm:$0xf0] }
 0x278   : > { %v7793_v33 = vor.u32 %v8639_v4, %v7790_v8 }
 0x279   : > { %v10109_v26 = vadd.f32 %v5536_v23, %v5463_v21  ;;  %v6934_v21 = vld [vmem:[%s11718_s0 + $0x60] sm:$0xf0] }
 0x27c   : > { %v5319_v44 = vpop.f32.mrf.mxu2 }
 0x27d   : > { %v5320_v45 = vadd.f32 %v5319_v44, %v9907_v35 }
 0x27e   : > { %v5393_v47 = vpop.f32.mrf.mxu3  ;;  %v5465_v60 = vpop.f32.mrf.mxu0 }
 0x27f   : > { %v5394_v53 = vadd.f32 %v5393_v47, %v5320_v45  ;;  %v5466_v54 = vadd.f32 %v5465_v60, %v5392_v19  ;;  %v5539_v56 = vpop.f32.mrf.mxu1  ;;  %v8424_v19 = vld [vmem:[%s11718_s0 + $0x1c] sm:$0xf]  ;;  %v8741_v45 = vld [vmem:[%s9523_s7 + $0x2b0] sm:$0xff] }
 0x280   : > { %v6937_v38 = vor.u32 %v8424_v19, %v6934_v21  ;;  %v8749_v47 = vld [vmem:[%s9523_s7 + $0x2f0] sm:$0xff]  ;;  %5886 = vmatpush.bf16.msrb.mxu2 %v8741_v45  ;;  %v8469_v45 = vld [vmem:[%s11718_s0 + $0x17c] sm:$0xf0] }
 0x281   : > { %v10135_v59 = vadd.f32 %v5539_v56, %v5466_v54  ;;  %5361 = vmatmul.bf16.gmra.mxu2 %v7781_v49  ;;  %5504 = vmatmul.bf16.gmra.mxu0 %v7717_v15  ;;  %v7004_v56 = vld [vmem:[%s11718_s0 + $0xa8] sm:$0xf] }
 0x282   : > { %5578 = vmatmul.bf16.gmra.mxu1 %v7721_v51  ;;  %5960 = vmatpush.bf16.msrb.mxu3 %v8749_v47  ;;  %v7005_v17 = vor.u32 %v8451_v63, %v7004_v56  ;;  %v8740_v47 = vld [vmem:[%s9523_s7 + $0x2a8] sm:$0xff] }
 0x283   : > { %5435 = vmatmul.bf16.gmra.mxu3 %v7785_v50 }
 0x284   : > { %v5322_v5 = vpop.f32.mrf.mxu2  ;;  %5887 = vmatpush.bf16.msrb.mxu2 %v8740_v47 }
 0x285   : > { %v5323_v35 = vadd.f32 %v5322_v5, %v9937_v58  ;;  %v6932_v58 = vld [vmem:[%s11718_s0 + $0x18] sm:$0xf]  ;;  %v6940_v5 = vld [vmem:[%s11718_s0 + $0x20] sm:$0xf] }
 0x286   : > { %v5396_v34 = vpop.f32.mrf.mxu3  ;;  %v5467_v6 = vpop.f32.mrf.mxu0  ;;  %v6933_v41 = vor.u32 %v8433_v18, %v6932_v58 }
 0x287   : > { %v5397_v7 = vadd.f32 %v5396_v34, %v5323_v35  ;;  %v5468_v9 = vadd.f32 %v5467_v6, %v5394_v53  ;;  %v5541_v10 = vpop.f32.mrf.mxu1  ;;  %v8434_v35 = vld [vmem:[%s11718_s0 + $0x64] sm:$0xf0]  ;;  %v7006_v34 = vld [vmem:[%s11718_s0 + $0xf0] sm:$0xf0]  ;;  %v8425_v6 = vld [vmem:[%s11718_s0 + $0x24] sm:$0xf] }
 0x288   : > { %v6941_v4 = vor.u32 %v8434_v35, %v6940_v5 }
 0x289   : > { %v10140_v12 = vadd.f32 %v5541_v10, %v5468_v9 }
 0x28c   : > { %v5324_v23 = vpop.f32.mrf.mxu2 }
 0x28d   : > { %v5325_v24 = vadd.f32 %v5324_v23, %v9941_v2 }
 0x28e   : > { %v5398_v27 = vpop.f32.mrf.mxu3  ;;  %v5470_v25 = vpop.f32.mrf.mxu0 }
 0x28f   : > { %v5399_v39 = vadd.f32 %v5398_v27, %v5325_v24  ;;  %v5471_v40 = vadd.f32 %v5470_v25, %v5397_v7  ;;  %v5544_v43 = vpop.f32.mrf.mxu1  ;;  %v6942_v7 = vld [vmem:[%s11718_s0 + $0x68] sm:$0xf0]  ;;  %v8765_v24 = vld [vmem:[%s9523_s7 + $0x370] sm:$0xff] }
 0x290   : > { %v6945_v8 = vor.u32 %v8425_v6, %v6942_v7  ;;  %6108 = vmatpush.bf16.msrb.mxu1 %v8765_v24  ;;  %v8487_v24 = vld [vmem:[%s11718_s0 + $0x20c] sm:$0xf0] }
 0x291   : > { %v10167_v44 = vadd.f32 %v5544_v43, %v5471_v40  ;;  %5509 = vmatmul.bf16.gmra.mxu0 %v7789_v32  ;;  %5597 = vmatmul.bf16.vlgmr.msra.gmra.mxu2 %v6933_v41  ;;  %v7076_v43 = vld [vmem:[%s11718_s0 + $0x138] sm:$0xf] }
 0x292   : > { %5583 = vmatmul.bf16.gmra.mxu1 %v7793_v33  ;;  %v7077_v63 = vor.u32 %v8469_v45, %v7076_v43 }
 0x293   : > { %5671 = vmatmul.bf16.vlgmr.msra.gmra.mxu3 %v6937_v38 }
 0x294   : > { %v5327_v2 = vpop.f32.mrf.mxu2 }
 0x295   : > { %v5328_v49 = vadd.f32 %v5327_v2, %v9971_v28  ;;  %v8442_v28 = vld [vmem:[%s11718_s0 + $0xac] sm:$0xf]  ;;  %v7012_v2 = vld [vmem:[%s11718_s0 + $0xb0] sm:$0xf] }
 0x296   : > { %v5401_v15 = vpop.f32.mrf.mxu3  ;;  %v5472_v60 = vpop.f32.mrf.mxu0  ;;  %v7009_v18 = vor.u32 %v8442_v28, %v7006_v34 }
 0x297   : > { %v5402_v50 = vadd.f32 %v5401_v15, %v5328_v49  ;;  %v5473_v51 = vadd.f32 %v5472_v60, %v5399_v39  ;;  %v5546_v53 = vpop.f32.mrf.mxu1  ;;  %v8452_v49 = vld [vmem:[%s11718_s0 + $0xf4] sm:$0xf0]  ;;  %v7078_v15 = vld [vmem:[%s11718_s0 + $0x180] sm:$0xf0]  ;;  %v8443_v60 = vld [vmem:[%s11718_s0 + $0xb4] sm:$0xf] }
 0x298   : > { %v7013_v0 = vor.u32 %v8452_v49, %v7012_v2 }
 0x299   : > { %v10172_v54 = vadd.f32 %v5546_v53, %v5473_v51 }
 0x29c   : > { %v5329_v9 = vpop.f32.mrf.mxu2 }
 0x29d   : > { %v5330_v10 = vadd.f32 %v5329_v9, %v9977_v42  ;;  %v8748_v9 = vld [vmem:[%s9523_s7 + $0x2e8] sm:$0xff] }
 0x29e   : > { %v5403_v13 = vpop.f32.mrf.mxu3  ;;  %v5475_v58 = vpop.f32.mrf.mxu0  ;;  %5961 = vmatpush.bf16.msrb.mxu3 %v8748_v9  ;;  %v8505_v9 = vld [vmem:[%s11718_s0 + $0x29c] sm:$0xf0] }
 0x29f   : > { %v5404_v19 = vadd.f32 %v5403_v13, %v5330_v10  ;;  %v5476_v21 = vadd.f32 %v5475_v58, %v5402_v50  ;;  %v5549_v23 = vpop.f32.mrf.mxu1  ;;  %v7014_v50 = vld [vmem:[%s11718_s0 + $0xf8] sm:$0xf0] }
 0x2a0   : > { %v7017_v35 = vor.u32 %v8443_v60, %v7014_v50 }
 0x2a1   : > { %v10201_v27 = vadd.f32 %v5549_v23, %v5476_v21  ;;  %5602 = vmatmul.bf16.gmra.mxu2 %v7005_v17  ;;  %5745 = vmatmul.bf16.vlgmr.msra.gmra.mxu0 %v6941_v4  ;;  %v7148_v23 = vld [vmem:[%s11718_s0 + $0x1c8] sm:$0xf] }
 0x2a2   : > { %5819 = vmatmul.bf16.vlgmr.msra.gmra.mxu1 %v6945_v8  ;;  %v7149_v47 = vor.u32 %v8487_v24, %v7148_v23 }
 0x2a3   : > { %5676 = vmatmul.bf16.gmra.mxu3 %v7009_v18 }
 0x2a4   : > { %v5332_v32 = vpop.f32.mrf.mxu2 }
 0x2a5   : > { %v5333_v42 = vadd.f32 %v5332_v32, %v10005_v3  ;;  %v8460_v3 = vld [vmem:[%s11718_s0 + $0x13c] sm:$0xf]  ;;  %v8764_v32 = vld [vmem:[%s9523_s7 + $0x368] sm:$0xff] }
 0x2a6   : > { %v5406_v41 = vpop.f32.mrf.mxu3  ;;  %v5477_v25 = vpop.f32.mrf.mxu0  ;;  %v7081_v5 = vor.u32 %v8460_v3, %v7078_v15  ;;  %6109 = vmatpush.bf16.msrb.mxu1 %v8764_v32 }
 0x2a7   : > { %v5407_v33 = vadd.f32 %v5406_v41, %v5333_v42  ;;  %v5478_v38 = vadd.f32 %v5477_v25, %v5404_v19  ;;  %v5551_v39 = vpop.f32.mrf.mxu1  ;;  %v8756_v19 = vld [vmem:[%s9523_s7 + $0x328] sm:$0xff]  ;;  %v7084_v42 = vld [vmem:[%s11718_s0 + $0x140] sm:$0xf]  ;;  %v7150_v25 = vld [vmem:[%s11718_s0 + $0x210] sm:$0xf0] }
 0x2a8   : > { %6035 = vmatpush.bf16.msrb.mxu0 %v8756_v19  ;;  %v8470_v41 = vld [vmem:[%s11718_s0 + $0x184] sm:$0xf0] }
 0x2a9   : > { %v10204_v40 = vadd.f32 %v5551_v39, %v5478_v38  ;;  %v7086_v38 = vld [vmem:[%s11718_s0 + $0x188] sm:$0xf0]  ;;  %v7085_v3 = vor.u32 %v8470_v41, %v7084_v42 }
 0x2ac   : > { %v5334_v51 = vpop.f32.mrf.mxu2 }
 0x2ad   : > { %v5335_v53 = vadd.f32 %v5334_v51, %v10010_v16 }
 0x2ae   : > { %v5408_v56 = vpop.f32.mrf.mxu3  ;;  %v5480_v28 = vpop.f32.mrf.mxu0 }
 0x2af   : > { %v5409_v34 = vadd.f32 %v5408_v56, %v5335_v53  ;;  %v5481_v6 = vadd.f32 %v5480_v28, %v5407_v33  ;;  %v5554_v7 = vpop.f32.mrf.mxu1  ;;  %v8461_v33 = vld [vmem:[%s11718_s0 + $0x144] sm:$0xf] }
 0x2b0   : > { %v7089_v15 = vor.u32 %v8461_v33, %v7086_v38 }
 0x2b1   : > { %v10233_v10 = vadd.f32 %v5554_v7, %v5481_v6  ;;  %5607 = vmatmul.bf16.gmra.mxu2 %v7077_v63  ;;  %5750 = vmatmul.bf16.gmra.mxu0 %v7013_v0  ;;  %v7220_v7 = vld [vmem:[%s11718_s0 + $0x258] sm:$0xf] }
 0x2b2   : > { %5824 = vmatmul.bf16.gmra.mxu1 %v7017_v35  ;;  %v7221_v24 = vor.u32 %v8505_v9, %v7220_v7 }
 0x2b3   : > { %5681 = vmatmul.bf16.gmra.mxu3 %v7081_v5 }
 0x2b4   : > { %v5337_v16 = vpop.f32.mrf.mxu2 }
 0x2b5   : > { %v5338_v13 = vadd.f32 %v5337_v16, %v9801_v11  ;;  %v8478_v11 = vld [vmem:[%s11718_s0 + $0x1cc] sm:$0xf]  ;;  %v8747_v16 = vld [vmem:[%s9523_s7 + $0x2e0] sm:$0xff] }
 0x2b6   : > { %v5411_v17 = vpop.f32.mrf.mxu3  ;;  %v5482_v4 = vpop.f32.mrf.mxu0  ;;  %v7153_v49 = vor.u32 %v8478_v11, %v7150_v25  ;;  %5962 = vmatpush.bf16.msrb.mxu3 %v8747_v16 }
 0x2b7   : > { %v5412_v58 = vadd.f32 %v5411_v17, %v5338_v13  ;;  %v5483_v18 = vadd.f32 %v5482_v4, %v5409_v34  ;;  %v5556_v8 = vpop.f32.mrf.mxu1  ;;  %v8739_v34 = vld [vmem:[%s9523_s7 + $0x2a0] sm:$0xff]  ;;  %v7156_v13 = vld [vmem:[%s11718_s0 + $0x1d0] sm:$0xf]  ;;  %v8488_v17 = vld [vmem:[%s11718_s0 + $0x214] sm:$0xf0] }
 0x2b8   : > { %5888 = vmatpush.bf16.msrb.mxu2 %v8739_v34  ;;  %v7222_v4 = vld [vmem:[%s11718_s0 + $0x2a0] sm:$0xf0]  ;;  %v7157_v32 = vor.u32 %v8488_v17, %v7156_v13 }
 0x2b9   : > { %v10237_v21 = vadd.f32 %v5556_v8, %v5483_v18  ;;  %v7158_v18 = vld [vmem:[%s11718_s0 + $0x218] sm:$0xf0] }
 0x2bc   : > { %v5339_v39 = vpop.f32.mrf.mxu2 }
 0x2bd   : > { %v5340_v43 = vadd.f32 %v5339_v39, %v9831_v29 }
 0x2be   : > { %v5413_v45 = vpop.f32.mrf.mxu3  ;;  %v5485_v2 = vpop.f32.mrf.mxu0 }
 0x2bf   : > { %v5414_v60 = vadd.f32 %v5413_v45, %v5340_v43  ;;  %v5486_v50 = vadd.f32 %v5485_v2, %v5412_v58  ;;  %v5559_v51 = vpop.f32.mrf.mxu1  ;;  %v8479_v58 = vld [vmem:[%s11718_s0 + $0x1d4] sm:$0xf]  ;;  %v8755_v43 = vld [vmem:[%s9523_s7 + $0x320] sm:$0xff] }
 0x2c0   : > { %v7161_v41 = vor.u32 %v8479_v58, %v7158_v18  ;;  %v8763_v45 = vld [vmem:[%s9523_s7 + $0x360] sm:$0xff]  ;;  %6036 = vmatpush.bf16.msrb.mxu0 %v8755_v43 }
 0x2c1   : > { %v10265_v53 = vadd.f32 %v5559_v51, %v5486_v50  ;;  %5612 = vmatmul.bf16.gmra.mxu2 %v7149_v47  ;;  %5755 = vmatmul.bf16.gmra.mxu0 %v7085_v3  ;;  %v7292_v51 = vld [vmem:[%s11718_s0 + $0x2e8] sm:$0xf]  ;;  %v8541_v43 = vld [vmem:[%s11718_s0 + $0x3bc] sm:$0xf0] }
 0x2c2   : > { %5829 = vmatmul.bf16.gmra.mxu1 %v7089_v15 }
 0x2c3   : > { %5686 = vmatmul.bf16.gmra.mxu3 %v7153_v49  ;;  %6110 = vmatpush.bf16.msrb.mxu1 %v8763_v45  ;;  %v8754_v45 = vld [vmem:[%s9523_s7 + $0x318] sm:$0xff] }
 0x2c4   : > { %v5342_v56 = vpop.f32.mrf.mxu2  ;;  %6037 = vmatpush.bf16.msrb.mxu0 %v8754_v45 }
 0x2c5   : > { %v5343_v29 = vadd.f32 %v5342_v56, %v9835_v37  ;;  %v8496_v37 = vld [vmem:[%s11718_s0 + $0x25c] sm:$0xf]  ;;  %v8523_v56 = vld [vmem:[%s11718_s0 + $0x32c] sm:$0xf0] }
 0x2c6   : > { %v5416_v63 = vpop.f32.mrf.mxu3  ;;  %v5487_v0 = vpop.f32.mrf.mxu0  ;;  %v7225_v42 = vor.u32 %v8496_v37, %v7222_v4  ;;  %v7293_v9 = vor.u32 %v8523_v56, %v7292_v51 }
 0x2c7   : > { %v5417_v28 = vadd.f32 %v5416_v63, %v5343_v29  ;;  %v5488_v5 = vadd.f32 %v5487_v0, %v5414_v60  ;;  %v5561_v35 = vpop.f32.mrf.mxu1  ;;  %v8514_v29 = vld [vmem:[%s11718_s0 + $0x2ec] sm:$0xf]  ;;  %v8506_v63 = vld [vmem:[%s11718_s0 + $0x2a4] sm:$0xf0]  ;;  %v7294_v0 = vld [vmem:[%s11718_s0 + $0x330] sm:$0xf0] }
 0x2c8   : > { %v7297_v13 = vor.u32 %v8514_v29, %v7294_v0 }
 0x2c9   : > { %v10269_v6 = vadd.f32 %v5561_v35, %v5488_v5  ;;  %v7230_v5 = vld [vmem:[%s11718_s0 + $0x2a8] sm:$0xf0] }
 0x2cc   : > { %v5344_v8 = vpop.f32.mrf.mxu2 }
 0x2cd   : > { %v5345_v19 = vadd.f32 %v5344_v8, %v9865_v55 }
 0x2ce   : > { %v5418_v23 = vpop.f32.mrf.mxu3  ;;  %v5490_v11 = vpop.f32.mrf.mxu0 }
 0x2cf   : > { %v5419_v25 = vadd.f32 %v5418_v23, %v5345_v19  ;;  %v5491_v33 = vadd.f32 %v5490_v11, %v5417_v28  ;;  %v5564_v38 = vpop.f32.mrf.mxu1  ;;  %v8497_v28 = vld [vmem:[%s11718_s0 + $0x264] sm:$0xf]  ;;  %v8738_v19 = vld [vmem:[%s9523_s7 + $0x298] sm:$0xff] }
 0x2d0   : > { %v7233_v17 = vor.u32 %v8497_v28, %v7230_v5  ;;  %5889 = vmatpush.bf16.msrb.mxu2 %v8738_v19  ;;  %v8559_v19 = vld [vmem:[%s11718_s0 + $0x44c] sm:$0xf0] }
 0x2d1   : > { %v10297_v39 = vadd.f32 %v5564_v38, %v5491_v33  ;;  %5617 = vmatmul.bf16.gmra.mxu2 %v7221_v24  ;;  %5760 = vmatmul.bf16.gmra.mxu0 %v7157_v32  ;;  %v7364_v33 = vld [vmem:[%s11718_s0 + $0x378] sm:$0xf] }
 0x2d2   : > { %5834 = vmatmul.bf16.gmra.mxu1 %v7161_v41  ;;  %v7365_v29 = vor.u32 %v8541_v43, %v7364_v33 }
 0x2d3   : > { %5691 = vmatmul.bf16.gmra.mxu3 %v7225_v42 }
 0x2d4   : > { %v5347_v55 = vpop.f32.mrf.mxu2 }
 0x2d5   : > { %v5348_v47 = vadd.f32 %v5347_v55, %v9871_v1  ;;  %v7228_v1 = vld [vmem:[%s11718_s0 + $0x260] sm:$0xf]  ;;  %v8762_v55 = vld [vmem:[%s9523_s7 + $0x358] sm:$0xff] }
 0x2d6   : > { %v5421_v3 = vpop.f32.mrf.mxu3  ;;  %v5492_v2 = vpop.f32.mrf.mxu0  ;;  %v7229_v16 = vor.u32 %v8506_v63, %v7228_v1  ;;  %6111 = vmatpush.bf16.msrb.mxu1 %v8762_v55 }
 0x2d7   : > { %v5422_v49 = vadd.f32 %v5421_v3, %v5348_v47  ;;  %v5493_v15 = vadd.f32 %v5492_v2, %v5419_v25  ;;  %v5566_v60 = vpop.f32.mrf.mxu1  ;;  %v7300_v47 = vld [vmem:[%s11718_s0 + $0x2f0] sm:$0xf]  ;;  %v8524_v3 = vld [vmem:[%s11718_s0 + $0x334] sm:$0xf0]  ;;  %v7366_v2 = vld [vmem:[%s11718_s0 + $0x3c0] sm:$0xf0] }
 0x2d8   : > { %v7301_v1 = vor.u32 %v8524_v3, %v7300_v47 }
 0x2d9   : > { %v10302_v50 = vadd.f32 %v5566_v60, %v5493_v15  ;;  %v7302_v15 = vld [vmem:[%s11718_s0 + $0x338] sm:$0xf0] }
 0x2dc   : > { %v5349_v35 = vpop.f32.mrf.mxu2 }
 0x2dd   : > { %v5350_v34 = vadd.f32 %v5349_v35, %v9899_v20  ;;  %v8746_v20 = vld [vmem:[%s9523_s7 + $0x2d8] sm:$0xff] }
 0x2de   : > { %v5423_v7 = vpop.f32.mrf.mxu3  ;;  %v5495_v37 = vpop.f32.mrf.mxu0  ;;  %5963 = vmatpush.bf16.msrb.mxu3 %v8746_v20  ;;  %v8737_v20 = vld [vmem:[%s9523_s7 + $0x290] sm:$0xff] }
 0x2df   : > { %v5424_v4 = vadd.f32 %v5423_v7, %v5350_v34  ;;  %v5496_v58 = vadd.f32 %v5495_v37, %v5422_v49  ;;  %v5569_v18 = vpop.f32.mrf.mxu1  ;;  %v8515_v49 = vld [vmem:[%s11718_s0 + $0x2f4] sm:$0xf]  ;;  %5890 = vmatpush.bf16.msrb.mxu2 %v8737_v20 }
 0x2e0   : > { %v7305_v28 = vor.u32 %v8515_v49, %v7302_v15 }
 0x2e1   : > { %v10329_v8 = vadd.f32 %v5569_v18, %v5496_v58  ;;  %5622 = vmatmul.bf16.gmra.mxu2 %v7293_v9  ;;  %5765 = vmatmul.bf16.gmra.mxu0 %v7229_v16  ;;  %v7436_v58 = vld [vmem:[%s11718_s0 + $0x408] sm:$0xf] }
 0x2e2   : > { %5839 = vmatmul.bf16.gmra.mxu1 %v7233_v17  ;;  %v7437_v45 = vor.u32 %v8559_v19, %v7436_v58 }
 0x2e3   : > { %5696 = vmatmul.bf16.gmra.mxu3 %v7297_v13 }
 0x2e4   : > { %v5352_v23 = vpop.f32.mrf.mxu2 }
 0x2e5   : > { %v5353_v24 = vadd.f32 %v5352_v23, %v9905_v31  ;;  %v8532_v31 = vld [vmem:[%s11718_s0 + $0x37c] sm:$0xf]  ;;  %v8745_v23 = vld [vmem:[%s9523_s7 + $0x2d0] sm:$0xff] }
 0x2e6   : > { %v5426_v32 = vpop.f32.mrf.mxu3  ;;  %v5497_v11 = vpop.f32.mrf.mxu0  ;;  %v7369_v0 = vor.u32 %v8532_v31, %v7366_v2  ;;  %5964 = vmatpush.bf16.msrb.mxu3 %v8745_v23 }
 0x2e7   : > { %v5427_v42 = vadd.f32 %v5426_v32, %v5353_v24  ;;  %v5498_v41 = vadd.f32 %v5497_v11, %v5424_v4  ;;  %v5571_v25 = vpop.f32.mrf.mxu1  ;;  %v7372_v24 = vld [vmem:[%s11718_s0 + $0x380] sm:$0xf]  ;;  %v8542_v32 = vld [vmem:[%s11718_s0 + $0x3c4] sm:$0xf0]  ;;  %v7438_v11 = vld [vmem:[%s11718_s0 + $0x450] sm:$0xf0] }
 0x2e8   : > { %v7373_v55 = vor.u32 %v8542_v32, %v7372_v24 }
 0x2e9   : > { %v10337_v38 = vadd.f32 %v5571_v25, %v5498_v41  ;;  %v7374_v41 = vld [vmem:[%s11718_s0 + $0x3c8] sm:$0xf0] }
 0x2ec   : > { %v5354_v60 = vpop.f32.mrf.mxu2 }
 0x2ed   : > { %v5355_v51 = vadd.f32 %v5354_v60, %v9935_v52 }
 0x2ee   : > { %v5428_v56 = vpop.f32.mrf.mxu3  ;;  %v5500_v63 = vpop.f32.mrf.mxu0 }
 0x2ef   : > { %v5429_v5 = vadd.f32 %v5428_v56, %v5355_v51  ;;  %v5501_v35 = vadd.f32 %v5500_v63, %v5427_v42  ;;  %v5574_v34 = vpop.f32.mrf.mxu1  ;;  %v8533_v42 = vld [vmem:[%s11718_s0 + $0x384] sm:$0xf]  ;;  %v8753_v51 = vld [vmem:[%s9523_s7 + $0x310] sm:$0xff] }
 0x2f0   : > { %v7377_v3 = vor.u32 %v8533_v42, %v7374_v41  ;;  %6038 = vmatpush.bf16.msrb.mxu0 %v8753_v51  ;;  %v8595_v51 = vld [vmem:[%s11718_s0 + $0x56c] sm:$0xf0] }
 0x2f1   : > { %v10363_v7 = vadd.f32 %v5574_v34, %v5501_v35  ;;  %5627 = vmatmul.bf16.gmra.mxu2 %v7365_v29  ;;  %5770 = vmatmul.bf16.gmra.mxu0 %v7301_v1  ;;  %v7508_v34 = vld [vmem:[%s11718_s0 + $0x498] sm:$0xf] }
 0x2f2   : > { %5844 = vmatmul.bf16.gmra.mxu1 %v7305_v28 }
 0x2f3   : > { %5701 = vmatmul.bf16.gmra.mxu3 %v7369_v0 }
 0x2f4   : > { %v5357_v9 = vpop.f32.mrf.mxu2 }
 0x2f5   : > { %v5358_v52 = vadd.f32 %v5357_v9, %v9939_v62  ;;  %v8550_v62 = vld [vmem:[%s11718_s0 + $0x40c] sm:$0xf]  ;;  %v8577_v9 = vld [vmem:[%s11718_s0 + $0x4dc] sm:$0xf0] }
 0x2f6   : > { %v5431_v16 = vpop.f32.mrf.mxu3  ;;  %v5502_v37 = vpop.f32.mrf.mxu0  ;;  %v7441_v47 = vor.u32 %v8550_v62, %v7438_v11  ;;  %v7509_v20 = vor.u32 %v8577_v9, %v7508_v34 }
 0x2f7   : > { %v5432_v13 = vadd.f32 %v5431_v16, %v5358_v52  ;;  %v5503_v17 = vadd.f32 %v5502_v37, %v5429_v5  ;;  %v5576_v4 = vpop.f32.mrf.mxu1  ;;  %v8761_v5 = vld [vmem:[%s9523_s7 + $0x350] sm:$0xff]  ;;  %v8560_v16 = vld [vmem:[%s11718_s0 + $0x454] sm:$0xf0]  ;;  %v7510_v37 = vld [vmem:[%s11718_s0 + $0x4e0] sm:$0xf0] }
 0x2f8   : > { %6112 = vmatpush.bf16.msrb.mxu1 %v8761_v5  ;;  %v7444_v52 = vld [vmem:[%s11718_s0 + $0x410] sm:$0xf] }
 0x2f9   : > { %v10369_v18 = vadd.f32 %v5576_v4, %v5503_v17  ;;  %v7446_v17 = vld [vmem:[%s11718_s0 + $0x458] sm:$0xf0]  ;;  %v7445_v23 = vor.u32 %v8560_v16, %v7444_v52 }
 0x2fc   : > { %v5359_v25 = vpop.f32.mrf.mxu2 }
 0x2fd   : > { %v5360_v33 = vadd.f32 %v5359_v25, %v9969_v22 }
 0x2fe   : > { %v5433_v43 = vpop.f32.mrf.mxu3  ;;  %v5505_v31 = vpop.f32.mrf.mxu0 }
 0x2ff   : > { %v5434_v2 = vadd.f32 %v5433_v43, %v5360_v33  ;;  %v5506_v49 = vadd.f32 %v5505_v31, %v5432_v13  ;;  %v5579_v15 = vpop.f32.mrf.mxu1  ;;  %v8551_v13 = vld [vmem:[%s11718_s0 + $0x414] sm:$0xf]  ;;  %v8736_v33 = vld [vmem:[%s9523_s7 + $0x288] sm:$0xff] }
 0x300   : > { %v7449_v32 = vor.u32 %v8551_v13, %v7446_v17  ;;  %5891 = vmatpush.bf16.msrb.mxu2 %v8736_v33  ;;  %v8613_v33 = vld [vmem:[%s11718_s0 + $0x5fc] sm:$0xf0] }
 0x301   : > { %v10395_v60 = vadd.f32 %v5579_v15, %v5506_v49  ;;  %5632 = vmatmul.bf16.gmra.mxu2 %v7437_v45  ;;  %5775 = vmatmul.bf16.gmra.mxu0 %v7373_v55  ;;  %v7580_v15 = vld [vmem:[%s11718_s0 + $0x528] sm:$0xf] }
 0x302   : > { %5849 = vmatmul.bf16.gmra.mxu1 %v7377_v3  ;;  %v7581_v34 = vor.u32 %v8595_v51, %v7580_v15 }
 0x303   : > { %5706 = vmatmul.bf16.gmra.mxu3 %v7441_v47 }
 0x304   : > { %v5362_v56 = vpop.f32.mrf.mxu2 }
 0x305   : > { %v5363_v22 = vadd.f32 %v5362_v56, %v9974_v36  ;;  %v8568_v36 = vld [vmem:[%s11718_s0 + $0x49c] sm:$0xf]  ;;  %v7516_v56 = vld [vmem:[%s11718_s0 + $0x4a0] sm:$0xf] }
 0x306   : > { %v5436_v29 = vpop.f32.mrf.mxu3  ;;  %v5507_v1 = vpop.f32.mrf.mxu0  ;;  %v7513_v24 = vor.u32 %v8568_v36, %v7510_v37 }
 0x307   : > { %v5437_v63 = vadd.f32 %v5436_v29, %v5363_v22  ;;  %v5508_v0 = vadd.f32 %v5507_v1, %v5434_v2  ;;  %v5581_v28 = vpop.f32.mrf.mxu1  ;;  %v8744_v2 = vld [vmem:[%s9523_s7 + $0x2c8] sm:$0xff]  ;;  %v7582_v29 = vld [vmem:[%s11718_s0 + $0x570] sm:$0xf0]  ;;  %v8569_v1 = vld [vmem:[%s11718_s0 + $0x4a4] sm:$0xf] }
 0x308   : > { %5965 = vmatpush.bf16.msrb.mxu3 %v8744_v2  ;;  %v8578_v22 = vld [vmem:[%s11718_s0 + $0x4e4] sm:$0xf0] }
 0x309   : > { %v10400_v35 = vadd.f32 %v5581_v28, %v5508_v0  ;;  %v7517_v9 = vor.u32 %v8578_v22, %v7516_v56 }
 0x30c   : > { %v5364_v4 = vpop.f32.mrf.mxu2 }
 0x30d   : > { %v5365_v58 = vadd.f32 %v5364_v4, %v10003_v57  ;;  %v8752_v4 = vld [vmem:[%s9523_s7 + $0x308] sm:$0xff] }
 0x30e   : > { %v5438_v19 = vpop.f32.mrf.mxu3  ;;  %v5510_v62 = vpop.f32.mrf.mxu0  ;;  %6039 = vmatpush.bf16.msrb.mxu0 %v8752_v4  ;;  %v8631_v4 = vld [vmem:[%s11718_s0 + $0x68c] sm:$0xf0] }
 0x30f   : > { %v5439_v11 = vadd.f32 %v5438_v19, %v5365_v58  ;;  %v5511_v42 = vadd.f32 %v5510_v62, %v5437_v63  ;;  %v5584_v41 = vpop.f32.mrf.mxu1  ;;  %v7518_v63 = vld [vmem:[%s11718_s0 + $0x4e8] sm:$0xf0] }
 0x310   : > { %v7521_v16 = vor.u32 %v8569_v1, %v7518_v63  ;;  %v8760_v19 = vld [vmem:[%s9523_s7 + $0x348] sm:$0xff] }
 0x311   : > { %v10427_v25 = vadd.f32 %v5584_v41, %v5511_v42  ;;  %5637 = vmatmul.bf16.gmra.mxu2 %v7509_v20  ;;  %5780 = vmatmul.bf16.gmra.mxu0 %v7445_v23  ;;  %v7652_v41 = vld [vmem:[%s11718_s0 + $0x5b8] sm:$0xf] }
 0x312   : > { %5854 = vmatmul.bf16.gmra.mxu1 %v7449_v32  ;;  %v7653_v15 = vor.u32 %v8613_v33, %v7652_v41 }
 0x313   : > { %5711 = vmatmul.bf16.gmra.mxu3 %v7513_v24  ;;  %6113 = vmatpush.bf16.msrb.mxu1 %v8760_v19  ;;  %v8751_v19 = vld [vmem:[%s9523_s7 + $0x300] sm:$0xff] }
 0x314   : > { %v5598_v43 = vpop.f32.mrf.mxu2  ;;  %6040 = vmatpush.bf16.msrb.mxu0 %v8751_v19 }
 0x315   : > { %v5599_v57 = vadd.f32 %v5598_v43, %v10038_v48  ;;  %v8586_v48 = vld [vmem:[%s11718_s0 + $0x52c] sm:$0xf]  ;;  %v8604_v43 = vld [vmem:[%s11718_s0 + $0x5bc] sm:$0xf] }
 0x316   : > { %v5672_v45 = vpop.f32.mrf.mxu3  ;;  %v5512_v55 = vpop.f32.mrf.mxu0  ;;  %v7585_v52 = vor.u32 %v8586_v48, %v7582_v29 }
 0x317   : > { %v5673_v31 = vadd.f32 %v5672_v45, %v5599_v57  ;;  %v5513_v47 = vadd.f32 %v5512_v55, %v5439_v11  ;;  %v5586_v3 = vpop.f32.mrf.mxu1  ;;  %v8596_v57 = vld [vmem:[%s11718_s0 + $0x574] sm:$0xf0]  ;;  %v7654_v45 = vld [vmem:[%s11718_s0 + $0x600] sm:$0xf0]  ;;  %v8587_v55 = vld [vmem:[%s11718_s0 + $0x534] sm:$0xf] }
 0x318   : > { %v7657_v56 = vor.u32 %v8604_v43, %v7654_v45 }
 0x319   : > { %v10432_v49 = vadd.f32 %v5586_v3, %v5513_v47 }
 0x31c   : > { %v5600_v0 = vpop.f32.mrf.mxu2 }
 0x31d   : > { %v5601_v28 = vadd.f32 %v5600_v0, %v10042_v61  ;;  %v8735_v0 = vld [vmem:[%s9523_s7 + $0x280] sm:$0xff] }
 0x31e   : > { %v5674_v5 = vpop.f32.mrf.mxu3  ;;  %v5746_v36 = vpop.f32.mrf.mxu0  ;;  %5892 = vmatpush.bf16.msrb.mxu2 %v8735_v0  ;;  %v8649_v0 = vld [vmem:[%s11718_s0 + $0x71c] sm:$0xf0] }
 0x31f   : > { %v5675_v37 = vadd.f32 %v5674_v5, %v5601_v28  ;;  %v5747_v13 = vadd.f32 %v5746_v36, %v5673_v31  ;;  %v5820_v17 = vpop.f32.mrf.mxu1  ;;  %v7590_v31 = vld [vmem:[%s11718_s0 + $0x578] sm:$0xf0]  ;;  %v8743_v5 = vld [vmem:[%s9523_s7 + $0x2c0] sm:$0xff] }
 0x320   : > { %v7593_v22 = vor.u32 %v8587_v55, %v7590_v31  ;;  %5966 = vmatpush.bf16.msrb.mxu3 %v8743_v5  ;;  %v8774_v5 = vld [vmem:[%s9523_s7 + $0x3b8] sm:$0xff] }
 0x321   : > { %v10460_v58 = vadd.f32 %v5820_v17, %v5747_v13  ;;  %5642 = vmatmul.bf16.gmra.mxu2 %v7581_v34  ;;  %5785 = vmatmul.bf16.gmra.mxu0 %v7517_v9  ;;  %v7724_v13 = vld [vmem:[%s11718_s0 + $0x648] sm:$0xf] }
 0x322   : > { %5859 = vmatmul.bf16.gmra.mxu1 %v7521_v16  ;;  %v7725_v43 = vor.u32 %v8631_v4, %v7724_v13  ;;  %6181 = vmatpush.bf16.msra.mxu2 %v8774_v5 }
 0x323   : > { %5716 = vmatmul.bf16.gmra.mxu3 %v7585_v52 }
 0x324   : > { %v5603_v61 = vpop.f32.mrf.mxu2 }
 0x325   : > { %v5604_v20 = vadd.f32 %v5603_v61, %v10070_v30  ;;  %v7588_v30 = vld [vmem:[%s11718_s0 + $0x530] sm:$0xf]  ;;  %v8759_v61 = vld [vmem:[%s9523_s7 + $0x340] sm:$0xff] }
 0x326   : > { %v5677_v23 = vpop.f32.mrf.mxu3  ;;  %v5748_v62 = vpop.f32.mrf.mxu0  ;;  %v7589_v51 = vor.u32 %v8596_v57, %v7588_v30  ;;  %6114 = vmatpush.bf16.msrb.mxu1 %v8759_v61 }
 0x327   : > { %v5678_v24 = vadd.f32 %v5677_v23, %v5604_v20  ;;  %v5749_v32 = vadd.f32 %v5748_v62, %v5675_v37  ;;  %v5822_v11 = vpop.f32.mrf.mxu1  ;;  %v7660_v20 = vld [vmem:[%s11718_s0 + $0x5c0] sm:$0xf]  ;;  %v8614_v23 = vld [vmem:[%s11718_s0 + $0x604] sm:$0xf0]  ;;  %v7726_v62 = vld [vmem:[%s11718_s0 + $0x690] sm:$0xf0] }
 0x328   : > { %v7661_v30 = vor.u32 %v8614_v23, %v7660_v20 }
 0x329   : > { %v10464_v42 = vadd.f32 %v5822_v11, %v5749_v32  ;;  %v7662_v32 = vld [vmem:[%s11718_s0 + $0x608] sm:$0xf0] }
 0x32c   : > { %v5605_v47 = vpop.f32.mrf.mxu2 }
 0x32d   : > { %v5606_v3 = vadd.f32 %v5605_v47, %v10077_v46 }
 0x32e   : > { %v5679_v2 = vpop.f32.mrf.mxu3  ;;  %v5751_v48 = vpop.f32.mrf.mxu0 }
 0x32f   : > { %v5680_v29 = vadd.f32 %v5679_v2, %v5606_v3  ;;  %v5752_v1 = vadd.f32 %v5751_v48, %v5678_v24  ;;  %v5825_v63 = vpop.f32.mrf.mxu1  ;;  %v8605_v24 = vld [vmem:[%s11718_s0 + $0x5c4] sm:$0xf] }
 0x330   : > { %v7665_v55 = vor.u32 %v8605_v24, %v7662_v32 }
 0x331   : > { %v10492_v28 = vadd.f32 %v5825_v63, %v5752_v1  ;;  %5647 = vmatmul.bf16.gmra.mxu2 %v7653_v15  ;;  %5790 = vmatmul.bf16.gmra.mxu0 %v7589_v51  ;;  %v7796_v1 = vld [vmem:[%s11718_s0 + $0x6d8] sm:$0xf] }
 0x332   : > { %5864 = vmatmul.bf16.gmra.mxu1 %v7593_v22  ;;  %v7797_v19 = vor.u32 %v8649_v0, %v7796_v1 }
 0x333   : > { %5721 = vmatmul.bf16.gmra.mxu3 %v7657_v56 }
 0x334   : > { %v5608_v46 = vpop.f32.mrf.mxu2 }
 0x335   : > { %v5609_v34 = vadd.f32 %v5608_v46, %v10103_v14  ;;  %v8622_v14 = vld [vmem:[%s11718_s0 + $0x64c] sm:$0xf]  ;;  %v8782_v46 = vld [vmem:[%s9523_s7 + $0x3f8] sm:$0xff] }
 0x336   : > { %v5682_v9 = vpop.f32.mrf.mxu3  ;;  %v5753_v36 = vpop.f32.mrf.mxu0  ;;  %v7729_v45 = vor.u32 %v8622_v14, %v7726_v62  ;;  %6255 = vmatpush.bf16.msra.mxu3 %v8782_v46 }
 0x337   : > { %v5683_v52 = vadd.f32 %v5682_v9, %v5609_v34  ;;  %v5754_v16 = vadd.f32 %v5753_v36, %v5680_v29  ;;  %v5827_v37 = vpop.f32.mrf.mxu1  ;;  %v7732_v34 = vld [vmem:[%s11718_s0 + $0x650] sm:$0xf]  ;;  %v8632_v9 = vld [vmem:[%s11718_s0 + $0x694] sm:$0xf0]  ;;  %v7798_v36 = vld [vmem:[%s11718_s0 + $0x720] sm:$0xf0] }
 0x338   : > { %v7733_v61 = vor.u32 %v8632_v9, %v7732_v34 }
 0x339   : > { %v10499_v17 = vadd.f32 %v5827_v37, %v5754_v16  ;;  %v7734_v16 = vld [vmem:[%s11718_s0 + $0x698] sm:$0xf0] }
 0x33c   : > { %v5610_v11 = vpop.f32.mrf.mxu2 }
 0x33d   : > { %v5611_v41 = vadd.f32 %v5610_v11, %v10109_v26 }
 0x33e   : > { %v5684_v33 = vpop.f32.mrf.mxu3  ;;  %v5756_v57 = vpop.f32.mrf.mxu0 }
 0x33f   : > { %v5685_v31 = vadd.f32 %v5684_v33, %v5611_v41  ;;  %v5757_v47 = vadd.f32 %v5756_v57, %v5683_v52  ;;  %v5830_v3 = vpop.f32.mrf.mxu1  ;;  %v8623_v52 = vld [vmem:[%s11718_s0 + $0x654] sm:$0xf]  ;;  %v8790_v41 = vld [vmem:[%s9523_s7 + $0x438] sm:$0xff] }
 0x340   : > { %v7737_v23 = vor.u32 %v8623_v52, %v7734_v16  ;;  %v8798_v33 = vld [vmem:[%s9523_s7 + $0x478] sm:$0xff]  ;;  %6329 = vmatpush.bf16.msra.mxu0 %v8790_v41  ;;  %v8453_v41 = vld [vmem:[%s11718_s0 + $0xfc] sm:$0xf0] }
 0x341   : > { %v10525_v2 = vadd.f32 %v5830_v3, %v5757_v47  ;;  %5652 = vmatmul.bf16.gmra.mxu2 %v7725_v43  ;;  %5795 = vmatmul.bf16.gmra.mxu0 %v7661_v30  ;;  %v7804_v3 = vld [vmem:[%s11718_s0 + $0x6e0] sm:$0xf] }
 0x342   : > { %5869 = vmatmul.bf16.gmra.mxu1 %v7665_v55 }
 0x343   : > { %5726 = vmatmul.bf16.gmra.mxu3 %v7729_v45  ;;  %6403 = vmatpush.bf16.msra.mxu1 %v8798_v33  ;;  %v8789_v33 = vld [vmem:[%s9523_s7 + $0x430] sm:$0xff] }
 0x344   : > { %v5613_v15 = vpop.f32.mrf.mxu2  ;;  %6330 = vmatpush.bf16.msra.mxu0 %v8789_v33 }
 0x345   : > { %v5614_v26 = vadd.f32 %v5613_v15, %v10135_v59  ;;  %v8640_v59 = vld [vmem:[%s11718_s0 + $0x6dc] sm:$0xf]  ;;  %v8650_v15 = vld [vmem:[%s11718_s0 + $0x724] sm:$0xf0] }
 0x346   : > { %v5687_v51 = vpop.f32.mrf.mxu3  ;;  %v5758_v48 = vpop.f32.mrf.mxu0  ;;  %v7801_v20 = vor.u32 %v8640_v59, %v7798_v36  ;;  %v7805_v5 = vor.u32 %v8650_v15, %v7804_v3 }
 0x347   : > { %v5688_v56 = vadd.f32 %v5687_v51, %v5614_v26  ;;  %v5759_v22 = vadd.f32 %v5758_v48, %v5685_v31  ;;  %v5832_v29 = vpop.f32.mrf.mxu1  ;;  %v8641_v26 = vld [vmem:[%s11718_s0 + $0x6e4] sm:$0xf]  ;;  %v8435_v51 = vld [vmem:[%s11718_s0 + $0x6c] sm:$0xf0]  ;;  %v7806_v48 = vld [vmem:[%s11718_s0 + $0x728] sm:$0xf0] }
 0x348   : > { %v7809_v34 = vor.u32 %v8641_v26, %v7806_v48 }
 0x349   : > { %v10531_v63 = vadd.f32 %v5832_v29, %v5759_v22  ;;  %v6950_v22 = vld [vmem:[%s11718_s0 + $0x70] sm:$0xf0] }
 0x34c   : > { %v5615_v37 = vpop.f32.mrf.mxu2 }
 0x34d   : > { %v5616_v13 = vadd.f32 %v5615_v37, %v10140_v12 }
 0x34e   : > { %v5689_v4 = vpop.f32.mrf.mxu3  ;;  %v5761_v14 = vpop.f32.mrf.mxu0 }
 0x34f   : > { %v5690_v62 = vadd.f32 %v5689_v4, %v5616_v13  ;;  %v5762_v24 = vadd.f32 %v5761_v14, %v5688_v56  ;;  %v5835_v32 = vpop.f32.mrf.mxu1  ;;  %v8426_v56 = vld [vmem:[%s11718_s0 + $0x2c] sm:$0xf]  ;;  %v8773_v13 = vld [vmem:[%s9523_s7 + $0x3b0] sm:$0xff] }
 0x350   : > { %v6953_v9 = vor.u32 %v8426_v56, %v6950_v22  ;;  %v8781_v4 = vld [vmem:[%s9523_s7 + $0x3f0] sm:$0xff]  ;;  %6182 = vmatpush.bf16.msra.mxu2 %v8773_v13 }
 0x351   : > { %v10557_v11 = vadd.f32 %v5835_v32, %v5762_v24  ;;  %5657 = vmatmul.bf16.gmra.mxu2 %v7797_v19  ;;  %5800 = vmatmul.bf16.gmra.mxu0 %v7733_v61  ;;  %v7020_v32 = vld [vmem:[%s11718_s0 + $0xb8] sm:$0xf]  ;;  %v8471_v13 = vld [vmem:[%s11718_s0 + $0x18c] sm:$0xf0] }
 0x352   : > { %5874 = vmatmul.bf16.gmra.mxu1 %v7737_v23  ;;  %6256 = vmatpush.bf16.msra.mxu3 %v8781_v4  ;;  %v7021_v15 = vor.u32 %v8453_v41, %v7020_v32  ;;  %v8772_v4 = vld [vmem:[%s9523_s7 + $0x3a8] sm:$0xff] }
 0x353   : > { %5731 = vmatmul.bf16.gmra.mxu3 %v7801_v20 }
 0x354   : > { %v5618_v43 = vpop.f32.mrf.mxu2  ;;  %6183 = vmatpush.bf16.msra.mxu2 %v8772_v4 }
 0x355   : > { %v5619_v12 = vadd.f32 %v5618_v43, %v10167_v44  ;;  %v6948_v44 = vld [vmem:[%s11718_s0 + $0x28] sm:$0xf]  ;;  %v6956_v43 = vld [vmem:[%s11718_s0 + $0x30] sm:$0xf] }
 0x356   : > { %v5692_v30 = vpop.f32.mrf.mxu3  ;;  %v5763_v57 = vpop.f32.mrf.mxu0  ;;  %v6949_v46 = vor.u32 %v8435_v51, %v6948_v44 }
 0x357   : > { %v5693_v45 = vadd.f32 %v5692_v30, %v5619_v12  ;;  %v5764_v55 = vadd.f32 %v5763_v57, %v5690_v62  ;;  %v5837_v31 = vpop.f32.mrf.mxu1  ;;  %v8436_v12 = vld [vmem:[%s11718_s0 + $0x74] sm:$0xf0]  ;;  %v7022_v30 = vld [vmem:[%s11718_s0 + $0x100] sm:$0xf0]  ;;  %v8427_v57 = vld [vmem:[%s11718_s0 + $0x34] sm:$0xf] }
 0x358   : > { %v6957_v26 = vor.u32 %v8436_v12, %v6956_v43 }
 0x359   : > { %v10562_v47 = vadd.f32 %v5837_v31, %v5764_v55 }
 0x35c   : > { %v5620_v29 = vpop.f32.mrf.mxu2 }
 0x35d   : > { %v5621_v1 = vadd.f32 %v5620_v29, %v10172_v54 }
 0x35e   : > { %v5694_v0 = vpop.f32.mrf.mxu3  ;;  %v5766_v59 = vpop.f32.mrf.mxu0 }
 0x35f   : > { %v5695_v36 = vadd.f32 %v5694_v0, %v5621_v1  ;;  %v5767_v52 = vadd.f32 %v5766_v59, %v5693_v45  ;;  %v5840_v16 = vpop.f32.mrf.mxu1  ;;  %v6958_v45 = vld [vmem:[%s11718_s0 + $0x78] sm:$0xf0]  ;;  %v8797_v1 = vld [vmem:[%s9523_s7 + $0x470] sm:$0xff] }
 0x360   : > { %v6961_v48 = vor.u32 %v8427_v57, %v6958_v45  ;;  %6404 = vmatpush.bf16.msra.mxu1 %v8797_v1  ;;  %v8489_v1 = vld [vmem:[%s11718_s0 + $0x21c] sm:$0xf0] }
 0x361   : > { %v10589_v37 = vadd.f32 %v5840_v16, %v5767_v52  ;;  %5805 = vmatmul.bf16.gmra.mxu0 %v7805_v5  ;;  %5893 = vmatmul.bf16.vlgmr.msrb.gmra.mxu2 %v6949_v46  ;;  %v7092_v16 = vld [vmem:[%s11718_s0 + $0x148] sm:$0xf] }
 0x362   : > { %5879 = vmatmul.bf16.gmra.mxu1 %v7809_v34  ;;  %v7093_v41 = vor.u32 %v8471_v13, %v7092_v16 }
 0x363   : > { %5967 = vmatmul.bf16.vlgmr.msrb.gmra.mxu3 %v6953_v9 }
 0x364   : > { %v5623_v54 = vpop.f32.mrf.mxu2 }
 0x365   : > { %v5624_v19 = vadd.f32 %v5623_v54, %v10201_v27  ;;  %v8444_v27 = vld [vmem:[%s11718_s0 + $0xbc] sm:$0xf]  ;;  %v7028_v54 = vld [vmem:[%s11718_s0 + $0xc0] sm:$0xf] }
 0x366   : > { %v5697_v61 = vpop.f32.mrf.mxu3  ;;  %v5768_v14 = vpop.f32.mrf.mxu0  ;;  %v7025_v51 = vor.u32 %v8444_v27, %v7022_v30 }
 0x367   : > { %v5698_v20 = vadd.f32 %v5697_v61, %v5624_v19  ;;  %v5769_v23 = vadd.f32 %v5768_v14, %v5695_v36  ;;  %v5842_v62 = vpop.f32.mrf.mxu1  ;;  %v8454_v19 = vld [vmem:[%s11718_s0 + $0x104] sm:$0xf0]  ;;  %v7094_v61 = vld [vmem:[%s11718_s0 + $0x190] sm:$0xf0]  ;;  %v8445_v14 = vld [vmem:[%s11718_s0 + $0xc4] sm:$0xf] }
 0x368   : > { %v7029_v33 = vor.u32 %v8454_v19, %v7028_v54 }
 0x369   : > { %v10594_v24 = vadd.f32 %v5842_v62, %v5769_v23 }
 0x36c   : > { %v5625_v55 = vpop.f32.mrf.mxu2 }
 0x36d   : > { %v5626_v31 = vadd.f32 %v5625_v55, %v10204_v40  ;;  %v8780_v55 = vld [vmem:[%s9523_s7 + $0x3e8] sm:$0xff] }
 0x36e   : > { %v5699_v3 = vpop.f32.mrf.mxu3  ;;  %v5771_v44 = vpop.f32.mrf.mxu0  ;;  %6257 = vmatpush.bf16.msra.mxu3 %v8780_v55  ;;  %v8507_v55 = vld [vmem:[%s11718_s0 + $0x2ac] sm:$0xf0] }
 0x36f   : > { %v5700_v56 = vadd.f32 %v5699_v3, %v5626_v31  ;;  %v5772_v22 = vadd.f32 %v5771_v44, %v5698_v20  ;;  %v5845_v29 = vpop.f32.mrf.mxu1  ;;  %v7030_v20 = vld [vmem:[%s11718_s0 + $0x108] sm:$0xf0] }
 0x370   : > { %v7033_v12 = vor.u32 %v8445_v14, %v7030_v20 }
 0x371   : > { %v10623_v0 = vadd.f32 %v5845_v29, %v5772_v22  ;;  %5898 = vmatmul.bf16.gmra.mxu2 %v7021_v15  ;;  %6041 = vmatmul.bf16.vlgmr.msrb.gmra.mxu0 %v6957_v26  ;;  %v7164_v29 = vld [vmem:[%s11718_s0 + $0x1d8] sm:$0xf] }
 0x372   : > { %6115 = vmatmul.bf16.vlgmr.msrb.gmra.mxu1 %v6961_v48  ;;  %v7165_v4 = vor.u32 %v8489_v1, %v7164_v29 }
 0x373   : > { %5972 = vmatmul.bf16.gmra.mxu3 %v7025_v51 }
 0x374   : > { %v5628_v5 = vpop.f32.mrf.mxu2 }
 0x375   : > { %v5629_v40 = vadd.f32 %v5628_v5, %v10233_v10  ;;  %v8462_v10 = vld [vmem:[%s11718_s0 + $0x14c] sm:$0xf] }
 0x376   : > { %v5702_v46 = vpop.f32.mrf.mxu3  ;;  %v5773_v59 = vpop.f32.mrf.mxu0  ;;  %v7097_v43 = vor.u32 %v8462_v10, %v7094_v61  ;;  %v8796_v5 = vld [vmem:[%s9523_s7 + $0x468] sm:$0xff] }
 0x377   : > { %v5703_v34 = vadd.f32 %v5702_v46, %v5629_v40  ;;  %v5774_v9 = vadd.f32 %v5773_v59, %v5700_v56  ;;  %v5847_v36 = vpop.f32.mrf.mxu1  ;;  %v8788_v56 = vld [vmem:[%s9523_s7 + $0x428] sm:$0xff]  ;;  %v7100_v40 = vld [vmem:[%s11718_s0 + $0x150] sm:$0xf]  ;;  %v8472_v46 = vld [vmem:[%s11718_s0 + $0x194] sm:$0xf0]  ;;  %6405 = vmatpush.bf16.msra.mxu1 %v8796_v5 }
 0x378   : > { %6331 = vmatpush.bf16.msra.mxu0 %v8788_v56  ;;  %v7166_v59 = vld [vmem:[%s11718_s0 + $0x220] sm:$0xf0]  ;;  %v7101_v10 = vor.u32 %v8472_v46, %v7100_v40 }
 0x379   : > { %v10626_v52 = vadd.f32 %v5847_v36, %v5774_v9  ;;  %v7102_v9 = vld [vmem:[%s11718_s0 + $0x198] sm:$0xf0] }
 0x37c   : > { %v5630_v23 = vpop.f32.mrf.mxu2 }
 0x37d   : > { %v5631_v62 = vadd.f32 %v5630_v23, %v10237_v21 }
 0x37e   : > { %v5704_v32 = vpop.f32.mrf.mxu3  ;;  %v5776_v27 = vpop.f32.mrf.mxu0 }
 0x37f   : > { %v5705_v30 = vadd.f32 %v5704_v32, %v5631_v62  ;;  %v5777_v57 = vadd.f32 %v5776_v27, %v5703_v34  ;;  %v5850_v45 = vpop.f32.mrf.mxu1  ;;  %v8463_v34 = vld [vmem:[%s11718_s0 + $0x154] sm:$0xf] }
 0x380   : > { %v7105_v61 = vor.u32 %v8463_v34, %v7102_v9 }
 0x381   : > { %v10655_v31 = vadd.f32 %v5850_v45, %v5777_v57  ;;  %5903 = vmatmul.bf16.gmra.mxu2 %v7093_v41  ;;  %6046 = vmatmul.bf16.gmra.mxu0 %v7029_v33  ;;  %v7236_v45 = vld [vmem:[%s11718_s0 + $0x268] sm:$0xf] }
 0x382   : > { %6120 = vmatmul.bf16.gmra.mxu1 %v7033_v12  ;;  %v7237_v1 = vor.u32 %v8507_v55, %v7236_v45 }
 0x383   : > { %5977 = vmatmul.bf16.gmra.mxu3 %v7097_v43 }
 0x384   : > { %v5633_v21 = vpop.f32.mrf.mxu2 }
 0x385   : > { %v5634_v3 = vadd.f32 %v5633_v21, %v10265_v53  ;;  %v8480_v53 = vld [vmem:[%s11718_s0 + $0x1dc] sm:$0xf]  ;;  %v8779_v21 = vld [vmem:[%s9523_s7 + $0x3e0] sm:$0xff] }
 0x386   : > { %v5707_v15 = vpop.f32.mrf.mxu3  ;;  %v5778_v26 = vpop.f32.mrf.mxu0  ;;  %v7169_v19 = vor.u32 %v8480_v53, %v7166_v59  ;;  %6258 = vmatpush.bf16.msra.mxu3 %v8779_v21 }
 0x387   : > { %v5708_v44 = vadd.f32 %v5707_v15, %v5634_v3  ;;  %v5779_v51 = vadd.f32 %v5778_v26, %v5705_v30  ;;  %v5852_v48 = vpop.f32.mrf.mxu1  ;;  %v8771_v30 = vld [vmem:[%s9523_s7 + $0x3a0] sm:$0xff]  ;;  %v8490_v15 = vld [vmem:[%s11718_s0 + $0x224] sm:$0xf0]  ;;  %v7238_v26 = vld [vmem:[%s11718_s0 + $0x2b0] sm:$0xf0] }
 0x388   : > { %6184 = vmatpush.bf16.msra.mxu2 %v8771_v30  ;;  %v7172_v3 = vld [vmem:[%s11718_s0 + $0x1e0] sm:$0xf] }
 0x389   : > { %v10659_v22 = vadd.f32 %v5852_v48, %v5779_v51  ;;  %v7174_v51 = vld [vmem:[%s11718_s0 + $0x228] sm:$0xf0]  ;;  %v7173_v5 = vor.u32 %v8490_v15, %v7172_v3 }
 0x38c   : > { %v5635_v36 = vpop.f32.mrf.mxu2 }
 0x38d   : > { %v5636_v16 = vadd.f32 %v5635_v36, %v10269_v6 }
 0x38e   : > { %v5709_v13 = vpop.f32.mrf.mxu3  ;;  %v5781_v54 = vpop.f32.mrf.mxu0 }
 0x38f   : > { %v5710_v14 = vadd.f32 %v5709_v13, %v5636_v16  ;;  %v5782_v20 = vadd.f32 %v5781_v54, %v5708_v44  ;;  %v5855_v23 = vpop.f32.mrf.mxu1  ;;  %v8481_v44 = vld [vmem:[%s11718_s0 + $0x1e4] sm:$0xf] }
 0x390   : > { %v7177_v46 = vor.u32 %v8481_v44, %v7174_v51  ;;  %v8787_v16 = vld [vmem:[%s9523_s7 + $0x420] sm:$0xff] }
 0x391   : > { %v10687_v62 = vadd.f32 %v5855_v23, %v5782_v20  ;;  %5908 = vmatmul.bf16.gmra.mxu2 %v7165_v4  ;;  %6051 = vmatmul.bf16.gmra.mxu0 %v7101_v10  ;;  %v8795_v13 = vld [vmem:[%s9523_s7 + $0x460] sm:$0xff]  ;;  %v7308_v23 = vld [vmem:[%s11718_s0 + $0x2f8] sm:$0xf] }
 0x392   : > { %6125 = vmatmul.bf16.gmra.mxu1 %v7105_v61  ;;  %6332 = vmatpush.bf16.msra.mxu0 %v8787_v16  ;;  %v8543_v16 = vld [vmem:[%s11718_s0 + $0x3cc] sm:$0xf0] }
 0x393   : > { %5982 = vmatmul.bf16.gmra.mxu3 %v7169_v19  ;;  %6406 = vmatpush.bf16.msra.mxu1 %v8795_v13  ;;  %v8786_v13 = vld [vmem:[%s9523_s7 + $0x418] sm:$0xff] }
 0x394   : > { %v5638_v32 = vpop.f32.mrf.mxu2 }
 0x395   : > { %v5639_v6 = vadd.f32 %v5638_v32, %v10297_v39  ;;  %v8498_v39 = vld [vmem:[%s11718_s0 + $0x26c] sm:$0xf]  ;;  %v8525_v32 = vld [vmem:[%s11718_s0 + $0x33c] sm:$0xf0] }
 0x396   : > { %v5712_v41 = vpop.f32.mrf.mxu3  ;;  %v5783_v33 = vpop.f32.mrf.mxu0  ;;  %v7241_v40 = vor.u32 %v8498_v39, %v7238_v26  ;;  %v7309_v55 = vor.u32 %v8525_v32, %v7308_v23  ;;  %6333 = vmatpush.bf16.msra.mxu0 %v8786_v13 }
 0x397   : > { %v5713_v27 = vadd.f32 %v5712_v41, %v5639_v6  ;;  %v5784_v43 = vadd.f32 %v5783_v33, %v5710_v14  ;;  %v5857_v12 = vpop.f32.mrf.mxu1  ;;  %v8516_v6 = vld [vmem:[%s11718_s0 + $0x2fc] sm:$0xf]  ;;  %v8508_v41 = vld [vmem:[%s11718_s0 + $0x2b4] sm:$0xf0]  ;;  %v7310_v33 = vld [vmem:[%s11718_s0 + $0x340] sm:$0xf0] }
 0x398   : > { %v7313_v3 = vor.u32 %v8516_v6, %v7310_v33 }
 0x399   : > { %v10691_v57 = vadd.f32 %v5857_v12, %v5784_v43  ;;  %v7246_v43 = vld [vmem:[%s11718_s0 + $0x2b8] sm:$0xf0] }
 0x39c   : > { %v5640_v48 = vpop.f32.mrf.mxu2 }
 0x39d   : > { %v5641_v56 = vadd.f32 %v5640_v48, %v10302_v50 }
 0x39e   : > { %v5714_v29 = vpop.f32.mrf.mxu3  ;;  %v5786_v53 = vpop.f32.mrf.mxu0 }
 0x39f   : > { %v5715_v59 = vadd.f32 %v5714_v29, %v5641_v56  ;;  %v5787_v34 = vadd.f32 %v5786_v53, %v5713_v27  ;;  %v5860_v9 = vpop.f32.mrf.mxu1  ;;  %v8499_v27 = vld [vmem:[%s11718_s0 + $0x274] sm:$0xf]  ;;  %v8770_v56 = vld [vmem:[%s9523_s7 + $0x398] sm:$0xff] }
 0x3a0   : > { %v7249_v15 = vor.u32 %v8499_v27, %v7246_v43  ;;  %6185 = vmatpush.bf16.msra.mxu2 %v8770_v56  ;;  %v8561_v56 = vld [vmem:[%s11718_s0 + $0x45c] sm:$0xf0] }
 0x3a1   : > { %v10719_v36 = vadd.f32 %v5860_v9, %v5787_v34  ;;  %5913 = vmatmul.bf16.gmra.mxu2 %v7237_v1  ;;  %6056 = vmatmul.bf16.gmra.mxu0 %v7173_v5  ;;  %v7380_v34 = vld [vmem:[%s11718_s0 + $0x388] sm:$0xf] }
 0x3a2   : > { %6130 = vmatmul.bf16.gmra.mxu1 %v7177_v46  ;;  %v7381_v6 = vor.u32 %v8543_v16, %v7380_v34 }
 0x3a3   : > { %5987 = vmatmul.bf16.gmra.mxu3 %v7241_v40 }
 0x3a4   : > { %v5643_v50 = vpop.f32.mrf.mxu2 }
 0x3a5   : > { %v5644_v4 = vadd.f32 %v5643_v50, %v10329_v8  ;;  %v7244_v8 = vld [vmem:[%s11718_s0 + $0x270] sm:$0xf]  ;;  %v8794_v50 = vld [vmem:[%s9523_s7 + $0x458] sm:$0xff] }
 0x3a6   : > { %v5717_v10 = vpop.f32.mrf.mxu3  ;;  %v5788_v54 = vpop.f32.mrf.mxu0  ;;  %v7245_v21 = vor.u32 %v8508_v41, %v7244_v8  ;;  %6407 = vmatpush.bf16.msra.mxu1 %v8794_v50 }
 0x3a7   : > { %v5718_v19 = vadd.f32 %v5717_v10, %v5644_v4  ;;  %v5789_v61 = vadd.f32 %v5788_v54, %v5715_v59  ;;  %v5862_v14 = vpop.f32.mrf.mxu1  ;;  %v7316_v4 = vld [vmem:[%s11718_s0 + $0x300] sm:$0xf]  ;;  %v8526_v10 = vld [vmem:[%s11718_s0 + $0x344] sm:$0xf0]  ;;  %v7382_v54 = vld [vmem:[%s11718_s0 + $0x3d0] sm:$0xf0] }
 0x3a8   : > { %v7317_v8 = vor.u32 %v8526_v10, %v7316_v4 }
 0x3a9   : > { %v10724_v20 = vadd.f32 %v5862_v14, %v5789_v61  ;;  %v7318_v61 = vld [vmem:[%s11718_s0 + $0x348] sm:$0xf0] }
 0x3ac   : > { %v5645_v12 = vpop.f32.mrf.mxu2 }
 0x3ad   : > { %v5646_v30 = vadd.f32 %v5645_v12, %v10337_v38  ;;  %v8778_v38 = vld [vmem:[%s9523_s7 + $0x3d8] sm:$0xff] }
 0x3ae   : > { %v5719_v45 = vpop.f32.mrf.mxu3  ;;  %v5791_v39 = vpop.f32.mrf.mxu0  ;;  %6259 = vmatpush.bf16.msra.mxu3 %v8778_v38  ;;  %v8769_v38 = vld [vmem:[%s9523_s7 + $0x390] sm:$0xff] }
 0x3af   : > { %v5720_v26 = vadd.f32 %v5719_v45, %v5646_v30  ;;  %v5792_v44 = vadd.f32 %v5791_v39, %v5718_v19  ;;  %v5865_v51 = vpop.f32.mrf.mxu1  ;;  %v8517_v19 = vld [vmem:[%s11718_s0 + $0x304] sm:$0xf]  ;;  %6186 = vmatpush.bf16.msra.mxu2 %v8769_v38 }
 0x3b0   : > { %v7321_v27 = vor.u32 %v8517_v19, %v7318_v61 }
 0x3b1   : > { %v10751_v48 = vadd.f32 %v5865_v51, %v5792_v44  ;;  %5918 = vmatmul.bf16.gmra.mxu2 %v7309_v55  ;;  %6061 = vmatmul.bf16.gmra.mxu0 %v7245_v21  ;;  %v7452_v44 = vld [vmem:[%s11718_s0 + $0x418] sm:$0xf] }
 0x3b2   : > { %6135 = vmatmul.bf16.gmra.mxu1 %v7249_v15  ;;  %v7453_v13 = vor.u32 %v8561_v56, %v7452_v44 }
 0x3b3   : > { %5992 = vmatmul.bf16.gmra.mxu3 %v7313_v3 }
 0x3b4   : > { %v5648_v29 = vpop.f32.mrf.mxu2 }
 0x3b5   : > { %v5649_v1 = vadd.f32 %v5648_v29, %v10363_v7  ;;  %v8534_v7 = vld [vmem:[%s11718_s0 + $0x38c] sm:$0xf]  ;;  %v8777_v29 = vld [vmem:[%s9523_s7 + $0x3d0] sm:$0xff] }
 0x3b6   : > { %v5722_v5 = vpop.f32.mrf.mxu3  ;;  %v5793_v53 = vpop.f32.mrf.mxu0  ;;  %v7385_v33 = vor.u32 %v8534_v7, %v7382_v54  ;;  %6260 = vmatpush.bf16.msra.mxu3 %v8777_v29 }
 0x3b7   : > { %v5723_v40 = vadd.f32 %v5722_v5, %v5649_v1  ;;  %v5794_v46 = vadd.f32 %v5793_v53, %v5720_v26  ;;  %v5867_v59 = vpop.f32.mrf.mxu1  ;;  %v7388_v1 = vld [vmem:[%s11718_s0 + $0x390] sm:$0xf]  ;;  %v8544_v5 = vld [vmem:[%s11718_s0 + $0x3d4] sm:$0xf0]  ;;  %v7454_v53 = vld [vmem:[%s11718_s0 + $0x460] sm:$0xf0] }
 0x3b8   : > { %v7389_v50 = vor.u32 %v8544_v5, %v7388_v1 }
 0x3b9   : > { %v10759_v9 = vadd.f32 %v5867_v59, %v5794_v46  ;;  %v7390_v46 = vld [vmem:[%s11718_s0 + $0x3d8] sm:$0xf0] }
 0x3bc   : > { %v5650_v14 = vpop.f32.mrf.mxu2 }
 0x3bd   : > { %v5651_v23 = vadd.f32 %v5650_v14, %v10369_v18 }
 0x3be   : > { %v5724_v32 = vpop.f32.mrf.mxu3  ;;  %v5796_v41 = vpop.f32.mrf.mxu0 }
 0x3bf   : > { %v5725_v43 = vadd.f32 %v5724_v32, %v5651_v23  ;;  %v5797_v12 = vadd.f32 %v5796_v41, %v5723_v40  ;;  %v5870_v30 = vpop.f32.mrf.mxu1  ;;  %v8535_v40 = vld [vmem:[%s11718_s0 + $0x394] sm:$0xf] }
 0x3c0   : > { %v7393_v10 = vor.u32 %v8535_v40, %v7390_v46  ;;  %v8785_v23 = vld [vmem:[%s9523_s7 + $0x410] sm:$0xff] }
 0x3c1   : > { %v10785_v45 = vadd.f32 %v5870_v30, %v5797_v12  ;;  %5923 = vmatmul.bf16.gmra.mxu2 %v7381_v6  ;;  %6066 = vmatmul.bf16.gmra.mxu0 %v7317_v8  ;;  %v7524_v30 = vld [vmem:[%s11718_s0 + $0x4a8] sm:$0xf] }
 0x3c2   : > { %6140 = vmatmul.bf16.gmra.mxu1 %v7321_v27  ;;  %6334 = vmatpush.bf16.msra.mxu0 %v8785_v23  ;;  %v8597_v23 = vld [vmem:[%s11718_s0 + $0x57c] sm:$0xf0] }
 0x3c3   : > { %5997 = vmatmul.bf16.gmra.mxu3 %v7385_v33 }
 0x3c4   : > { %v5653_v55 = vpop.f32.mrf.mxu2 }
 0x3c5   : > { %v5654_v18 = vadd.f32 %v5653_v55, %v10395_v60  ;;  %v8552_v60 = vld [vmem:[%s11718_s0 + $0x41c] sm:$0xf]  ;;  %v8579_v55 = vld [vmem:[%s11718_s0 + $0x4ec] sm:$0xf0] }
 0x3c6   : > { %v5727_v21 = vpop.f32.mrf.mxu3  ;;  %v5798_v39 = vpop.f32.mrf.mxu0  ;;  %v7457_v4 = vor.u32 %v8552_v60, %v7454_v53  ;;  %v7525_v38 = vor.u32 %v8579_v55, %v7524_v30 }
 0x3c7   : > { %v5728_v3 = vadd.f32 %v5727_v21, %v5654_v18  ;;  %v5799_v15 = vadd.f32 %v5798_v39, %v5725_v43  ;;  %v5872_v26 = vpop.f32.mrf.mxu1  ;;  %v8793_v43 = vld [vmem:[%s9523_s7 + $0x450] sm:$0xff]  ;;  %v7460_v18 = vld [vmem:[%s11718_s0 + $0x420] sm:$0xf]  ;;  %v8562_v21 = vld [vmem:[%s11718_s0 + $0x464] sm:$0xf0] }
 0x3c8   : > { %6408 = vmatpush.bf16.msra.mxu1 %v8793_v43  ;;  %v7526_v39 = vld [vmem:[%s11718_s0 + $0x4f0] sm:$0xf0]  ;;  %v7461_v29 = vor.u32 %v8562_v21, %v7460_v18 }
 0x3c9   : > { %v10791_v51 = vadd.f32 %v5872_v26, %v5799_v15  ;;  %v7462_v15 = vld [vmem:[%s11718_s0 + $0x468] sm:$0xf0] }
 0x3cc   : > { %v5655_v59 = vpop.f32.mrf.mxu2 }
 0x3cd   : > { %v5656_v34 = vadd.f32 %v5655_v59, %v10400_v35 }
 0x3ce   : > { %v5729_v16 = vpop.f32.mrf.mxu3  ;;  %v5801_v7 = vpop.f32.mrf.mxu0 }
 0x3cf   : > { %v5730_v54 = vadd.f32 %v5729_v16, %v5656_v34  ;;  %v5802_v19 = vadd.f32 %v5801_v7, %v5728_v3  ;;  %v5875_v61 = vpop.f32.mrf.mxu1  ;;  %v8553_v3 = vld [vmem:[%s11718_s0 + $0x424] sm:$0xf]  ;;  %v8768_v34 = vld [vmem:[%s9523_s7 + $0x388] sm:$0xff] }
 0x3d0   : > { %v7465_v5 = vor.u32 %v8553_v3, %v7462_v15  ;;  %6187 = vmatpush.bf16.msra.mxu2 %v8768_v34  ;;  %v8615_v34 = vld [vmem:[%s11718_s0 + $0x60c] sm:$0xf0] }
 0x3d1   : > { %v10817_v14 = vadd.f32 %v5875_v61, %v5802_v19  ;;  %5928 = vmatmul.bf16.gmra.mxu2 %v7453_v13  ;;  %6071 = vmatmul.bf16.gmra.mxu0 %v7389_v50  ;;  %v7596_v61 = vld [vmem:[%s11718_s0 + $0x538] sm:$0xf] }
 0x3d2   : > { %6145 = vmatmul.bf16.gmra.mxu1 %v7393_v10  ;;  %v7597_v30 = vor.u32 %v8597_v23, %v7596_v61 }
 0x3d3   : > { %6002 = vmatmul.bf16.gmra.mxu3 %v7457_v4 }
 0x3d4   : > { %v5658_v32 = vpop.f32.mrf.mxu2 }
 0x3d5   : > { %v5659_v35 = vadd.f32 %v5658_v32, %v10427_v25  ;;  %v8570_v25 = vld [vmem:[%s11718_s0 + $0x4ac] sm:$0xf]  ;;  %v7532_v32 = vld [vmem:[%s11718_s0 + $0x4b0] sm:$0xf] }
 0x3d6   : > { %v5732_v6 = vpop.f32.mrf.mxu3  ;;  %v5803_v8 = vpop.f32.mrf.mxu0  ;;  %v7529_v1 = vor.u32 %v8570_v25, %v7526_v39 }
 0x3d7   : > { %v5733_v41 = vadd.f32 %v5732_v6, %v5659_v35  ;;  %v5804_v33 = vadd.f32 %v5803_v8, %v5730_v54  ;;  %v5877_v27 = vpop.f32.mrf.mxu1  ;;  %v8776_v54 = vld [vmem:[%s9523_s7 + $0x3c8] sm:$0xff]  ;;  %v8580_v35 = vld [vmem:[%s11718_s0 + $0x4f4] sm:$0xf0]  ;;  %v7598_v6 = vld [vmem:[%s11718_s0 + $0x580] sm:$0xf0] }
 0x3d8   : > { %6261 = vmatpush.bf16.msra.mxu3 %v8776_v54  ;;  %v8571_v8 = vld [vmem:[%s11718_s0 + $0x4b4] sm:$0xf]  ;;  %v7533_v55 = vor.u32 %v8580_v35, %v7532_v32 }
 0x3d9   : > { %v10822_v12 = vadd.f32 %v5877_v27, %v5804_v33 }
 0x3dc   : > { %v5660_v26 = vpop.f32.mrf.mxu2 }
 0x3dd   : > { %v5661_v44 = vadd.f32 %v5660_v26, %v10432_v49  ;;  %v8784_v26 = vld [vmem:[%s9523_s7 + $0x408] sm:$0xff] }
 0x3de   : > { %v5734_v56 = vpop.f32.mrf.mxu3  ;;  %v5806_v60 = vpop.f32.mrf.mxu0  ;;  %6335 = vmatpush.bf16.msra.mxu0 %v8784_v26  ;;  %v8633_v26 = vld [vmem:[%s11718_s0 + $0x69c] sm:$0xf0] }
 0x3df   : > { %v5735_v53 = vadd.f32 %v5734_v56, %v5661_v44  ;;  %v5807_v40 = vadd.f32 %v5806_v60, %v5733_v41  ;;  %v5880_v46 = vpop.f32.mrf.mxu1  ;;  %v7534_v41 = vld [vmem:[%s11718_s0 + $0x4f8] sm:$0xf0]  ;;  %v8792_v56 = vld [vmem:[%s9523_s7 + $0x448] sm:$0xff] }
 0x3e0   : > { %v7537_v21 = vor.u32 %v8571_v8, %v7534_v41  ;;  %6409 = vmatpush.bf16.msra.mxu1 %v8792_v56  ;;  %v8783_v56 = vld [vmem:[%s9523_s7 + $0x400] sm:$0xff] }
 0x3e1   : > { %v10849_v59 = vadd.f32 %v5880_v46, %v5807_v40  ;;  %5933 = vmatmul.bf16.gmra.mxu2 %v7525_v38  ;;  %6076 = vmatmul.bf16.gmra.mxu0 %v7461_v29  ;;  %v7668_v46 = vld [vmem:[%s11718_s0 + $0x5c8] sm:$0xf] }
 0x3e2   : > { %6150 = vmatmul.bf16.gmra.mxu1 %v7465_v5  ;;  %v7669_v61 = vor.u32 %v8615_v34, %v7668_v46  ;;  %6336 = vmatpush.bf16.msra.mxu0 %v8783_v56 }
 0x3e3   : > { %6007 = vmatmul.bf16.gmra.mxu3 %v7529_v1 }
 0x3e4   : > { %v5894_v16 = vpop.f32.mrf.mxu2 }
 0x3e5   : > { %v5895_v49 = vadd.f32 %v5894_v16, %v10460_v58  ;;  %v8588_v58 = vld [vmem:[%s11718_s0 + $0x53c] sm:$0xf]  ;;  %v8606_v16 = vld [vmem:[%s11718_s0 + $0x5cc] sm:$0xf] }
 0x3e6   : > { %v5968_v13 = vpop.f32.mrf.mxu3  ;;  %v5808_v50 = vpop.f32.mrf.mxu0  ;;  %v7601_v18 = vor.u32 %v8588_v58, %v7598_v6 }
 0x3e7   : > { %v5969_v7 = vadd.f32 %v5968_v13, %v5895_v49  ;;  %v5809_v4 = vadd.f32 %v5808_v50, %v5735_v53  ;;  %v5882_v10 = vpop.f32.mrf.mxu1  ;;  %v8598_v49 = vld [vmem:[%s11718_s0 + $0x584] sm:$0xf0]  ;;  %v7670_v13 = vld [vmem:[%s11718_s0 + $0x610] sm:$0xf0]  ;;  %v8589_v50 = vld [vmem:[%s11718_s0 + $0x544] sm:$0xf] }
 0x3e8   : > { %v7673_v32 = vor.u32 %v8606_v16, %v7670_v13 }
 0x3e9   : > { %v10854_v19 = vadd.f32 %v5882_v10, %v5809_v4 }
 0x3ec   : > { %v5896_v33 = vpop.f32.mrf.mxu2 }
 0x3ed   : > { %v5897_v27 = vadd.f32 %v5896_v33, %v10464_v42  ;;  %v8767_v33 = vld [vmem:[%s9523_s7 + $0x380] sm:$0xff] }
 0x3ee   : > { %v5970_v43 = vpop.f32.mrf.mxu3  ;;  %v6042_v25 = vpop.f32.mrf.mxu0  ;;  %6188 = vmatpush.bf16.msra.mxu2 %v8767_v33  ;;  %v8651_v33 = vld [vmem:[%s11718_s0 + $0x72c] sm:$0xf0] }
 0x3ef   : > { %v5971_v39 = vadd.f32 %v5970_v43, %v5897_v27  ;;  %v6043_v3 = vadd.f32 %v6042_v25, %v5969_v7  ;;  %v6116_v15 = vpop.f32.mrf.mxu1  ;;  %v7606_v7 = vld [vmem:[%s11718_s0 + $0x588] sm:$0xf0]  ;;  %v8775_v43 = vld [vmem:[%s9523_s7 + $0x3c0] sm:$0xff] }
 0x3f0   : > { %v7609_v35 = vor.u32 %v8589_v50, %v7606_v7  ;;  %6262 = vmatpush.bf16.msra.mxu3 %v8775_v43  ;;  %v8642_v43 = vld [vmem:[%s11718_s0 + $0x6ec] sm:$0xf] }
 0x3f1   : > { %v10882_v44 = vadd.f32 %v6116_v15, %v6043_v3  ;;  %5938 = vmatmul.bf16.gmra.mxu2 %v7597_v30  ;;  %6081 = vmatmul.bf16.gmra.mxu0 %v7533_v55  ;;  %v7740_v3 = vld [vmem:[%s11718_s0 + $0x658] sm:$0xf] }
 0x3f2   : > { %6155 = vmatmul.bf16.gmra.mxu1 %v7537_v21  ;;  %v7741_v16 = vor.u32 %v8633_v26, %v7740_v3 }
 0x3f3   : > { %6012 = vmatmul.bf16.gmra.mxu3 %v7601_v18 }
 0x3f4   : > { %v5899_v42 = vpop.f32.mrf.mxu2 }
 0x3f5   : > { %v5900_v38 = vadd.f32 %v5899_v42, %v10492_v28  ;;  %v7604_v28 = vld [vmem:[%s11718_s0 + $0x540] sm:$0xf] }
 0x3f6   : > { %v5973_v29 = vpop.f32.mrf.mxu3  ;;  %v6044_v60 = vpop.f32.mrf.mxu0  ;;  %v7605_v23 = vor.u32 %v8598_v49, %v7604_v28  ;;  %v8791_v42 = vld [vmem:[%s9523_s7 + $0x440] sm:$0xff] }
 0x3f7   : > { %v5974_v1 = vadd.f32 %v5973_v29, %v5900_v38  ;;  %v6045_v5 = vadd.f32 %v6044_v60, %v5971_v39  ;;  %v6118_v53 = vpop.f32.mrf.mxu1  ;;  %v7676_v38 = vld [vmem:[%s11718_s0 + $0x5d0] sm:$0xf]  ;;  %v8616_v29 = vld [vmem:[%s11718_s0 + $0x614] sm:$0xf0]  ;;  %v7742_v60 = vld [vmem:[%s11718_s0 + $0x6a0] sm:$0xf0]  ;;  %6410 = vmatpush.bf16.msra.mxu1 %v8791_v42 }
 0x3f8   : > { %v7677_v28 = vor.u32 %v8616_v29, %v7676_v38 }
 0x3f9   : > { %v10886_v40 = vadd.f32 %v6118_v53, %v6045_v5  ;;  %v7678_v5 = vld [vmem:[%s11718_s0 + $0x618] sm:$0xf0] }
 0x3fc   : > { %v5901_v4 = vpop.f32.mrf.mxu2 }
 0x3fd   : > { %v5902_v10 = vadd.f32 %v5901_v4, %v10499_v17 }
 0x3fe   : > { %v5975_v54 = vpop.f32.mrf.mxu3  ;;  %v6047_v58 = vpop.f32.mrf.mxu0 }
 0x3ff   : > { %v5976_v6 = vadd.f32 %v5975_v54, %v5902_v10  ;;  %v6048_v8 = vadd.f32 %v6047_v58, %v5974_v1  ;;  %v6121_v41 = vpop.f32.mrf.mxu1  ;;  %v8607_v1 = vld [vmem:[%s11718_s0 + $0x5d4] sm:$0xf] }
 0x400   : > { %v7681_v50 = vor.u32 %v8607_v1, %v7678_v5 }
 0x401   : > { %v10914_v27 = vadd.f32 %v6121_v41, %v6048_v8  ;;  %5943 = vmatmul.bf16.gmra.mxu2 %v7669_v61  ;;  %6086 = vmatmul.bf16.gmra.mxu0 %v7605_v23  ;;  %v7812_v41 = vld [vmem:[%s11718_s0 + $0x6e8] sm:$0xf] }
 0x402   : > { %6160 = vmatmul.bf16.gmra.mxu1 %v7609_v35  ;;  %v7813_v3 = vor.u32 %v8651_v33, %v7812_v41 }
 0x403   : > { %6017 = vmatmul.bf16.gmra.mxu3 %v7673_v32 }
 0x404   : > { %v5904_v17 = vpop.f32.mrf.mxu2 }
 0x405   : > { %v5905_v30 = vadd.f32 %v5904_v17, %v10525_v2  ;;  %v8624_v2 = vld [vmem:[%s11718_s0 + $0x65c] sm:$0xf]  ;;  %v8634_v17 = vld [vmem:[%s11718_s0 + $0x6a4] sm:$0xf0] }
 0x406   : > { %v5978_v55 = vpop.f32.mrf.mxu3  ;;  %v6049_v25 = vpop.f32.mrf.mxu0  ;;  %v7745_v13 = vor.u32 %v8624_v2, %v7742_v60 }
 0x407   : > { %v5979_v18 = vadd.f32 %v5978_v55, %v5905_v30  ;;  %v6050_v21 = vadd.f32 %v6049_v25, %v5976_v6  ;;  %v6123_v39 = vpop.f32.mrf.mxu1  ;;  %v7814_v30 = vld [vmem:[%s11718_s0 + $0x730] sm:$0xf0]  ;;  %v8625_v55 = vld [vmem:[%s11718_s0 + $0x664] sm:$0xf]  ;;  %v7750_v25 = vld [vmem:[%s11718_s0 + $0x6a8] sm:$0xf0] }
 0x408   : > { %v7817_v42 = vor.u32 %v8642_v43, %v7814_v30  ;;  %v7753_v2 = vor.u32 %v8625_v55, %v7750_v25 }
 0x409   : > { %v10921_v15 = vadd.f32 %v6123_v39, %v6050_v21 }
 0x40c   : > { %v5906_v53 = vpop.f32.mrf.mxu2 }
 0x40d   : > { %v5907_v46 = vadd.f32 %v5906_v53, %v10531_v63 }
 0x40e   : > { %v5980_v34 = vpop.f32.mrf.mxu3  ;;  %v6052_v49 = vpop.f32.mrf.mxu0 }
 0x40f   : > { %v5981_v7 = vadd.f32 %v5980_v34, %v5907_v46  ;;  %v6053_v4 = vadd.f32 %v6052_v49, %v5979_v18  ;;  %v6126_v10 = vpop.f32.mrf.mxu1 }
 0x411   : > { %v10947_v54 = vadd.f32 %v6126_v10, %v6053_v4  ;;  %5948 = vmatmul.bf16.gmra.mxu2 %v7741_v16  ;;  %6091 = vmatmul.bf16.gmra.mxu0 %v7677_v28  ;;  %v8437_v4 = vld [vmem:[%s11718_s0 + $0x7c] sm:$0xf0]  ;;  %v7822_v10 = vld [vmem:[%s11718_s0 + $0x738] sm:$0xf0] }
 0x412   : > { %6165 = vmatmul.bf16.gmra.mxu1 %v7681_v50  ;;  %v8652_v50 = vld [vmem:[%s11718_s0 + $0x734] sm:$0xf0] }
 0x413   : > { %6022 = vmatmul.bf16.gmra.mxu3 %v7745_v13  ;;  %v7820_v13 = vld [vmem:[%s11718_s0 + $0x6f0] sm:$0xf] }
 0x414   : > { %v5909_v61 = vpop.f32.mrf.mxu2 }
 0x415   : > { %v5910_v23 = vadd.f32 %v5909_v61, %v10557_v11  ;;  %v7748_v11 = vld [vmem:[%s11718_s0 + $0x660] sm:$0xf]  ;;  %v8428_v61 = vld [vmem:[%s11718_s0 + $0x3c] sm:$0xf] }
 0x416   : > { %v5983_v58 = vpop.f32.mrf.mxu3  ;;  %v6054_v63 = vpop.f32.mrf.mxu0  ;;  %v7749_v26 = vor.u32 %v8634_v17, %v7748_v11 }
 0x417   : > { %v5984_v32 = vadd.f32 %v5983_v58, %v5910_v23  ;;  %v6055_v35 = vadd.f32 %v6054_v63, %v5981_v7  ;;  %v6128_v6 = vpop.f32.mrf.mxu1  ;;  %v8643_v7 = vld [vmem:[%s11718_s0 + $0x6f4] sm:$0xf]  ;;  %v6966_v23 = vld [vmem:[%s11718_s0 + $0x80] sm:$0xf0] }
 0x418   : > { %v7825_v33 = vor.u32 %v8643_v7, %v7822_v10  ;;  %v6969_v43 = vor.u32 %v8428_v61, %v6966_v23 }
 0x419   : > { %v10950_v8 = vadd.f32 %v6128_v6, %v6055_v35  ;;  %v7821_v35 = vor.u32 %v8652_v50, %v7820_v13 }
 0x41c   : > { %v5911_v18 = vpop.f32.mrf.mxu2 }
 0x41d   : > { %v5912_v21 = vadd.f32 %v5911_v18, %v10562_v47 }
 0x41e   : > { %v5985_v39 = vpop.f32.mrf.mxu3  ;;  %v6057_v56 = vpop.f32.mrf.mxu0 }
 0x41f   : > { %v5986_v38 = vadd.f32 %v5985_v39, %v5912_v21  ;;  %v6058_v29 = vadd.f32 %v6057_v56, %v5984_v32  ;;  %v6131_v60 = vpop.f32.mrf.mxu1 }
 0x421   : > { %v10977_v1 = vadd.f32 %v6131_v60, %v6058_v29  ;;  %5953 = vmatmul.bf16.gmra.mxu2 %v7813_v3  ;;  %6096 = vmatmul.bf16.gmra.mxu0 %v7749_v26  ;;  %v8438_v29 = vld [vmem:[%s11718_s0 + $0x84] sm:$0xf0]  ;;  %v7038_v60 = vld [vmem:[%s11718_s0 + $0x110] sm:$0xf0] }
 0x422   : > { %6170 = vmatmul.bf16.gmra.mxu1 %v7753_v2  ;;  %v8455_v2 = vld [vmem:[%s11718_s0 + $0x10c] sm:$0xf0] }
 0x423   : > { %6027 = vmatmul.bf16.gmra.mxu3 %v7817_v42  ;;  %v7036_v42 = vld [vmem:[%s11718_s0 + $0xc8] sm:$0xf] }
 0x424   : > { %v5914_v5 = vpop.f32.mrf.mxu2 }
 0x425   : > { %v5915_v53 = vadd.f32 %v5914_v5, %v10589_v37  ;;  %v6964_v37 = vld [vmem:[%s11718_s0 + $0x38] sm:$0xf]  ;;  %v8429_v5 = vld [vmem:[%s11718_s0 + $0x44] sm:$0xf] }
 0x426   : > { %v5988_v46 = vpop.f32.mrf.mxu3  ;;  %v6059_v47 = vpop.f32.mrf.mxu0  ;;  %v6965_v6 = vor.u32 %v8437_v4, %v6964_v37 }
 0x427   : > { %v5989_v34 = vadd.f32 %v5988_v46, %v5915_v53  ;;  %v6060_v16 = vadd.f32 %v6059_v47, %v5986_v38  ;;  %v6133_v28 = vpop.f32.mrf.mxu1  ;;  %v8446_v38 = vld [vmem:[%s11718_s0 + $0xcc] sm:$0xf] }
 0x428   : > { %v6974_v53 = vld [vmem:[%s11718_s0 + $0x88] sm:$0xf0]  ;;  %v7041_v50 = vor.u32 %v8446_v38, %v7038_v60 }
 0x429   : > { %v10980_v49 = vadd.f32 %v6133_v28, %v6060_v16  ;;  %v7037_v16 = vor.u32 %v8455_v2, %v7036_v42  ;;  %v6977_v7 = vor.u32 %v8429_v5, %v6974_v53 }
 0x42c   : > { %v5916_v58 = vpop.f32.mrf.mxu2 }
 0x42d   : > { %v5917_v63 = vadd.f32 %v5916_v58, %v10594_v24 }
 0x42e   : > { %v5990_v32 = vpop.f32.mrf.mxu3  ;;  %v6062_v41 = vpop.f32.mrf.mxu0 }
 0x42f   : > { %v5991_v11 = vadd.f32 %v5990_v32, %v5917_v63  ;;  %v6063_v17 = vadd.f32 %v6062_v41, %v5989_v34  ;;  %v6136_v30 = vpop.f32.mrf.mxu1 }
 0x431   : > { %v11007_v55 = vadd.f32 %v6136_v30, %v6063_v17  ;;  %6101 = vmatmul.bf16.gmra.mxu0 %v7821_v35  ;;  %6189 = vmatmul.bf16.vlgmr.msra.gmra.mxu2 %v6965_v6  ;;  %v8456_v17 = vld [vmem:[%s11718_s0 + $0x114] sm:$0xf0]  ;;  %v7110_v30 = vld [vmem:[%s11718_s0 + $0x1a0] sm:$0xf0] }
 0x432   : > { %6175 = vmatmul.bf16.gmra.mxu1 %v7825_v33  ;;  %v7108_v33 = vld [vmem:[%s11718_s0 + $0x158] sm:$0xf] }
 0x433   : > { %6263 = vmatmul.bf16.vlgmr.msra.gmra.mxu3 %v6969_v43  ;;  %v8473_v43 = vld [vmem:[%s11718_s0 + $0x19c] sm:$0xf0] }
 0x434   : > { %v5919_v25 = vpop.f32.mrf.mxu2 }
 0x435   : > { %v5920_v18 = vadd.f32 %v5919_v25, %v10623_v0  ;;  %v6972_v0 = vld [vmem:[%s11718_s0 + $0x40] sm:$0xf]  ;;  %v8447_v25 = vld [vmem:[%s11718_s0 + $0xd4] sm:$0xf] }
 0x436   : > { %v5993_v21 = vpop.f32.mrf.mxu3  ;;  %v6064_v24 = vpop.f32.mrf.mxu0  ;;  %v6973_v28 = vor.u32 %v8438_v29, %v6972_v0 }
 0x437   : > { %v5994_v39 = vadd.f32 %v5993_v21, %v5920_v18  ;;  %v6065_v3 = vadd.f32 %v6064_v24, %v5991_v11  ;;  %v6138_v26 = vpop.f32.mrf.mxu1  ;;  %v8464_v11 = vld [vmem:[%s11718_s0 + $0x15c] sm:$0xf] }
 0x438   : > { %v7046_v18 = vld [vmem:[%s11718_s0 + $0x118] sm:$0xf0]  ;;  %v7113_v2 = vor.u32 %v8464_v11, %v7110_v30 }
 0x439   : > { %v11010_v56 = vadd.f32 %v6138_v26, %v6065_v3  ;;  %v7109_v3 = vor.u32 %v8473_v43, %v7108_v33  ;;  %v7049_v38 = vor.u32 %v8447_v25, %v7046_v18 }
 0x43c   : > { %v5921_v46 = vpop.f32.mrf.mxu2 }
 0x43d   : > { %v5922_v47 = vadd.f32 %v5921_v46, %v10626_v52 }
 0x43e   : > { %v5995_v34 = vpop.f32.mrf.mxu3  ;;  %v6067_v13 = vpop.f32.mrf.mxu0 }
 0x43f   : > { %v5996_v37 = vadd.f32 %v5995_v34, %v5922_v47  ;;  %v6068_v4 = vadd.f32 %v6067_v13, %v5994_v39  ;;  %v6141_v10 = vpop.f32.mrf.mxu1 }
 0x441   : > { %v11037_v61 = vadd.f32 %v6141_v10, %v6068_v4  ;;  %6194 = vmatmul.bf16.gmra.mxu2 %v7037_v16  ;;  %6337 = vmatmul.bf16.vlgmr.msra.gmra.mxu0 %v6973_v28  ;;  %v8474_v4 = vld [vmem:[%s11718_s0 + $0x1a4] sm:$0xf0]  ;;  %v7182_v10 = vld [vmem:[%s11718_s0 + $0x230] sm:$0xf0] }
 0x442   : > { %6411 = vmatmul.bf16.vlgmr.msra.gmra.mxu1 %v6977_v7  ;;  %v8491_v7 = vld [vmem:[%s11718_s0 + $0x22c] sm:$0xf0] }
 0x443   : > { %6268 = vmatmul.bf16.gmra.mxu3 %v7041_v50  ;;  %v7180_v50 = vld [vmem:[%s11718_s0 + $0x1e8] sm:$0xf] }
 0x444   : > { %v5924_v23 = vpop.f32.mrf.mxu2 }
 0x445   : > { %v5925_v58 = vadd.f32 %v5924_v23, %v10655_v31  ;;  %v7044_v31 = vld [vmem:[%s11718_s0 + $0xd0] sm:$0xf]  ;;  %v8465_v23 = vld [vmem:[%s11718_s0 + $0x164] sm:$0xf] }
 0x446   : > { %v5998_v63 = vpop.f32.mrf.mxu3  ;;  %v6069_v52 = vpop.f32.mrf.mxu0  ;;  %v7045_v26 = vor.u32 %v8456_v17, %v7044_v31 }
 0x447   : > { %v5999_v32 = vadd.f32 %v5998_v63, %v5925_v58  ;;  %v6070_v35 = vadd.f32 %v6069_v52, %v5996_v37  ;;  %v6143_v6 = vpop.f32.mrf.mxu1  ;;  %v8482_v37 = vld [vmem:[%s11718_s0 + $0x1ec] sm:$0xf] }
 0x448   : > { %v7118_v58 = vld [vmem:[%s11718_s0 + $0x1a8] sm:$0xf0]  ;;  %v7185_v43 = vor.u32 %v8482_v37, %v7182_v10 }
 0x449   : > { %v11040_v41 = vadd.f32 %v6143_v6, %v6070_v35  ;;  %v7181_v35 = vor.u32 %v8491_v7, %v7180_v50  ;;  %v7121_v11 = vor.u32 %v8465_v23, %v7118_v58 }
 0x44c   : > { %v5926_v21 = vpop.f32.mrf.mxu2 }
 0x44d   : > { %v5927_v24 = vadd.f32 %v5926_v21, %v10659_v22 }
 0x44e   : > { %v6000_v39 = vpop.f32.mrf.mxu3  ;;  %v6072_v42 = vpop.f32.mrf.mxu0 }
 0x44f   : > { %v6001_v0 = vadd.f32 %v6000_v39, %v5927_v24  ;;  %v6073_v29 = vadd.f32 %v6072_v42, %v5999_v32  ;;  %v6146_v60 = vpop.f32.mrf.mxu1 }
 0x451   : > { %v11067_v5 = vadd.f32 %v6146_v60, %v6073_v29  ;;  %6199 = vmatmul.bf16.gmra.mxu2 %v7109_v3  ;;  %6342 = vmatmul.bf16.gmra.mxu0 %v7045_v26  ;;  %v8492_v29 = vld [vmem:[%s11718_s0 + $0x234] sm:$0xf0]  ;;  %v7254_v60 = vld [vmem:[%s11718_s0 + $0x2c0] sm:$0xf0] }
 0x452   : > { %6416 = vmatmul.bf16.gmra.mxu1 %v7049_v38  ;;  %v8509_v38 = vld [vmem:[%s11718_s0 + $0x2bc] sm:$0xf0] }
 0x453   : > { %6273 = vmatmul.bf16.gmra.mxu3 %v7113_v2  ;;  %v7252_v2 = vld [vmem:[%s11718_s0 + $0x278] sm:$0xf] }
 0x454   : > { %v5929_v53 = vpop.f32.mrf.mxu2 }
 0x455   : > { %v5930_v46 = vadd.f32 %v5929_v53, %v10687_v62  ;;  %v7116_v62 = vld [vmem:[%s11718_s0 + $0x160] sm:$0xf]  ;;  %v8483_v53 = vld [vmem:[%s11718_s0 + $0x1f4] sm:$0xf] }
 0x456   : > { %v6003_v47 = vpop.f32.mrf.mxu3  ;;  %v6074_v22 = vpop.f32.mrf.mxu0  ;;  %v7117_v6 = vor.u32 %v8474_v4, %v7116_v62 }
 0x457   : > { %v6004_v34 = vadd.f32 %v6003_v47, %v5930_v46  ;;  %v6075_v16 = vadd.f32 %v6074_v22, %v6001_v0  ;;  %v6148_v28 = vpop.f32.mrf.mxu1  ;;  %v8500_v0 = vld [vmem:[%s11718_s0 + $0x27c] sm:$0xf] }
 0x458   : > { %v7190_v46 = vld [vmem:[%s11718_s0 + $0x238] sm:$0xf0]  ;;  %v7257_v7 = vor.u32 %v8500_v0, %v7254_v60 }
 0x459   : > { %v11070_v13 = vadd.f32 %v6148_v28, %v6075_v16  ;;  %v7253_v16 = vor.u32 %v8509_v38, %v7252_v2  ;;  %v7193_v37 = vor.u32 %v8483_v53, %v7190_v46 }
 0x45c   : > { %v5931_v63 = vpop.f32.mrf.mxu2 }
 0x45d   : > { %v5932_v52 = vadd.f32 %v5931_v63, %v10691_v57 }
 0x45e   : > { %v6005_v32 = vpop.f32.mrf.mxu3  ;;  %v6077_v33 = vpop.f32.mrf.mxu0 }
 0x45f   : > { %v6006_v31 = vadd.f32 %v6005_v32, %v5932_v52  ;;  %v6078_v17 = vadd.f32 %v6077_v33, %v6004_v34  ;;  %v6151_v30 = vpop.f32.mrf.mxu1 }
 0x461   : > { %v11097_v25 = vadd.f32 %v6151_v30, %v6078_v17  ;;  %6204 = vmatmul.bf16.gmra.mxu2 %v7181_v35  ;;  %6347 = vmatmul.bf16.gmra.mxu0 %v7117_v6  ;;  %v8510_v17 = vld [vmem:[%s11718_s0 + $0x2c4] sm:$0xf0]  ;;  %v7326_v30 = vld [vmem:[%s11718_s0 + $0x350] sm:$0xf0] }
 0x462   : > { %6421 = vmatmul.bf16.gmra.mxu1 %v7121_v11  ;;  %v8527_v11 = vld [vmem:[%s11718_s0 + $0x34c] sm:$0xf0] }
 0x463   : > { %6278 = vmatmul.bf16.gmra.mxu3 %v7185_v43  ;;  %v7324_v43 = vld [vmem:[%s11718_s0 + $0x308] sm:$0xf] }
 0x464   : > { %v5934_v18 = vpop.f32.mrf.mxu2 }
 0x465   : > { %v5935_v21 = vadd.f32 %v5934_v18, %v10719_v36  ;;  %v7188_v36 = vld [vmem:[%s11718_s0 + $0x1f0] sm:$0xf]  ;;  %v8501_v18 = vld [vmem:[%s11718_s0 + $0x284] sm:$0xf] }
 0x466   : > { %v6008_v24 = vpop.f32.mrf.mxu3  ;;  %v6079_v57 = vpop.f32.mrf.mxu0  ;;  %v7189_v28 = vor.u32 %v8492_v29, %v7188_v36 }
 0x467   : > { %v6009_v39 = vadd.f32 %v6008_v24, %v5935_v21  ;;  %v6080_v3 = vadd.f32 %v6079_v57, %v6006_v31  ;;  %v6153_v26 = vpop.f32.mrf.mxu1  ;;  %v8518_v31 = vld [vmem:[%s11718_s0 + $0x30c] sm:$0xf] }
 0x468   : > { %v7262_v21 = vld [vmem:[%s11718_s0 + $0x2c8] sm:$0xf0]  ;;  %v7329_v38 = vor.u32 %v8518_v31, %v7326_v30 }
 0x469   : > { %v11100_v42 = vadd.f32 %v6153_v26, %v6080_v3  ;;  %v7325_v3 = vor.u32 %v8527_v11, %v7324_v43  ;;  %v7265_v0 = vor.u32 %v8501_v18, %v7262_v21 }
 0x46c   : > { %v5936_v47 = vpop.f32.mrf.mxu2 }
 0x46d   : > { %v5937_v22 = vadd.f32 %v5936_v47, %v10724_v20 }
 0x46e   : > { %v6010_v34 = vpop.f32.mrf.mxu3  ;;  %v6082_v50 = vpop.f32.mrf.mxu0 }
 0x46f   : > { %v6011_v62 = vadd.f32 %v6010_v34, %v5937_v22  ;;  %v6083_v4 = vadd.f32 %v6082_v50, %v6009_v39  ;;  %v6156_v10 = vpop.f32.mrf.mxu1 }
 0x471   : > { %v11127_v23 = vadd.f32 %v6156_v10, %v6083_v4  ;;  %6209 = vmatmul.bf16.gmra.mxu2 %v7253_v16  ;;  %6352 = vmatmul.bf16.gmra.mxu0 %v7189_v28  ;;  %v8528_v4 = vld [vmem:[%s11718_s0 + $0x354] sm:$0xf0]  ;;  %v7398_v10 = vld [vmem:[%s11718_s0 + $0x3e0] sm:$0xf0] }
 0x472   : > { %6426 = vmatmul.bf16.gmra.mxu1 %v7193_v37  ;;  %v8545_v37 = vld [vmem:[%s11718_s0 + $0x3dc] sm:$0xf0] }
 0x473   : > { %6283 = vmatmul.bf16.gmra.mxu3 %v7257_v7  ;;  %v7396_v7 = vld [vmem:[%s11718_s0 + $0x398] sm:$0xf] }
 0x474   : > { %v5939_v58 = vpop.f32.mrf.mxu2 }
 0x475   : > { %v5940_v63 = vadd.f32 %v5939_v58, %v10751_v48  ;;  %v7260_v48 = vld [vmem:[%s11718_s0 + $0x280] sm:$0xf]  ;;  %v8519_v58 = vld [vmem:[%s11718_s0 + $0x314] sm:$0xf] }
 0x476   : > { %v6013_v52 = vpop.f32.mrf.mxu3  ;;  %v6084_v20 = vpop.f32.mrf.mxu0  ;;  %v7261_v26 = vor.u32 %v8510_v17, %v7260_v48 }
 0x477   : > { %v6014_v32 = vadd.f32 %v6013_v52, %v5940_v63  ;;  %v6085_v35 = vadd.f32 %v6084_v20, %v6011_v62  ;;  %v6158_v6 = vpop.f32.mrf.mxu1  ;;  %v8536_v62 = vld [vmem:[%s11718_s0 + $0x39c] sm:$0xf] }
 0x478   : > { %v7334_v63 = vld [vmem:[%s11718_s0 + $0x358] sm:$0xf0]  ;;  %v7401_v11 = vor.u32 %v8536_v62, %v7398_v10 }
 0x479   : > { %v11130_v33 = vadd.f32 %v6158_v6, %v6085_v35  ;;  %v7397_v35 = vor.u32 %v8545_v37, %v7396_v7  ;;  %v7337_v31 = vor.u32 %v8519_v58, %v7334_v63 }
 0x47c   : > { %v5941_v24 = vpop.f32.mrf.mxu2 }
 0x47d   : > { %v5942_v57 = vadd.f32 %v5941_v24, %v10759_v9 }
 0x47e   : > { %v6015_v39 = vpop.f32.mrf.mxu3  ;;  %v6087_v2 = vpop.f32.mrf.mxu0 }
 0x47f   : > { %v6016_v36 = vadd.f32 %v6015_v39, %v5942_v57  ;;  %v6088_v29 = vadd.f32 %v6087_v2, %v6014_v32  ;;  %v6161_v60 = vpop.f32.mrf.mxu1 }
 0x481   : > { %v11157_v53 = vadd.f32 %v6161_v60, %v6088_v29  ;;  %6214 = vmatmul.bf16.gmra.mxu2 %v7325_v3  ;;  %6357 = vmatmul.bf16.gmra.mxu0 %v7261_v26  ;;  %v8546_v29 = vld [vmem:[%s11718_s0 + $0x3e4] sm:$0xf0]  ;;  %v7470_v60 = vld [vmem:[%s11718_s0 + $0x470] sm:$0xf0] }
 0x482   : > { %6431 = vmatmul.bf16.gmra.mxu1 %v7265_v0  ;;  %v8563_v0 = vld [vmem:[%s11718_s0 + $0x46c] sm:$0xf0] }
 0x483   : > { %6288 = vmatmul.bf16.gmra.mxu3 %v7329_v38  ;;  %v7468_v38 = vld [vmem:[%s11718_s0 + $0x428] sm:$0xf] }
 0x484   : > { %v5944_v46 = vpop.f32.mrf.mxu2 }
 0x485   : > { %v5945_v47 = vadd.f32 %v5944_v46, %v10785_v45  ;;  %v7332_v45 = vld [vmem:[%s11718_s0 + $0x310] sm:$0xf]  ;;  %v8537_v46 = vld [vmem:[%s11718_s0 + $0x3a4] sm:$0xf] }
 0x486   : > { %v6018_v22 = vpop.f32.mrf.mxu3  ;;  %v6089_v9 = vpop.f32.mrf.mxu0  ;;  %v7333_v6 = vor.u32 %v8528_v4, %v7332_v45 }
 0x487   : > { %v6019_v34 = vadd.f32 %v6018_v22, %v5945_v47  ;;  %v6090_v16 = vadd.f32 %v6089_v9, %v6016_v36  ;;  %v6163_v28 = vpop.f32.mrf.mxu1  ;;  %v8554_v36 = vld [vmem:[%s11718_s0 + $0x42c] sm:$0xf] }
 0x488   : > { %v7406_v47 = vld [vmem:[%s11718_s0 + $0x3e8] sm:$0xf0]  ;;  %v7473_v37 = vor.u32 %v8554_v36, %v7470_v60 }
 0x489   : > { %v11160_v50 = vadd.f32 %v6163_v28, %v6090_v16  ;;  %v7469_v16 = vor.u32 %v8563_v0, %v7468_v38  ;;  %v7409_v62 = vor.u32 %v8537_v46, %v7406_v47 }
 0x48c   : > { %v5946_v52 = vpop.f32.mrf.mxu2 }
 0x48d   : > { %v5947_v20 = vadd.f32 %v5946_v52, %v10791_v51 }
 0x48e   : > { %v6020_v32 = vpop.f32.mrf.mxu3  ;;  %v6092_v43 = vpop.f32.mrf.mxu0 }
 0x48f   : > { %v6021_v48 = vadd.f32 %v6020_v32, %v5947_v20  ;;  %v6093_v17 = vadd.f32 %v6092_v43, %v6019_v34  ;;  %v6166_v30 = vpop.f32.mrf.mxu1 }
 0x491   : > { %v11187_v18 = vadd.f32 %v6166_v30, %v6093_v17  ;;  %6219 = vmatmul.bf16.gmra.mxu2 %v7397_v35  ;;  %6362 = vmatmul.bf16.gmra.mxu0 %v7333_v6  ;;  %v8564_v17 = vld [vmem:[%s11718_s0 + $0x474] sm:$0xf0]  ;;  %v7542_v30 = vld [vmem:[%s11718_s0 + $0x500] sm:$0xf0] }
 0x492   : > { %6436 = vmatmul.bf16.gmra.mxu1 %v7337_v31  ;;  %v8581_v31 = vld [vmem:[%s11718_s0 + $0x4fc] sm:$0xf0] }
 0x493   : > { %6293 = vmatmul.bf16.gmra.mxu3 %v7401_v11  ;;  %v7540_v11 = vld [vmem:[%s11718_s0 + $0x4b8] sm:$0xf] }
 0x494   : > { %v5949_v21 = vpop.f32.mrf.mxu2 }
 0x495   : > { %v5950_v24 = vadd.f32 %v5949_v21, %v10817_v14  ;;  %v7404_v14 = vld [vmem:[%s11718_s0 + $0x3a0] sm:$0xf]  ;;  %v8555_v21 = vld [vmem:[%s11718_s0 + $0x434] sm:$0xf] }
 0x496   : > { %v6023_v57 = vpop.f32.mrf.mxu3  ;;  %v6094_v51 = vpop.f32.mrf.mxu0  ;;  %v7405_v28 = vor.u32 %v8546_v29, %v7404_v14 }
 0x497   : > { %v6024_v39 = vadd.f32 %v6023_v57, %v5950_v24  ;;  %v6095_v3 = vadd.f32 %v6094_v51, %v6021_v48  ;;  %v6168_v26 = vpop.f32.mrf.mxu1  ;;  %v8572_v48 = vld [vmem:[%s11718_s0 + $0x4bc] sm:$0xf] }
 0x498   : > { %v7478_v24 = vld [vmem:[%s11718_s0 + $0x478] sm:$0xf0]  ;;  %v7545_v0 = vor.u32 %v8572_v48, %v7542_v30 }
 0x499   : > { %v11190_v2 = vadd.f32 %v6168_v26, %v6095_v3  ;;  %v7541_v3 = vor.u32 %v8581_v31, %v7540_v11  ;;  %v7481_v36 = vor.u32 %v8555_v21, %v7478_v24 }
 0x49c   : > { %v5951_v22 = vpop.f32.mrf.mxu2 }
 0x49d   : > { %v5952_v9 = vadd.f32 %v5951_v22, %v10822_v12 }
 0x49e   : > { %v6025_v34 = vpop.f32.mrf.mxu3  ;;  %v6097_v7 = vpop.f32.mrf.mxu0 }
 0x49f   : > { %v6026_v45 = vadd.f32 %v6025_v34, %v5952_v9  ;;  %v6098_v4 = vadd.f32 %v6097_v7, %v6024_v39  ;;  %v6171_v10 = vpop.f32.mrf.mxu1 }
 0x4a1   : > { %v11217_v58 = vadd.f32 %v6171_v10, %v6098_v4  ;;  %6224 = vmatmul.bf16.gmra.mxu2 %v7469_v16  ;;  %6367 = vmatmul.bf16.gmra.mxu0 %v7405_v28  ;;  %v8582_v4 = vld [vmem:[%s11718_s0 + $0x504] sm:$0xf0]  ;;  %v7614_v10 = vld [vmem:[%s11718_s0 + $0x590] sm:$0xf0] }
 0x4a2   : > { %6441 = vmatmul.bf16.gmra.mxu1 %v7409_v62  ;;  %v8599_v62 = vld [vmem:[%s11718_s0 + $0x58c] sm:$0xf0] }
 0x4a3   : > { %6298 = vmatmul.bf16.gmra.mxu3 %v7473_v37  ;;  %v7612_v37 = vld [vmem:[%s11718_s0 + $0x548] sm:$0xf] }
 0x4a4   : > { %v5954_v63 = vpop.f32.mrf.mxu2 }
 0x4a5   : > { %v5955_v52 = vadd.f32 %v5954_v63, %v10849_v59  ;;  %v7476_v59 = vld [vmem:[%s11718_s0 + $0x430] sm:$0xf]  ;;  %v8573_v63 = vld [vmem:[%s11718_s0 + $0x4c4] sm:$0xf] }
 0x4a6   : > { %v6028_v20 = vpop.f32.mrf.mxu3  ;;  %v6099_v12 = vpop.f32.mrf.mxu0  ;;  %v7477_v26 = vor.u32 %v8564_v17, %v7476_v59 }
 0x4a7   : > { %v6029_v32 = vadd.f32 %v6028_v20, %v5955_v52  ;;  %v6100_v35 = vadd.f32 %v6099_v12, %v6026_v45  ;;  %v6173_v6 = vpop.f32.mrf.mxu1  ;;  %v8590_v45 = vld [vmem:[%s11718_s0 + $0x54c] sm:$0xf] }
 0x4a8   : > { %v7550_v52 = vld [vmem:[%s11718_s0 + $0x508] sm:$0xf0]  ;;  %v7617_v31 = vor.u32 %v8590_v45, %v7614_v10 }
 0x4a9   : > { %v11220_v43 = vadd.f32 %v6173_v6, %v6100_v35  ;;  %v7613_v35 = vor.u32 %v8599_v62, %v7612_v37  ;;  %v7553_v48 = vor.u32 %v8573_v63, %v7550_v52 }
 0x4ac   : > { %v5956_v57 = vpop.f32.mrf.mxu2 }
 0x4ad   : > { %v5957_v51 = vadd.f32 %v5956_v57, %v10854_v19 }
 0x4ae   : > { %v6030_v39 = vpop.f32.mrf.mxu3  ;;  %v6102_v38 = vpop.f32.mrf.mxu0 }
 0x4af   : > { %v6031_v14 = vadd.f32 %v6030_v39, %v5957_v51  ;;  %v6103_v29 = vadd.f32 %v6102_v38, %v6029_v32  ;;  %v6176_v60 = vpop.f32.mrf.mxu1 }
 0x4b1   : > { %v11247_v46 = vadd.f32 %v6176_v60, %v6103_v29  ;;  %6229 = vmatmul.bf16.gmra.mxu2 %v7541_v3  ;;  %6372 = vmatmul.bf16.gmra.mxu0 %v7477_v26  ;;  %v8600_v29 = vld [vmem:[%s11718_s0 + $0x594] sm:$0xf0]  ;;  %v7686_v60 = vld [vmem:[%s11718_s0 + $0x620] sm:$0xf0] }
 0x4b2   : > { %6446 = vmatmul.bf16.gmra.mxu1 %v7481_v36  ;;  %v8617_v36 = vld [vmem:[%s11718_s0 + $0x61c] sm:$0xf0] }
 0x4b3   : > { %6303 = vmatmul.bf16.gmra.mxu3 %v7545_v0  ;;  %v7684_v0 = vld [vmem:[%s11718_s0 + $0x5d8] sm:$0xf] }
 0x4b4   : > { %v6190_v47 = vpop.f32.mrf.mxu2 }
 0x4b5   : > { %v6191_v22 = vadd.f32 %v6190_v47, %v10882_v44  ;;  %v7548_v44 = vld [vmem:[%s11718_s0 + $0x4c0] sm:$0xf]  ;;  %v8591_v47 = vld [vmem:[%s11718_s0 + $0x554] sm:$0xf] }
 0x4b6   : > { %v6264_v9 = vpop.f32.mrf.mxu3  ;;  %v6104_v19 = vpop.f32.mrf.mxu0  ;;  %v7549_v6 = vor.u32 %v8582_v4, %v7548_v44 }
 0x4b7   : > { %v6265_v34 = vadd.f32 %v6264_v9, %v6191_v22  ;;  %v6105_v16 = vadd.f32 %v6104_v19, %v6031_v14  ;;  %v6178_v28 = vpop.f32.mrf.mxu1  ;;  %v8608_v14 = vld [vmem:[%s11718_s0 + $0x5dc] sm:$0xf] }
 0x4b8   : > { %v7622_v22 = vld [vmem:[%s11718_s0 + $0x598] sm:$0xf0]  ;;  %v7689_v62 = vor.u32 %v8608_v14, %v7686_v60 }
 0x4b9   : > { %v11250_v7 = vadd.f32 %v6178_v28, %v6105_v16  ;;  %v7685_v16 = vor.u32 %v8617_v36, %v7684_v0  ;;  %v7625_v45 = vor.u32 %v8591_v47, %v7622_v22 }
 0x4bc   : > { %v6192_v20 = vpop.f32.mrf.mxu2 }
 0x4bd   : > { %v6193_v12 = vadd.f32 %v6192_v20, %v10886_v40 }
 0x4be   : > { %v6266_v32 = vpop.f32.mrf.mxu3  ;;  %v6338_v11 = vpop.f32.mrf.mxu0 }
 0x4bf   : > { %v6267_v59 = vadd.f32 %v6266_v32, %v6193_v12  ;;  %v6339_v17 = vadd.f32 %v6338_v11, %v6265_v34  ;;  %v6412_v30 = vpop.f32.mrf.mxu1 }
 0x4c1   : > { %v11277_v21 = vadd.f32 %v6412_v30, %v6339_v17  ;;  %6234 = vmatmul.bf16.gmra.mxu2 %v7613_v35  ;;  %6377 = vmatmul.bf16.gmra.mxu0 %v7549_v6  ;;  %v8618_v17 = vld [vmem:[%s11718_s0 + $0x624] sm:$0xf0]  ;;  %v7758_v30 = vld [vmem:[%s11718_s0 + $0x6b0] sm:$0xf0] }
 0x4c2   : > { %6451 = vmatmul.bf16.gmra.mxu1 %v7553_v48  ;;  %v8635_v48 = vld [vmem:[%s11718_s0 + $0x6ac] sm:$0xf0] }
 0x4c3   : > { %6308 = vmatmul.bf16.gmra.mxu3 %v7617_v31  ;;  %v7756_v31 = vld [vmem:[%s11718_s0 + $0x668] sm:$0xf] }
 0x4c4   : > { %v6195_v24 = vpop.f32.mrf.mxu2 }
 0x4c5   : > { %v6196_v57 = vadd.f32 %v6195_v24, %v10914_v27  ;;  %v7620_v27 = vld [vmem:[%s11718_s0 + $0x550] sm:$0xf]  ;;  %v8609_v24 = vld [vmem:[%s11718_s0 + $0x5e4] sm:$0xf] }
 0x4c6   : > { %v6269_v51 = vpop.f32.mrf.mxu3  ;;  %v6340_v40 = vpop.f32.mrf.mxu0  ;;  %v7621_v28 = vor.u32 %v8600_v29, %v7620_v27 }
 0x4c7   : > { %v6270_v39 = vadd.f32 %v6269_v51, %v6196_v57  ;;  %v6341_v3 = vadd.f32 %v6340_v40, %v6267_v59  ;;  %v6414_v26 = vpop.f32.mrf.mxu1  ;;  %v8626_v59 = vld [vmem:[%s11718_s0 + $0x66c] sm:$0xf] }
 0x4c8   : > { %v7694_v57 = vld [vmem:[%s11718_s0 + $0x628] sm:$0xf0]  ;;  %v7761_v36 = vor.u32 %v8626_v59, %v7758_v30 }
 0x4c9   : > { %v11280_v38 = vadd.f32 %v6414_v26, %v6341_v3  ;;  %v7757_v3 = vor.u32 %v8635_v48, %v7756_v31  ;;  %v7697_v14 = vor.u32 %v8609_v24, %v7694_v57 }
 0x4cc   : > { %v6197_v9 = vpop.f32.mrf.mxu2 }
 0x4cd   : > { %v6198_v19 = vadd.f32 %v6197_v9, %v10921_v15 }
 0x4ce   : > { %v6271_v34 = vpop.f32.mrf.mxu3  ;;  %v6343_v37 = vpop.f32.mrf.mxu0 }
 0x4cf   : > { %v6272_v44 = vadd.f32 %v6271_v34, %v6198_v19  ;;  %v6344_v4 = vadd.f32 %v6343_v37, %v6270_v39  ;;  %v6417_v10 = vpop.f32.mrf.mxu1 }
 0x4d1   : > { %v11307_v63 = vadd.f32 %v6417_v10, %v6344_v4  ;;  %6239 = vmatmul.bf16.gmra.mxu2 %v7685_v16  ;;  %6382 = vmatmul.bf16.gmra.mxu0 %v7621_v28  ;;  %v8636_v4 = vld [vmem:[%s11718_s0 + $0x6b4] sm:$0xf0]  ;;  %v7830_v10 = vld [vmem:[%s11718_s0 + $0x740] sm:$0xf0] }
 0x4d2   : > { %6456 = vmatmul.bf16.gmra.mxu1 %v7625_v45  ;;  %v8653_v45 = vld [vmem:[%s11718_s0 + $0x73c] sm:$0xf0] }
 0x4d3   : > { %6313 = vmatmul.bf16.gmra.mxu3 %v7689_v62  ;;  %v7828_v62 = vld [vmem:[%s11718_s0 + $0x6f8] sm:$0xf] }
 0x4d4   : > { %v6200_v52 = vpop.f32.mrf.mxu2 }
 0x4d5   : > { %v6201_v20 = vadd.f32 %v6200_v52, %v10947_v54  ;;  %v7692_v54 = vld [vmem:[%s11718_s0 + $0x5e0] sm:$0xf]  ;;  %v8627_v52 = vld [vmem:[%s11718_s0 + $0x674] sm:$0xf] }
 0x4d6   : > { %v6274_v12 = vpop.f32.mrf.mxu3  ;;  %v6345_v15 = vpop.f32.mrf.mxu0  ;;  %v7693_v26 = vor.u32 %v8618_v17, %v7692_v54 }
 0x4d7   : > { %v6275_v32 = vadd.f32 %v6274_v12, %v6201_v20  ;;  %v6346_v35 = vadd.f32 %v6345_v15, %v6272_v44  ;;  %v6419_v6 = vpop.f32.mrf.mxu1  ;;  %v8644_v44 = vld [vmem:[%s11718_s0 + $0x6fc] sm:$0xf] }
 0x4d8   : > { %v7766_v20 = vld [vmem:[%s11718_s0 + $0x6b8] sm:$0xf0]  ;;  %v7833_v48 = vor.u32 %v8644_v44, %v7830_v10 }
 0x4d9   : > { %v11310_v11 = vadd.f32 %v6419_v6, %v6346_v35  ;;  %v7829_v35 = vor.u32 %v8653_v45, %v7828_v62  ;;  %v7769_v59 = vor.u32 %v8627_v52, %v7766_v20 }
 0x4db   : > { %11730 = vst [vmem:[#allocation4_spill] sm:$0xff] %v11310_v11 }
 0x4dc   : > { %v6202_v51 = vpop.f32.mrf.mxu2 }
 0x4dd   : > { %v6203_v40 = vadd.f32 %v6202_v51, %v10950_v8 }
 0x4de   : > { %v6276_v39 = vpop.f32.mrf.mxu3  ;;  %v6348_v0 = vpop.f32.mrf.mxu0 }
 0x4df   : > { %v6277_v27 = vadd.f32 %v6276_v39, %v6203_v40  ;;  %v6349_v29 = vadd.f32 %v6348_v0, %v6275_v32  ;;  %v6422_v60 = vpop.f32.mrf.mxu1 }
 0x4e1   : > { %v11337_v47 = vadd.f32 %v6422_v60, %v6349_v29  ;;  %6244 = vmatmul.bf16.gmra.mxu2 %v7757_v3  ;;  %6387 = vmatmul.bf16.gmra.mxu0 %v7693_v26 }
 0x4e2   : > { %6461 = vmatmul.bf16.gmra.mxu1 %v7697_v14  ;;  %v8654_v14 = vld [vmem:[%s11718_s0 + $0x744] sm:$0xf0] }
 0x4e3   : > { %11731 = vst [vmem:[#allocation5_spill] sm:$0xff] %v11337_v47  ;;  %6318 = vmatmul.bf16.gmra.mxu3 %v7761_v36  ;;  %v7836_v36 = vld [vmem:[%s11718_s0 + $0x700] sm:$0xf] }
 0x4e4   : > { %v6205_v22 = vpop.f32.mrf.mxu2 }
 0x4e5   : > { %v6206_v9 = vadd.f32 %v6205_v22, %v10977_v1  ;;  %v7764_v1 = vld [vmem:[%s11718_s0 + $0x670] sm:$0xf] }
 0x4e6   : > { %v6279_v19 = vpop.f32.mrf.mxu3  ;;  %v6350_v8 = vpop.f32.mrf.mxu0  ;;  %v7765_v6 = vor.u32 %v8636_v4, %v7764_v1 }
 0x4e7   : > { %v6280_v34 = vadd.f32 %v6279_v19, %v6206_v9  ;;  %v6351_v16 = vadd.f32 %v6350_v8, %v6277_v27  ;;  %v6424_v28 = vpop.f32.mrf.mxu1  ;;  %v8645_v27 = vld [vmem:[%s11718_s0 + $0x704] sm:$0xf]  ;;  %v7837_v9 = vor.u32 %v8654_v14, %v7836_v36 }
 0x4e9   : > { %v11340_v37 = vadd.f32 %v6424_v28, %v6351_v16 }
 0x4eb   : > { %11732 = vst [vmem:[#allocation6_spill] sm:$0xff] %v11340_v37 }
 0x4ec   : > { %v6207_v12 = vpop.f32.mrf.mxu2 }
 0x4ed   : > { %v6208_v15 = vadd.f32 %v6207_v12, %v10980_v49 }
 0x4ee   : > { %v6281_v32 = vpop.f32.mrf.mxu3  ;;  %v6353_v31 = vpop.f32.mrf.mxu0 }
 0x4ef   : > { %v6282_v54 = vadd.f32 %v6281_v32, %v6208_v15  ;;  %v6354_v17 = vadd.f32 %v6353_v31, %v6280_v34  ;;  %v6427_v30 = vpop.f32.mrf.mxu1 }
 0x4f1   : > { %v11367_v24 = vadd.f32 %v6427_v30, %v6354_v17  ;;  %6249 = vmatmul.bf16.gmra.mxu2 %v7829_v35  ;;  %6392 = vmatmul.bf16.gmra.mxu0 %v7765_v6 }
 0x4f2   : > { %6466 = vmatmul.bf16.gmra.mxu1 %v7769_v59 }
 0x4f3   : > { %11733 = vst [vmem:[#allocation7_spill] sm:$0xff] %v11367_v24  ;;  %6323 = vmatmul.bf16.gmra.mxu3 %v7833_v48 }
 0x4f4   : > { %v6210_v57 = vpop.f32.mrf.mxu2 }
 0x4f5   : > { %v6211_v51 = vadd.f32 %v6210_v57, %v11007_v55  ;;  %v7838_v55 = vld [vmem:[%s11718_s0 + $0x748] sm:$0xf0] }
 0x4f6   : > { %v6284_v40 = vpop.f32.mrf.mxu3  ;;  %v6355_v49 = vpop.f32.mrf.mxu0  ;;  %v7841_v8 = vor.u32 %v8645_v27, %v7838_v55 }
 0x4f7   : > { %v6285_v39 = vadd.f32 %v6284_v40, %v6211_v51  ;;  %v6356_v3 = vadd.f32 %v6355_v49, %v6282_v54  ;;  %v6429_v26 = vpop.f32.mrf.mxu1 }
 0x4f9   : > { %v11370_v0 = vadd.f32 %v6429_v26, %v6356_v3 }
 0x4fb   : > { %11734 = vst [vmem:[#allocation8_spill] sm:$0xff] %v11370_v0 }
 0x4fc   : > { %v6212_v29 = vpop.f32.mrf.mxu2 }
 0x4fd   : > { %v6213_v60 = vadd.f32 %v6212_v29, %v11010_v56 }
 0x4fe   : > { %v6286_v22 = vpop.f32.mrf.mxu3  ;;  %v6358_v19 = vpop.f32.mrf.mxu0 }
 0x4ff   : > { %v6287_v34 = vadd.f32 %v6286_v22, %v6213_v60  ;;  %v6359_v16 = vadd.f32 %v6358_v19, %v6285_v39  ;;  %v6432_v28 = vpop.f32.mrf.mxu1 }
 0x501   : > { %v11385_v62 = vadd.f32 %v6432_v28, %v6359_v16  ;;  %6397 = vmatmul.bf16.gmra.mxu0 %v7837_v9 }
 0x502   : > { %6471 = vmatmul.bf16.gmra.mxu1 %v7841_v8 }
 0x503   : > { %11735 = vst [vmem:[#allocation9_spill] sm:$0xff] %v11385_v62 }
 0x504   : > { %v6215_v45 = vpop.f32.mrf.mxu2 }
 0x505   : > { %v6216_v44 = vadd.f32 %v6215_v45, %v11037_v61 }
 0x506   : > { %v6289_v1 = vpop.f32.mrf.mxu3  ;;  %v6360_v4 = vpop.f32.mrf.mxu0 }
 0x507   : > { %v6290_v10 = vadd.f32 %v6289_v1, %v6216_v44  ;;  %v6361_v52 = vadd.f32 %v6360_v4, %v6287_v34  ;;  %v6434_v20 = vpop.f32.mrf.mxu1 }
 0x509   : > { %v11388_v56 = vadd.f32 %v6434_v20, %v6361_v52 }
 0x50c   : > { %v6217_v12 = vpop.f32.mrf.mxu2 }
 0x50d   : > { %v6218_v15 = vadd.f32 %v6217_v12, %v11040_v41 }
 0x50e   : > { %v6291_v32 = vpop.f32.mrf.mxu3  ;;  %v6363_v35 = vpop.f32.mrf.mxu0 }
 0x50f   : > { %v6292_v6 = vadd.f32 %v6291_v32, %v6218_v15  ;;  %v6364_v31 = vadd.f32 %v6363_v35, %v6290_v10  ;;  %v6437_v48 = vpop.f32.mrf.mxu1 }
 0x511   : > { %v11391_v59 = vadd.f32 %v6437_v48, %v6364_v31 }
 0x514   : > { %v6220_v54 = vpop.f32.mrf.mxu2 }
 0x515   : > { %v6221_v61 = vadd.f32 %v6220_v54, %v11067_v5 }
 0x516   : > { %v6294_v17 = vpop.f32.mrf.mxu3  ;;  %v6365_v30 = vpop.f32.mrf.mxu0 }
 0x517   : > { %v6295_v57 = vadd.f32 %v6294_v17, %v6221_v61  ;;  %v6366_v51 = vadd.f32 %v6365_v30, %v6292_v6  ;;  %v6439_v40 = vpop.f32.mrf.mxu1 }
 0x519   : > { %v11394_v49 = vadd.f32 %v6439_v40, %v6366_v51 }
 0x51c   : > { %v6222_v39 = vpop.f32.mrf.mxu2 }
 0x51d   : > { %v6223_v41 = vadd.f32 %v6222_v39, %v11070_v13  ;;  %v6509_v39 = vmul.f32 %v11280_v38, %v11280_v38 }
 0x51e   : > { %v6296_v3 = vpop.f32.mrf.mxu3  ;;  %v6368_v26 = vpop.f32.mrf.mxu0 }
 0x51f   : > { %v6297_v36 = vadd.f32 %v6296_v3, %v6223_v41  ;;  %v6369_v14 = vadd.f32 %v6368_v26, %v6295_v57  ;;  %v6442_v27 = vpop.f32.mrf.mxu1  ;;  %v6508_v3 = vmul.f32 %v11277_v21, %v11277_v21  ;;  %v6477_v26 = vadd.f32 %v11280_v38, %v11277_v21 }
 0x521   : > { %v11397_v55 = vadd.f32 %v6442_v27, %v6369_v14  ;;  %v6534_v14 = vadd.f32 %v6509_v39, %v6508_v3  ;;  %v6478_v27 = vadd.f32 %v6477_v26, %v11307_v63 }
 0x524   : > { %v6225_v29 = vpop.f32.mrf.mxu2 }
 0x525   : > { %v6226_v5 = vadd.f32 %v6225_v29, %v11097_v25  ;;  %v6511_v29 = vmul.f32 %v11310_v11, %v11310_v11 }
 0x526   : > { %v6299_v60 = vpop.f32.mrf.mxu3  ;;  %v6370_v22 = vpop.f32.mrf.mxu0 }
 0x527   : > { %v6300_v9 = vadd.f32 %v6299_v60, %v6226_v5  ;;  %v6371_v19 = vadd.f32 %v6370_v22, %v6297_v36  ;;  %v6444_v8 = vpop.f32.mrf.mxu1  ;;  %v6510_v36 = vmul.f32 %v11307_v63, %v11307_v63  ;;  %v6479_v22 = vadd.f32 %v6478_v27, %v11310_v11 }
 0x528   : > { %v6515_v11 = vmul.f32 %v11370_v0, %v11370_v0 }
 0x529   : > { %v11400_v34 = vadd.f32 %v6444_v8, %v6371_v19  ;;  %v6535_v60 = vadd.f32 %v6534_v14, %v6510_v36  ;;  %v6514_v36 = vmul.f32 %v11367_v24, %v11367_v24 }
 0x52c   : > { %v6227_v16 = vpop.f32.mrf.mxu2 }
 0x52e   : > { %v11402_v28 = vpop.f32.mrf.mxu3  ;;  %v6373_v13 = vpop.f32.mrf.mxu0 }
 0x52f   : > { %v6374_v45 = vadd.f32 %v6373_v13, %v6300_v9  ;;  %v6447_v44 = vpop.f32.mrf.mxu1  ;;  %v6512_v9 = vmul.f32 %v11337_v47, %v11337_v47  ;;  %v6536_v13 = vadd.f32 %v6535_v60, %v6511_v29 }
 0x531   : > { %v11404_v1 = vadd.f32 %v6447_v44, %v6374_v45  ;;  %v6480_v45 = vadd.f32 %v6479_v22, %v11337_v47  ;;  %v6513_v44 = vmul.f32 %v11340_v37, %v11340_v37  ;;  %v6537_v3 = vadd.f32 %v6536_v13, %v6512_v9 }
 0x532   : > { %v6516_v47 = vmul.f32 %v11385_v62, %v11385_v62  ;;  %v6228_v9 = vadd.f32 %v6227_v16, %v11100_v42  ;;  %v6518_v42 = vmul.f32 %v11391_v59, %v11391_v59 }
 0x533   : > { %v6481_v26 = vadd.f32 %v6480_v45, %v11340_v37  ;;  %v6538_v14 = vadd.f32 %v6537_v3, %v6513_v44  ;;  %v6517_v3 = vmul.f32 %v11388_v56, %v11388_v56 }
 0x534   : > { %v6230_v4 = vpop.f32.mrf.mxu2  ;;  %v6302_v16 = vadd.f32 %v11402_v28, %v6228_v9 }
 0x535   : > { %v6482_v27 = vadd.f32 %v6481_v26, %v11367_v24  ;;  %v6539_v60 = vadd.f32 %v6538_v14, %v6514_v36  ;;  %v6231_v36 = vadd.f32 %v6230_v4, %v11127_v23 }
 0x536   : > { %v6304_v10 = vpop.f32.mrf.mxu3  ;;  %v6375_v52 = vpop.f32.mrf.mxu0 }
 0x537   : > { %v11406_v20 = vpop.f32.mrf.mxu1  ;;  %v6483_v22 = vadd.f32 %v6482_v27, %v11370_v0  ;;  %v6540_v37 = vadd.f32 %v6539_v60, %v6515_v11  ;;  %v6376_v24 = vadd.f32 %v6375_v52, %v6302_v16 }
 0x539   : > { %v6484_v44 = vadd.f32 %v6483_v22, %v11385_v62  ;;  %v6541_v14 = vadd.f32 %v6540_v37, %v6516_v47  ;;  %v6519_v22 = vmul.f32 %v11394_v49, %v11394_v49  ;;  %v6305_v62 = vadd.f32 %v6304_v10, %v6231_v36 }
 0x53b   : > { %v6485_v27 = vadd.f32 %v6484_v44, %v11388_v56  ;;  %v6542_v11 = vadd.f32 %v6541_v14, %v6517_v3  ;;  %v6520_v44 = vmul.f32 %v11397_v55, %v11397_v55 }
 0x53c   : > { %v6232_v25 = vpop.f32.mrf.mxu2 }
 0x53d   : > { %v6233_v0 = vadd.f32 %v6232_v25, %v11130_v33  ;;  %v6486_v60 = vadd.f32 %v6485_v27, %v11391_v59  ;;  %v6543_v37 = vadd.f32 %v6542_v11, %v6518_v42 }
 0x53e   : > { %v11408_v12 = vpop.f32.mrf.mxu3  ;;  %v11410_v15 = vpop.f32.mrf.mxu0 }
 0x53f   : > { %v11412_v32 = vpop.f32.mrf.mxu1  ;;  %v6487_v4 = vadd.f32 %v6486_v60, %v11394_v49  ;;  %v6307_v28 = vadd.f32 %v11408_v12, %v6233_v0  ;;  %v6379_v33 = vadd.f32 %v11410_v15, %v6305_v62  ;;  %v6544_v3 = vadd.f32 %v6543_v37, %v6519_v22 }
 0x540   : > { %v6522_v15 = vmul.f32 %v11404_v1, %v11404_v1 }
 0x541   : > { %v6488_v10 = vadd.f32 %v6487_v4, %v11397_v55  ;;  %v6545_v12 = vadd.f32 %v6544_v3, %v6520_v44 }
 0x543   : > { %v6489_v62 = vadd.f32 %v6488_v10, %v11400_v34 }
 0x544   : > { %v6235_v35 = vpop.f32.mrf.mxu2 }
 0x545   : > { %v6236_v23 = vadd.f32 %v6235_v35, %v11157_v53  ;;  %v6521_v53 = vmul.f32 %v11400_v34, %v11400_v34  ;;  %v11498_v35 = vadd.f32 %v11406_v20, %v6376_v24  ;;  %v6490_v27 = vadd.f32 %v6489_v62, %v11404_v1 }
 0x546   : > { %v11414_v6 = vpop.f32.mrf.mxu3  ;;  %v11416_v31 = vpop.f32.mrf.mxu0 }
 0x547   : > { %v11418_v48 = vpop.f32.mrf.mxu1  ;;  %v6310_v36 = vadd.f32 %v11414_v6, %v6236_v23  ;;  %v6381_v14 = vadd.f32 %v11416_v31, %v6307_v28  ;;  %v6546_v6 = vadd.f32 %v6545_v12, %v6521_v53  ;;  %v6523_v42 = vmul.f32 %v11498_v35, %v11498_v35 }
 0x548   : > { %v6491_v11 = vadd.f32 %v6490_v27, %v11498_v35  ;;  %v8871_v53 = vmov 196.0  }
 0x549   : > { %8843 = vrcp.f32 %v8871_v53 }
 0x54c   : > { %v6237_v54 = vpop.f32.mrf.mxu2 }
 0x54d   : > { %v6238_v25 = vadd.f32 %v6237_v54, %v11160_v50  ;;  %v11508_v54 = vadd.f32 %v11412_v32, %v6379_v33 }
 0x54e   : > { %v11420_v61 = vpop.f32.mrf.mxu3  ;;  %v11422_v17 = vpop.f32.mrf.mxu0 }
 0x54f   : > { %v11424_v30 = vpop.f32.mrf.mxu1  ;;  %v6312_v24 = vadd.f32 %v11420_v61, %v6238_v25  ;;  %v6384_v20 = vadd.f32 %v11422_v17, %v6310_v36  ;;  %v6547_v17 = vadd.f32 %v6546_v6, %v6522_v15 }
 0x554   : > { %v11426_v57 = vpop.f32.mrf.mxu2 }
 0x555   : > { %v6241_v50 = vadd.f32 %v11426_v57, %v11187_v18  ;;  %v11518_v18 = vadd.f32 %v11418_v48, %v6381_v14 }
 0x556   : > { %v11428_v51 = vpop.f32.mrf.mxu3  ;;  %v11430_v40 = vpop.f32.mrf.mxu0 }
 0x557   : > { %v11434_v41 = vpop.f32.mrf.mxu1  ;;  %v6386_v57 = vadd.f32 %v11430_v40, %v6312_v24  ;;  %v6315_v16 = vadd.f32 %v11428_v51, %v6241_v50  ;;  %v6548_v51 = vadd.f32 %v6547_v17, %v6523_v42 }
 0x559   : > { %v11536_v37 = vadd.f32 %v11434_v41, %v6386_v57 }
 0x55c   : > { %v11445_v5 = vpop.f32.mrf.mxu2 }
 0x55d   : > { %v6243_v31 = vadd.f32 %v11445_v5, %v11190_v2  ;;  %v6524_v2 = vmul.f32 %v11508_v54, %v11508_v54  ;;  %v11527_v5 = vadd.f32 %v11424_v30, %v6384_v20 }
 0x55e   : > { %v11450_v19 = vpop.f32.mrf.mxu3  ;;  %v11452_v8 = vpop.f32.mrf.mxu0 }
 0x55f   : > { %v11457_v39 = vpop.f32.mrf.mxu1  ;;  %v6317_v48 = vadd.f32 %v11450_v19, %v6243_v31  ;;  %v6389_v22 = vadd.f32 %v11452_v8, %v6315_v16  ;;  %v6549_v44 = vadd.f32 %v6548_v51, %v6524_v2  ;;  %v8844_v31 = vpop.eup %8843 }
 0x560   : > { %vm6570_vm0 = vweird.f32 %v8844_v31 }
 0x561   : > { %v11545_v28 = vadd.f32 %v11457_v39, %v6389_v22 }
 0x564   : > { %v6245_v29 = vpop.f32.mrf.mxu2 }
 0x565   : > { %v6246_v61 = vadd.f32 %v6245_v29, %v11217_v58  ;;  %v6492_v58 = vadd.f32 %v6491_v11, %v11508_v54  ;;  %v6525_v29 = vmul.f32 %v11518_v18, %v11518_v18 }
 0x566   : > { %v11469_v13 = vpop.f32.mrf.mxu3  ;;  %v11471_v45 = vpop.f32.mrf.mxu0 }
 0x567   : > { %v11476_v26 = vpop.f32.mrf.mxu1  ;;  %v6320_v30 = vadd.f32 %v11469_v13, %v6246_v61  ;;  %v6391_v4 = vadd.f32 %v11471_v45, %v6317_v48  ;;  %v6493_v8 = vadd.f32 %v6492_v58, %v11518_v18  ;;  %v6550_v41 = vadd.f32 %v6549_v44, %v6525_v29 }
 0x568   : > { %v6527_v13 = vmul.f32 %v11536_v37, %v11536_v37 }
 0x569   : > { %v6494_v3 = vadd.f32 %v6493_v8, %v11527_v5 }
 0x56b   : > { %v6495_v39 = vadd.f32 %v6494_v3, %v11536_v37 }
 0x56c   : > { %v6247_v47 = vpop.f32.mrf.mxu2 }
 0x56d   : > { %v6248_v40 = vadd.f32 %v6247_v47, %v11220_v43  ;;  %v6526_v43 = vmul.f32 %v11527_v5, %v11527_v5 }
 0x56e   : > { %v6393_v9 = vpop.f32.mrf.mxu0  ;;  %v6321_v0 = vpop.f32.mrf.mxu3 }
 0x56f   : > { %v6467_v52 = vpop.f32.mrf.mxu1  ;;  %v6322_v33 = vadd.f32 %v6321_v0, %v6248_v40  ;;  %v6394_v25 = vadd.f32 %v6393_v9, %v6320_v30  ;;  %v6551_v36 = vadd.f32 %v6550_v41, %v6526_v43  ;;  %v6528_v9 = vmul.f32 %v11545_v28, %v11545_v28 }
 0x571   : > { %v11556_v0 = vadd.f32 %v6467_v52, %v6394_v25  ;;  %v6552_v15 = vadd.f32 %v6551_v36, %v6527_v13 }
 0x573   : > { %v6553_v27 = vadd.f32 %v6552_v15, %v6528_v9  ;;  %v6530_v52 = vmul.f32 %v11556_v0, %v11556_v0 }
 0x574   : > { %v6250_v32 = vpop.f32.mrf.mxu2 }
 0x575   : > { %v6251_v19 = vadd.f32 %v6250_v32, %v11247_v46  ;;  %v11551_v46 = vadd.f32 %v11476_v26, %v6391_v4  ;;  %v6496_v26 = vadd.f32 %v6495_v39, %v11545_v28 }
 0x576   : > { %v6395_v60 = vpop.f32.mrf.mxu0  ;;  %v6324_v47 = vpop.f32.mrf.mxu3 }
 0x577   : > { %v6469_v23 = vpop.f32.mrf.mxu1  ;;  %v6325_v45 = vadd.f32 %v6324_v47, %v6251_v19  ;;  %v6396_v10 = vadd.f32 %v6395_v60, %v6322_v33  ;;  %v6529_v24 = vmul.f32 %v11551_v46, %v11551_v46  ;;  %v6497_v42 = vadd.f32 %v6496_v26, %v11551_v46 }
 0x578   : > { %v6566_v60 = vmul.f32 196.0, %v8844_v31 }
 0x579   : > { %v11561_v20 = vadd.f32 %v6469_v23, %v6396_v10  ;;  %v6554_v16 = vadd.f32 %v6553_v27, %v6529_v24  ;;  %v6498_v61 = vadd.f32 %v6497_v42, %v11556_v0 }
 0x57a   : > { %v6567_v30 = vsub.f32 1.0, %v6566_v60 }
 0x57b   : > { %v6531_v17 = vmul.f32 %v11561_v20, %v11561_v20  ;;  %v6499_v48 = vadd.f32 %v6498_v61, %v11561_v20 }
 0x57c   : > { %v6252_v14 = vpop.f32.mrf.mxu2  ;;  %v6568_v47 = vmul.f32 %v8844_v31, %v6567_v30 }
 0x57d   : > { %v6253_v6 = vadd.f32 %v6252_v14, %v11250_v7  ;;  %v6555_v7 = vadd.f32 %v6554_v16, %v6530_v52 }
 0x57e   : > { %v6398_v12 = vpop.f32.mrf.mxu0  ;;  %v6326_v32 = vpop.f32.mrf.mxu3  ;;  %v6569_v13 = vadd.f32 %v8844_v31, %v6568_v47 }
 0x57f   : > { %v6399_v62 = vadd.f32 %v6398_v12, %v6325_v45  ;;  %v6472_v50 = vpop.f32.mrf.mxu1  ;;  %v6327_v11 = vadd.f32 %v6326_v32, %v6253_v6  ;;  %v6556_v51 = vadd.f32 %v6555_v7, %v6531_v17  ;;  %v6576_v32 = vld [vmem:[%s2585_s20] sm:$0x1] }
 0x580   : > { %v6571_v14 = vsel %vm6570_vm0, %v8844_v31, %v6569_v13 }
 0x581   : > { %v11567_v57 = vadd.f32 %v6472_v50, %v6399_v62 }
 0x583   : > { %v6532_v22 = vmul.f32 %v11567_v57, %v11567_v57  ;;  %v6500_v58 = vadd.f32 %v6499_v48, %v11567_v57 }
 0x585   : > { %v6557_v4 = vadd.f32 %v6556_v51, %v6532_v22 }
 0x586   : > { %v6400_v2 = vpop.f32.mrf.mxu0 }
 0x587   : > { %v6401_v40 = vadd.f32 %v6400_v2, %v6327_v11  ;;  %v6474_v23 = vpop.f32.mrf.mxu1  ;;  %v6589_v11 = vld [vmem:[%s2588_s25] sm:$0x1] }
 0x589   : > { %v11576_v29 = vadd.f32 %v6474_v23, %v6401_v40  ;;  %v11736_v23 = vld [vmem:[#allocation4_spill] sm:$0xff] }
 0x58b   : > { %v6501_v19 = vadd.f32 %v6500_v58, %v11576_v29  ;;  %v6533_v44 = vmul.f32 %v11576_v29, %v11576_v29  ;;  %v11737_v58 = vld [vmem:[#allocation5_spill] sm:$0xff] }
 0x58d   : > { %v6502_v8 = vrot.slane %v6501_v19, 4  ;;  %v6558_v43 = vadd.f32 %v6557_v4, %v6533_v44  ;;  %v11738_v4 = vld [vmem:[#allocation6_spill] sm:$0xff]  ;;  %v11739_v44 = vld [vmem:[#allocation7_spill] sm:$0xff] }
 0x58f   : > { %v6503_v33 = vadd.f32 %v6502_v8, %v6501_v19  ;;  %v6559_v25 = vrot.slane %v6558_v43, 4 }
 0x591   : > { %v6504_v41 = vrot.slane %v6503_v33, 2  ;;  %v6560_v3 = vadd.f32 %v6559_v25, %v6558_v43  ;;  %v11740_v43 = vld [vmem:[#allocation8_spill] sm:$0xff] }
 0x593   : > { %v6505_v45 = vadd.f32 %v6504_v41, %v6503_v33  ;;  %v6561_v10 = vrot.slane %v6560_v3, 2  ;;  %v11741_v33 = vld [vmem:[#allocation9_spill] sm:$0xff] }
 0x595   : > { %v6506_v53 = vrot.slane %v6505_v45, 1  ;;  %v6562_v36 = vadd.f32 %v6561_v10, %v6560_v3 }
 0x597   : > { %v6507_v12 = vadd.f32 %v6506_v53, %v6505_v45  ;;  %v6563_v39 = vrot.slane %v6562_v36, 1 }
 0x599   : > { %v6564_v9 = vadd.f32 %v6563_v39, %v6562_v36  ;;  %v6572_v62 = vmul.f32 %v6571_v14, %v6507_v12 }
 0x59b   : > { %v6573_v50 = vmul.f32 %v6571_v14, %v6564_v9  ;;  %v6574_v15 = vmul.f32 %v6572_v62, %v6572_v62 }
 0x59d   : > { %v6575_v26 = vsub.f32 %v6573_v50, %v6574_v15 }
 0x59f   : > { %v6577_v24 = vadd.f32 1e-05, %v6575_v26 }
 0x5a1   : > { %8845 = vrsqrt.f32 %v6577_v24  ;;  %vm6584_vm2 = vweird.f32 %v6577_v24 }
 0x5a7   : > { %v8846_v6 = vpop.eup %8845 }
 0x5a8   : > { %v6579_v27 = vmul.f32 %v8846_v6, %v6577_v24  ;;  %vm6585_vm1 = vweird.f32 %v8846_v6 }
 0x5a9   : > { %vm6586_vm3 = vmor %vm6584_vm2, %vm6585_vm1 }
 0x5aa   : > { %v6580_v42 = vmul.f32 %v8846_v6, %v6579_v27 }
 0x5ac   : > { %v6581_v52 = vmul.f32 0.5, %v6580_v42 }
 0x5ae   : > { %v6582_v31 = vsub.f32 1.5, %v6581_v52 }
 0x5b0   : > { %v6583_v16 = vmul.f32 %v8846_v6, %v6582_v31 }
 0x5b2   : > { %v6587_v61 = vsel %vm6586_vm3, %v8846_v6, %v6583_v16 }
 0x5b3   : > { %v6588_v17 = vmul.f32 %v6587_v61, %v6576_v32 }
 0x5b5   : > { %v6590_v2 = vmul.f32 %v6588_v17, %v6572_v62  ;;  %v6593_v60 = vperm.slane %v6588_v17, 0 }
 0x5b7   : > { %v6591_v7 = vsub.f32 %v6589_v11, %v6590_v2  ;;  %v6595_v48 = vmul.f32 %v6593_v60, %v11277_v21  ;;  %v6596_v22 = vmul.f32 %v6593_v60, %v11280_v38  ;;  %v6597_v40 = vmul.f32 %v6593_v60, %v11307_v63 }
 0x5b8   : > { %v6598_v51 = vmul.f32 %v6593_v60, %v11736_v23  ;;  %v6599_v30 = vmul.f32 %v6593_v60, %v11737_v58  ;;  %v6600_v19 = vmul.f32 %v6593_v60, %v11738_v4  ;;  %v6601_v8 = vmul.f32 %v6593_v60, %v11739_v44 }
 0x5b9   : > { %v6602_v47 = vmul.f32 %v6593_v60, %v11740_v43  ;;  %v6603_v25 = vmul.f32 %v6593_v60, %v11741_v33  ;;  %v6604_v21 = vmul.f32 %v6593_v60, %v11388_v56  ;;  %v6605_v38 = vmul.f32 %v6593_v60, %v11391_v59 }
 0x5ba   : > { %v6606_v63 = vmul.f32 %v6593_v60, %v11394_v49  ;;  %v6607_v41 = vmul.f32 %v6593_v60, %v11397_v55  ;;  %v6608_v3 = vmul.f32 %v6593_v60, %v11400_v34  ;;  %v6609_v13 = vmul.f32 %v6593_v60, %v11404_v1 }
 0x5bb   : > { %v6610_v45 = vmul.f32 %v6593_v60, %v11498_v35  ;;  %v6611_v10 = vmul.f32 %v6593_v60, %v11508_v54  ;;  %v6612_v53 = vmul.f32 %v6593_v60, %v11518_v18  ;;  %v6613_v36 = vmul.f32 %v6593_v60, %v11527_v5 }
 0x5bc   : > { %v6614_v56 = vmul.f32 %v6593_v60, %v11536_v37  ;;  %v6619_v59 = vmul.f32 %v6593_v60, %v11567_v57  ;;  %v6620_v49 = vmul.f32 %v6593_v60, %v11576_v29  ;;  %v6622_v14 = vperm.slane %v6591_v7, 0 }
 0x5bd   : > { %v6615_v55 = vmul.f32 %v6593_v60, %v11545_v28  ;;  %v6616_v34 = vmul.f32 %v6593_v60, %v11551_v46  ;;  %v6617_v1 = vmul.f32 %v6593_v60, %v11556_v0  ;;  %v6618_v35 = vmul.f32 %v6593_v60, %v11561_v20 }
 0x5be   : > { %v6624_v54 = vadd.f32 %v6622_v14, %v6595_v48  ;;  %v6625_v18 = vadd.f32 %v6622_v14, %v6596_v22  ;;  %v6626_v12 = vadd.f32 %v6622_v14, %v6597_v40  ;;  %v6627_v5 = vadd.f32 %v6622_v14, %v6598_v51 }
 0x5bf   : > { %v6628_v39 = vadd.f32 %v6622_v14, %v6599_v30  ;;  %v6629_v37 = vadd.f32 %v6622_v14, %v6600_v19  ;;  %v6630_v9 = vadd.f32 %v6622_v14, %v6601_v8  ;;  %v6631_v57 = vadd.f32 %v6622_v14, %v6602_v47 }
 0x5c0   : > { %v6632_v62 = vadd.f32 %v6622_v14, %v6603_v25  ;;  %v6633_v29 = vadd.f32 %v6622_v14, %v6604_v21  ;;  %v6634_v50 = vadd.f32 %v6622_v14, %v6605_v38  ;;  %v6635_v15 = vadd.f32 %v6622_v14, %v6606_v63  ;;  %6650 = vst [vmem:[%s11620_s15] sm:$0xff] %v6624_v54 }
 0x5c1   : > { %v6636_v28 = vadd.f32 %v6622_v14, %v6607_v41  ;;  %v6637_v46 = vadd.f32 %v6622_v14, %v6608_v3  ;;  %v6638_v0 = vadd.f32 %v6622_v14, %v6609_v13  ;;  %v6639_v20 = vadd.f32 %v6622_v14, %v6610_v45  ;;  %6651 = vst [vmem:[%s11620_s15 + $0x8] sm:$0xff] %v6625_v18 }
 0x5c2   : > { %v6640_v26 = vadd.f32 %v6622_v14, %v6611_v10  ;;  %v6641_v24 = vadd.f32 %v6622_v14, %v6612_v53  ;;  %v6642_v6 = vadd.f32 %v6622_v14, %v6613_v36  ;;  %v6643_v27 = vadd.f32 %v6622_v14, %v6614_v56  ;;  %6652 = vst [vmem:[%s11620_s15 + $0x10] sm:$0xff] %v6626_v12 }
 0x5c3   : > { %v6644_v42 = vadd.f32 %v6622_v14, %v6615_v55  ;;  %v6645_v52 = vadd.f32 %v6622_v14, %v6616_v34  ;;  %v6646_v31 = vadd.f32 %v6622_v14, %v6617_v1  ;;  %v6647_v32 = vadd.f32 %v6622_v14, %v6618_v35  ;;  %6653 = vst [vmem:[%s11620_s15 + $0x18] sm:$0xff] %v6627_v5 }
 0x5c4   : > { %v6648_v16 = vadd.f32 %v6622_v14, %v6619_v59  ;;  %v6649_v61 = vadd.f32 %v6622_v14, %v6620_v49  ;;  %6654 = vst [vmem:[%s11620_s15 + $0x20] sm:$0xff] %v6628_v39 }
 0x5c5   : > { %6655 = vst [vmem:[%s11620_s15 + $0x28] sm:$0xff] %v6629_v37 }
 0x5c6   : > { %6656 = vst [vmem:[%s11620_s15 + $0x30] sm:$0xff] %v6630_v9 }
 0x5c7   : > { %6657 = vst [vmem:[%s11620_s15 + $0x38] sm:$0xff] %v6631_v57  ;;  %v6763_v17 = vld [vmem:[%s11620_s15] sm:$0xff] (%p8928_p5) }
 0x5c8   : > { %6658 = vst [vmem:[%s11620_s15 + $0x40] sm:$0xff] %v6632_v62  ;;  %v6765_v11 = vld [vmem:[%s11620_s15 + $0x8] sm:$0xff] (%p8928_p5) }
 0x5c9   : > { %6659 = vst [vmem:[%s11620_s15 + $0x48] sm:$0xff] %v6633_v29  ;;  %v6767_v2 = vld [vmem:[%s11620_s15 + $0x10] sm:$0xff] (%p8928_p5) }
 0x5ca   : > { %6660 = vst [vmem:[%s11620_s15 + $0x50] sm:$0xff] %v6634_v50  ;;  %v6769_v60 = vld [vmem:[%s11620_s15 + $0x18] sm:$0xff] (%p8928_p5) }
 0x5cb   : > { %6661 = vst [vmem:[%s11620_s15 + $0x58] sm:$0xff] %v6635_v15  ;;  %v6771_v7 = vld [vmem:[%s11620_s15 + $0x20] sm:$0xff] (%p8928_p5) }
 0x5cc   : > { %6662 = vst [vmem:[%s11620_s15 + $0x60] sm:$0xff] %v6636_v28  ;;  %v6773_v48 = vld [vmem:[%s11620_s15 + $0x28] sm:$0xff] (%p8928_p5) }
 0x5cd   : > { %6663 = vst [vmem:[%s11620_s15 + $0x68] sm:$0xff] %v6637_v46  ;;  %v6775_v22 = vld [vmem:[%s11620_s15 + $0x30] sm:$0xff] (%p8928_p5) }
 0x5ce   : > { %6664 = vst [vmem:[%s11620_s15 + $0x70] sm:$0xff] %v6638_v0  ;;  %v6777_v40 = vld [vmem:[%s11620_s15 + $0x38] sm:$0xff] (%p8928_p5) }
 0x5cf   : > { %6665 = vst [vmem:[%s11620_s15 + $0x78] sm:$0xff] %v6639_v20  ;;  %v6779_v23 = vld [vmem:[%s11620_s15 + $0x40] sm:$0xff] (%p8928_p5) }
 0x5d0   : > { %6666 = vst [vmem:[%s11620_s15 + $0x80] sm:$0xff] %v6640_v26  ;;  %v6781_v51 = vld [vmem:[%s11620_s15 + $0x48] sm:$0xff] (%p8928_p5) }
 0x5d1   : > { %6667 = vst [vmem:[%s11620_s15 + $0x88] sm:$0xff] %v6641_v24  ;;  %v6783_v58 = vld [vmem:[%s11620_s15 + $0x50] sm:$0xff] (%p8928_p5) }
 0x5d2   : > { %6668 = vst [vmem:[%s11620_s15 + $0x90] sm:$0xff] %v6642_v6  ;;  %v6785_v30 = vld [vmem:[%s11620_s15 + $0x58] sm:$0xff] (%p8928_p5) }
 0x5d3   : > { %6669 = vst [vmem:[%s11620_s15 + $0x98] sm:$0xff] %v6643_v27  ;;  %v6787_v4 = vld [vmem:[%s11620_s15 + $0x60] sm:$0xff] (%p8928_p5) }
 0x5d4   : > { %6670 = vst [vmem:[%s11620_s15 + $0xa0] sm:$0xff] %v6644_v42  ;;  %v6789_v19 = vld [vmem:[%s11620_s15 + $0x68] sm:$0xff] (%p8928_p5) }
 0x5d5   : > { %6671 = vst [vmem:[%s11620_s15 + $0xa8] sm:$0xff] %v6645_v52  ;;  %6682 = sbr.rel (!%p8928_p5) target bundleno = 1524 (0x5f4), region = 92  ;;  %v6791_v44 = vld [vmem:[%s11620_s15 + $0x70] sm:$0xff] (%p8928_p5) }
 0x5d6   : > { %6672 = vst [vmem:[%s11620_s15 + $0xb0] sm:$0xff] %v6646_v31  ;;  %v6793_v8 = vld [vmem:[%s11620_s15 + $0x78] sm:$0xff] (%p8928_p5) }
 0x5d7   : > { %6673 = vst [vmem:[%s11620_s15 + $0xb8] sm:$0xff] %v6647_v32  ;;  %v6795_v43 = vld [vmem:[%s11620_s15 + $0x80] sm:$0xff] (%p8928_p5) }
 0x5d8   : > { %6674 = vst [vmem:[%s11620_s15 + $0xc0] sm:$0xff] %v6648_v16  ;;  %v6797_v47 = vld [vmem:[%s11620_s15 + $0x88] sm:$0xff] (%p8928_p5) }
 0x5d9   : > { %6675 = vst [vmem:[%s11620_s15 + $0xc8] sm:$0xff] %v6649_v61  ;;  %v6799_v33 = vld [vmem:[%s11620_s15 + $0x90] sm:$0xff] (%p8928_p5) }
 0x5da   : > { %6764 = vst [vmem:[%s11656_s29] sm:$0xff] %v6763_v17  ;;  %v6801_v25 = vld [vmem:[%s11620_s15 + $0x98] sm:$0xff] }
 0x5db   : > { %6766 = vst [vmem:[%s11656_s29 + $0x10] sm:$0xff] %v6765_v11  ;;  %v6803_v21 = vld [vmem:[%s11620_s15 + $0xa0] sm:$0xff] }
 0x5dc   : > { %6768 = vst [vmem:[%s11656_s29 + $0x20] sm:$0xff] %v6767_v2  ;;  %v6805_v38 = vld [vmem:[%s11620_s15 + $0xa8] sm:$0xff] }
 0x5dd   : > { %6770 = vst [vmem:[%s11656_s29 + $0x30] sm:$0xff] %v6769_v60  ;;  %v6807_v63 = vld [vmem:[%s11620_s15 + $0xb0] sm:$0xff] }
 0x5de   : > { %6772 = vst [vmem:[%s11656_s29 + $0x40] sm:$0xff] %v6771_v7  ;;  %v6809_v41 = vld [vmem:[%s11620_s15 + $0xb8] sm:$0xff] }
 0x5df   : > { %6774 = vst [vmem:[%s11656_s29 + $0x50] sm:$0xff] %v6773_v48  ;;  %v6811_v3 = vld [vmem:[%s11620_s15 + $0xc0] sm:$0xff] }
 0x5e0   : > { %6776 = vst [vmem:[%s11656_s29 + $0x60] sm:$0xff] %v6775_v22  ;;  %v6813_v13 = vld [vmem:[%s11620_s15 + $0xc8] sm:$0xff] }
 0x5e1   : > { %6778 = vst [vmem:[%s11656_s29 + $0x70] sm:$0xff] %v6777_v40 }
 0x5e2   : > { %6780 = vst [vmem:[%s11656_s29 + $0x80] sm:$0xff] %v6779_v23 }
 0x5e3   : > { %6782 = vst [vmem:[%s11656_s29 + $0x90] sm:$0xff] %v6781_v51 }
 0x5e4   : > { %6784 = vst [vmem:[%s11656_s29 + $0xa0] sm:$0xff] %v6783_v58 }
 0x5e5   : > { %6786 = vst [vmem:[%s11656_s29 + $0xb0] sm:$0xff] %v6785_v30 }
 0x5e6   : > { %6788 = vst [vmem:[%s11656_s29 + $0xc0] sm:$0xff] %v6787_v4 }
 0x5e7   : > { %6790 = vst [vmem:[%s11656_s29 + $0xd0] sm:$0xff] %v6789_v19 }
 0x5e8   : > { %6792 = vst [vmem:[%s11656_s29 + $0xe0] sm:$0xff] %v6791_v44 }
 0x5e9   : > { %6794 = vst [vmem:[%s11656_s29 + $0xf0] sm:$0xff] %v6793_v8 }
 0x5ea   : > { %6796 = vst [vmem:[%s11656_s29 + $0x100] sm:$0xff] %v6795_v43 }
 0x5eb   : > { %6798 = vst [vmem:[%s11656_s29 + $0x110] sm:$0xff] %v6797_v47 }
 0x5ec   : > { %6800 = vst [vmem:[%s11656_s29 + $0x120] sm:$0xff] %v6799_v33 }
 0x5ed   : > { %6802 = vst [vmem:[%s11656_s29 + $0x130] sm:$0xff] %v6801_v25 }
 0x5ee   : > { %6804 = vst [vmem:[%s11656_s29 + $0x140] sm:$0xff] %v6803_v21 }
 0x5ef   : > { %6806 = vst [vmem:[%s11656_s29 + $0x150] sm:$0xff] %v6805_v38 }
 0x5f0   : > { %6808 = vst [vmem:[%s11656_s29 + $0x160] sm:$0xff] %v6807_v63 }
 0x5f1   : > { %6810 = vst [vmem:[%s11656_s29 + $0x170] sm:$0xff] %v6809_v41 }
 0x5f2   : > { %6812 = vst [vmem:[%s11656_s29 + $0x180] sm:$0xff] %v6811_v3 }
 0x5f3   : > { %6814 = vst [vmem:[%s11656_s29 + $0x190] sm:$0xff] %v6813_v13 }
 0x5f4 PF: > { %p11_p11 = scmp.ge.s32.totalorder %s8916_s19, 4   ;;  %s11742_s15 = smov %s8865_s16 }
 0x5f5   : > { %s11743_s16 = smov %s8926_s22  ;;  %s11744_s17 = smov %s8916_s19 }
 0x5f6   :  { %13 = sbr.rel (!%p11_p11) target bundleno = 2 (0x2), region = 171 }

</bundles_post_ra>
